<compile_context>
chip_gen: v6e
topology: v6e:2x2x1
jax: 0.10.0
libtpu: 0.0.40
codegen_flags: <defaults>
</compile_context>

<pallas_src>
import functools

import jax
import jax.numpy as jnp
from jax.experimental import pallas as pl
from jax.experimental.pallas import tpu as pltpu


def _round_up(x, m):
    return ((x + m - 1) // m) * m


def _pack_gates_ifog(w, H, HP, in_dim, in_pad):
    """w: (4H, in_dim) in PyTorch gate order (i,f,g,o).
    Returns (in_pad, 4*HP) bf16 with gate order (i,f,o,g), zero padded."""
    blocks = (w[0:H], w[H:2 * H], w[3 * H:4 * H], w[2 * H:3 * H])   # i, f, o, g
    out = jnp.zeros((4 * HP, in_pad), jnp.float32)
    for k, blk in enumerate(blocks):
        out = out.at[k * HP:k * HP + H, :in_dim].set(blk)
    return out.T.astype(jnp.bfloat16)


def _pack_bias_ifog(b, H, HP):
    """b: (4H,) in PyTorch gate order (i,f,g,o) -> (1, 4*HP) f32, gate order (i,f,o,g)."""
    blocks = (b[0:H], b[H:2 * H], b[3 * H:4 * H], b[2 * H:3 * H])
    out = jnp.zeros((4 * HP,), jnp.float32)
    for k, blk in enumerate(blocks):
        out = out.at[k * HP:k * HP + H].set(blk)
    return out.reshape(1, 4 * HP)


def _make_fused_lstm_fc_kernel(num_layers, T, BP, HP):
    has_seq = num_layers > 1
    # Partial-unroll factor for the serial time loop (full unroll for short T).
    unroll = T if T <= 16 else next(u for u in (8, 4, 2, 1) if T % u == 0)

    def kernel(*refs):
        idx = 0
        x_ref = refs[idx]; idx += 1
        layer_refs = []
        for _ in range(num_layers):
            layer_refs.append((refs[idx], refs[idx + 1], refs[idx + 2]))
            idx += 3
        wfc_ref = refs[idx]; idx += 1
        bfc_ref = refs[idx]; idx += 1
        out_ref = refs[idx]; idx += 1
        gx_scr = refs[idx]; idx += 1                 # (T*BP, 4HP) f32: hoisted gate pre-acts
        seq_scr = refs[idx] if has_seq else None     # (T*BP, HP) bf16: inter-layer sequence

        def sigm(z):
            # sigmoid via a single EUP tanh push; mul/add ride spare VALU slots.
            return 0.5 * jnp.tanh(0.5 * z) + 0.5

        h_last = None
        for layer, (wih_ref, whh_ref, b_ref) in enumerate(layer_refs):
            # Hoisted input projection for the whole sequence: one big bf16 MXU matmul.
            inp = x_ref[...] if layer == 0 else seq_scr[...]
            gx_scr[...] = (
                jnp.dot(inp, wih_ref[...], preferred_element_type=jnp.float32)
                + b_ref[...]
            )

            whh = whh_ref[...]                       # (HP, 4HP) bf16, loop invariant
            write_seq = has_seq and (layer != num_layers - 1)

            def one_step(t, h, c, whh=whh, write_seq=write_seq):
                row = pl.multiple_of(t * BP, BP)     # BP is a multiple of 8 -> sublane aligned
                gates = gx_scr[pl.ds(row, BP), :] + jnp.dot(
                    h.astype(jnp.bfloat16), whh, preferred_element_type=jnp.float32)
                # Gate order (i, f, o, g): sigmoid on one contiguous 3*HP block, tanh on last HP.
                sg = sigm(gates[:, 0:3 * HP])
                i_g = sg[:, 0 * HP:1 * HP]
                f_g = sg[:, 1 * HP:2 * HP]
                o_g = sg[:, 2 * HP:3 * HP]
                g_g = jnp.tanh(gates[:, 3 * HP:4 * HP])
                c = f_g * c + i_g * g_g
                h = o_g * jnp.tanh(c)
                if write_seq:
                    seq_scr[pl.ds(row, BP), :] = h.astype(jnp.bfloat16)
                return h, c

            h = jnp.zeros((BP, HP), jnp.float32)
            c = jnp.zeros((BP, HP), jnp.float32)
            if T <= 16:
                for t in range(T):                   # fully unrolled; h/c live in vregs
                    h, c = one_step(t, h, c)
            else:
                def chunk(ci, carry, one_step=one_step):
                    h, c = carry
                    for u in range(unroll):          # manual partial unroll inside the loop
                        h, c = one_step(ci * unroll + u, h, c)
                    return h, c
                h, c = jax.lax.fori_loop(0, T // unroll, chunk, (h, c))
            h_last = h

        # Fused FC head on the last layer's final hidden state.
        out_ref[...] = (
            jnp.dot(h_last.astype(jnp.bfloat16), wfc_ref[...],
                    preferred_element_type=jnp.float32)
            + bfc_ref[...]
        )

    return kernel


def lstm_fc_forward(x, packed_layers, w_fc_t, b_fc, hidden_pad, input_pad):
    """x: (B, T, D) f32.  packed_layers: [(w_ih_t (in_pad,4HP) bf16, w_hh_t (HP,4HP) bf16,
    bias (1,4HP) f32)] * L.  w_fc_t: (HP, O) bf16; b_fc: (1, O) f32.  Returns (B, O) f32."""
    B, T, D = x.shape
    HP = hidden_pad
    DP = input_pad
    O = w_fc_t.shape[1]
    num_layers = len(packed_layers)
    BP = _round_up(max(B, 8), 8)                    # sublane-aligned batch

    # Time-major, batch- and feature-padded, flattened: row = t*BP + b.  bf16 for the MXU.
    x_tm = jnp.swapaxes(x, 0, 1)                    # (T, B, D)
    x_tm = jnp.pad(x_tm, ((0, 0), (0, BP - B), (0, DP - D)))
    x2d = x_tm.reshape(T * BP, DP).astype(jnp.bfloat16)

    args = [x2d]
    for (w_ih_t, w_hh_t, bias) in packed_layers:
        args += [w_ih_t, w_hh_t, bias]
    args += [w_fc_t, b_fc]

    scratch = [pltpu.VMEM((T * BP, 4 * HP), jnp.float32)]        # hoisted gate pre-activations
    if num_layers > 1:
        scratch.append(pltpu.VMEM((T * BP, HP), jnp.bfloat16))   # inter-layer output sequence

    # Scoped-VMEM budget from the actual footprint (defaults of 16/32 MiB are too small at
    # realistic T/H); floor of 32 MiB keeps us legal on every generation incl. v7x (64 MiB).
    in_bytes = sum(int(a.size) * a.dtype.itemsize for a in args)
    scr_bytes = T * BP * 4 * HP * 4 + (T * BP * HP * 2 if num_layers > 1 else 0)
    out_bytes = BP * O * 4
    need = 2 * (in_bytes + out_bytes) + scr_bytes + (4 << 20)
    vmem_limit = int(min(max(need, 32 << 20), 100 << 20))

    out = pl.pallas_call(
        _make_fused_lstm_fc_kernel(num_layers, T, BP, HP),
        out_shape=jax.ShapeDtypeStruct((BP, O), jnp.float32),
        scratch_shapes=scratch,
        compiler_params=pltpu.CompilerParams(vmem_limit_bytes=vmem_limit),
    )(*args)
    return out[:B]


class LSTMModelPallas:
    """Mirrors the PyTorch LSTMModel forward (eval mode, h0 = c0 = 0)."""

    def __init__(self, input_size, hidden_size, num_layers, dropout, output_size=1, seed=0):
        del dropout  # training-only in nn.LSTM; no effect on the eval forward
        self.input_size = input_size
        self.hidden_size = hidden_size
        self.num_layers = num_layers
        self.output_size = output_size

        H = hidden_size
        HP = _round_up(H, 128)           # lane-aligned hidden dim
        DP = _round_up(input_size, 128)  # lane-aligned input dim
        self.HP, self.DP = HP, DP

        key = jax.random.PRNGKey(seed)
        k = 1.0 / jnp.sqrt(jnp.float32(H))  # PyTorch default uniform(-k, k)
        self.raw_layers = []     # PyTorch layout, gate order (i,f,g,o), f32 -- for the reference
        self.packed_layers = []  # kernel layout: gate order (i,f,o,g), lane-padded, bf16 weights
        for layer in range(num_layers):
            d_in = input_size if layer == 0 else H
            in_pad = DP if layer == 0 else HP
            key, k1, k2, k3, k4 = jax.random.split(key, 5)
            w_ih = jax.random.uniform(k1, (4 * H, d_in), jnp.float32, -k, k)
            w_hh = jax.random.uniform(k2, (4 * H, H), jnp.float32, -k, k)
            b_ih = jax.random.uniform(k3, (4 * H,), jnp.float32, -k, k)
            b_hh = jax.random.uniform(k4, (4 * H,), jnp.float32, -k, k)
            self.raw_layers.append((w_ih, w_hh, b_ih, b_hh))
            self.packed_layers.append((
                _pack_gates_ifog(w_ih, H, HP, d_in, in_pad),   # (in_pad, 4HP) bf16
                _pack_gates_ifog(w_hh, H, HP, H, HP),          # (HP, 4HP) bf16
                _pack_bias_ifog(b_ih + b_hh, H, HP),           # (1, 4HP) f32 (folded biases)
            ))

        key, kf1, kf2 = jax.random.split(key, 3)
        w_fc = jax.random.uniform(kf1, (output_size, H), jnp.float32, -k, k)
        b_fc = jax.random.uniform(kf2, (output_size,), jnp.float32, -k, k)
        self.raw_fc = (w_fc, b_fc)
        w_fc_p = jnp.zeros((output_size, HP), jnp.float32).at[:, :H].set(w_fc)
        self.w_fc_t = w_fc_p.T.astype(jnp.bfloat16)   # (HP, O)
        self.b_fc = b_fc.reshape(1, output_size)

    @functools.partial(jax.jit, static_argnums=0)
    def __call__(self, x):
        # x: (B, T, input_size). h0 = c0 = 0, dropout inactive (eval).
        return lstm_fc_forward(x, self.packed_layers, self.w_fc_t, self.b_fc, self.HP, self.DP)


def _lstm_reference(x, raw_layers, raw_fc):
    """Pure-JAX f32 reference with PyTorch gate order/layout (correctness check)."""
    B, T, _ = x.shape
    out = x
    for (w_ih, w_hh, b_ih, b_hh) in raw_layers:
        H = w_hh.shape[1]
        h = jnp.zeros((B, H), jnp.float32)
        c = jnp.zeros((B, H), jnp.float32)
        ys = []
        for t in range(T):
            gates = out[:, t, :] @ w_ih.T + h @ w_hh.T + b_ih + b_hh
            i = jax.nn.sigmoid(gates[:, 0 * H:1 * H])
            f = jax.nn.sigmoid(gates[:, 1 * H:2 * H])
            g = jnp.tanh(gates[:, 2 * H:3 * H])
            o = jax.nn.sigmoid(gates[:, 3 * H:4 * H])
            c = f * c + i * g
            h = o * jnp.tanh(c)
            ys.append(h)
        out = jnp.stack(ys, axis=1)
    w_fc, b_fc = raw_fc
    return out[:, -1, :] @ w_fc.T + b_fc


if __name__ == "__main__":
    B, T, D, H, L = 4, 8, 16, 32, 2

    model = LSTMModelPallas(input_size=D, hidden_size=H, num_layers=L, dropout=0.1,
                            output_size=1, seed=0)

    x = jax.random.normal(jax.random.PRNGKey(0), (B, T, D), dtype=jnp.float32)
    y = model(x)
    jax.block_until_ready(y)
    assert y.shape == (B, 1), y.shape

    y_ref = _lstm_reference(x, model.raw_layers, model.raw_fc)
    err = float(jnp.max(jnp.abs(y - y_ref)))
    # bf16 matmul operands vs. full-f32 reference -> small but nonzero drift.
    assert err < 5e-2, (err, y, y_ref)

    print("KERNEL_OK")
</pallas_src>

<mosaic_0001>
module attributes {stable_mosaic.version = 11 : i64} {
  func.func @kernel(%arg0: memref<64x128xbf16, #tpu.memory_space<vmem>>, %arg1: memref<128x512xbf16, #tpu.memory_space<vmem>>, %arg2: memref<128x512xbf16, #tpu.memory_space<vmem>>, %arg3: memref<1x512xf32, #tpu.memory_space<vmem>>, %arg4: memref<128x512xbf16, #tpu.memory_space<vmem>>, %arg5: memref<128x512xbf16, #tpu.memory_space<vmem>>, %arg6: memref<1x512xf32, #tpu.memory_space<vmem>>, %arg7: memref<128x1xbf16, #tpu.memory_space<vmem>>, %arg8: memref<1x1xf32, #tpu.memory_space<vmem>>, %arg9: memref<8x1xf32, #tpu.memory_space<vmem>>, %arg10: memref<64x512xf32, #tpu.memory_space<vmem>>, %arg11: memref<64x128xbf16, #tpu.memory_space<vmem>>) attributes {dimension_semantics = [], scalar_prefetch = 0 : i64, scratch_operands = 2 : i64, tpu.core_type = #tpu.core_type<tc>} {
    %c0 = arith.constant 0 : index
    %c0_0 = arith.constant 0 : index
    %0 = vector.load %arg0[%c0, %c0_0] : memref<64x128xbf16, #tpu.memory_space<vmem>>, vector<64x128xbf16>
    %c0_1 = arith.constant 0 : index
    %c0_2 = arith.constant 0 : index
    %1 = vector.load %arg1[%c0_1, %c0_2] : memref<128x512xbf16, #tpu.memory_space<vmem>>, vector<128x512xbf16>
    %cst = arith.constant dense<0.000000e+00> : vector<64x512xf32>
    %2 = tpu.matmul %0, %1, %cst {dimension_numbers = #tpu.dot_dimension_numbers<[1], [0], [0], [1], [0, 0, 1, 1], [], []>} : vector<64x128xbf16>, vector<128x512xbf16>, vector<64x512xf32> -> vector<64x512xf32>
    %c0_3 = arith.constant 0 : index
    %c0_4 = arith.constant 0 : index
    %3 = vector.load %arg3[%c0_3, %c0_4] : memref<1x512xf32, #tpu.memory_space<vmem>>, vector<1x512xf32>
    %4 = vector.broadcast %3 : vector<1x512xf32> to vector<64x512xf32>
    %5 = arith.addf %2, %4 : vector<64x512xf32>
    %c0_5 = arith.constant 0 : index
    %c0_6 = arith.constant 0 : index
    %6 = vector.load %arg10[%c0_5, %c0_6] : memref<64x512xf32, #tpu.memory_space<vmem>>, vector<64x512xf32>
    tpu.vector_store %arg10[%c0_5, %c0_6], %5 {strides = array<i32>} : memref<64x512xf32, #tpu.memory_space<vmem>>, vector<64x512xf32>,
    %c0_7 = arith.constant 0 : index
    %c0_8 = arith.constant 0 : index
    %7 = vector.load %arg2[%c0_7, %c0_8] : memref<128x512xbf16, #tpu.memory_space<vmem>>, vector<128x512xbf16>
    %cst_9 = arith.constant 0.000000e+00 : f32
    %8 = vector.broadcast %cst_9 : f32 to vector<8x128xf32>
    %cst_10 = arith.constant 0.000000e+00 : f32
    %9 = vector.broadcast %cst_10 : f32 to vector<8x128xf32>
    %c0_i32 = arith.constant 0 : i32
    %10 = tpu.assume_multiple %c0_i32, 8 : i32
    %11 = arith.index_cast %10 : i32 to index
    %c0_11 = arith.constant 0 : index
    %12 = vector.load %arg10[%11, %c0_11] : memref<64x512xf32, #tpu.memory_space<vmem>>, vector<8x512xf32>
    %13 = arith.truncf %8 : vector<8x128xf32> to vector<8x128xbf16>
    %cst_12 = arith.constant dense<0.000000e+00> : vector<8x512xf32>
    %14 = tpu.matmul %13, %7, %cst_12 {dimension_numbers = #tpu.dot_dimension_numbers<[1], [0], [0], [1], [0, 0, 1, 1], [], []>} : vector<8x128xbf16>, vector<128x512xbf16>, vector<8x512xf32> -> vector<8x512xf32>
    %15 = arith.addf %12, %14 : vector<8x512xf32>
    %16 = vector.extract_strided_slice %15 {offsets = [0, 0], sizes = [8, 384], strides = [1, 1]} : vector<8x512xf32> to vector<8x384xf32>
    %cst_13 = arith.constant 5.000000e-01 : f32
    %17 = vector.broadcast %cst_13 : f32 to vector<8x384xf32>
    %18 = arith.mulf %17, %16 : vector<8x384xf32>
    %19 = math.tanh %18 : vector<8x384xf32>
    %cst_14 = arith.constant 5.000000e-01 : f32
    %20 = vector.broadcast %cst_14 : f32 to vector<8x384xf32>
    %21 = arith.mulf %20, %19 : vector<8x384xf32>
    %cst_15 = arith.constant 5.000000e-01 : f32
    %22 = vector.broadcast %cst_15 : f32 to vector<8x384xf32>
    %23 = arith.addf %21, %22 : vector<8x384xf32>
    %24 = vector.extract_strided_slice %23 {offsets = [0, 0], sizes = [8, 128], strides = [1, 1]} : vector<8x384xf32> to vector<8x128xf32>
    %25 = vector.extract_strided_slice %23 {offsets = [0, 128], sizes = [8, 128], strides = [1, 1]} : vector<8x384xf32> to vector<8x128xf32>
    %26 = vector.extract_strided_slice %23 {offsets = [0, 256], sizes = [8, 128], strides = [1, 1]} : vector<8x384xf32> to vector<8x128xf32>
    %27 = vector.extract_strided_slice %15 {offsets = [0, 384], sizes = [8, 128], strides = [1, 1]} : vector<8x512xf32> to vector<8x128xf32>
    %28 = math.tanh %27 : vector<8x128xf32>
    %29 = arith.mulf %25, %9 : vector<8x128xf32>
    %30 = arith.mulf %24, %28 : vector<8x128xf32>
    %31 = arith.addf %29, %30 : vector<8x128xf32>
    %32 = math.tanh %31 : vector<8x128xf32>
    %33 = arith.mulf %26, %32 : vector<8x128xf32>
    %34 = arith.truncf %33 : vector<8x128xf32> to vector<8x128xbf16>
    %35 = arith.index_cast %10 : i32 to index
    %c0_16 = arith.constant 0 : index
    %36 = vector.load %arg11[%35, %c0_16] : memref<64x128xbf16, #tpu.memory_space<vmem>>, vector<8x128xbf16>
    tpu.vector_store %arg11[%35, %c0_16], %34 {strides = array<i32>} : memref<64x128xbf16, #tpu.memory_space<vmem>>, vector<8x128xbf16>,
    %c8_i32 = arith.constant 8 : i32
    %37 = tpu.assume_multiple %c8_i32, 8 : i32
    %38 = arith.index_cast %37 : i32 to index
    %c0_17 = arith.constant 0 : index
    %39 = vector.load %arg10[%38, %c0_17] : memref<64x512xf32, #tpu.memory_space<vmem>>, vector<8x512xf32>
    %40 = arith.truncf %33 : vector<8x128xf32> to vector<8x128xbf16>
    %cst_18 = arith.constant dense<0.000000e+00> : vector<8x512xf32>
    %41 = tpu.matmul %40, %7, %cst_18 {dimension_numbers = #tpu.dot_dimension_numbers<[1], [0], [0], [1], [0, 0, 1, 1], [], []>} : vector<8x128xbf16>, vector<128x512xbf16>, vector<8x512xf32> -> vector<8x512xf32>
    %42 = arith.addf %39, %41 : vector<8x512xf32>
    %43 = vector.extract_strided_slice %42 {offsets = [0, 0], sizes = [8, 384], strides = [1, 1]} : vector<8x512xf32> to vector<8x384xf32>
    %cst_19 = arith.constant 5.000000e-01 : f32
    %44 = vector.broadcast %cst_19 : f32 to vector<8x384xf32>
    %45 = arith.mulf %44, %43 : vector<8x384xf32>
    %46 = math.tanh %45 : vector<8x384xf32>
    %cst_20 = arith.constant 5.000000e-01 : f32
    %47 = vector.broadcast %cst_20 : f32 to vector<8x384xf32>
    %48 = arith.mulf %47, %46 : vector<8x384xf32>
    %cst_21 = arith.constant 5.000000e-01 : f32
    %49 = vector.broadcast %cst_21 : f32 to vector<8x384xf32>
    %50 = arith.addf %48, %49 : vector<8x384xf32>
    %51 = vector.extract_strided_slice %50 {offsets = [0, 0], sizes = [8, 128], strides = [1, 1]} : vector<8x384xf32> to vector<8x128xf32>
    %52 = vector.extract_strided_slice %50 {offsets = [0, 128], sizes = [8, 128], strides = [1, 1]} : vector<8x384xf32> to vector<8x128xf32>
    %53 = vector.extract_strided_slice %50 {offsets = [0, 256], sizes = [8, 128], strides = [1, 1]} : vector<8x384xf32> to vector<8x128xf32>
    %54 = vector.extract_strided_slice %42 {offsets = [0, 384], sizes = [8, 128], strides = [1, 1]} : vector<8x512xf32> to vector<8x128xf32>
    %55 = math.tanh %54 : vector<8x128xf32>
    %56 = arith.mulf %52, %31 : vector<8x128xf32>
    %57 = arith.mulf %51, %55 : vector<8x128xf32>
    %58 = arith.addf %56, %57 : vector<8x128xf32>
    %59 = math.tanh %58 : vector<8x128xf32>
    %60 = arith.mulf %53, %59 : vector<8x128xf32>
    %61 = arith.truncf %60 : vector<8x128xf32> to vector<8x128xbf16>
    %62 = arith.index_cast %37 : i32 to index
    %c0_22 = arith.constant 0 : index
    %63 = vector.load %arg11[%62, %c0_22] : memref<64x128xbf16, #tpu.memory_space<vmem>>, vector<8x128xbf16>
    tpu.vector_store %arg11[%62, %c0_22], %61 {strides = array<i32>} : memref<64x128xbf16, #tpu.memory_space<vmem>>, vector<8x128xbf16>,
    %c16_i32 = arith.constant 16 : i32
    %64 = tpu.assume_multiple %c16_i32, 8 : i32
    %65 = arith.index_cast %64 : i32 to index
    %c0_23 = arith.constant 0 : index
    %66 = vector.load %arg10[%65, %c0_23] : memref<64x512xf32, #tpu.memory_space<vmem>>, vector<8x512xf32>
    %67 = arith.truncf %60 : vector<8x128xf32> to vector<8x128xbf16>
    %cst_24 = arith.constant dense<0.000000e+00> : vector<8x512xf32>
    %68 = tpu.matmul %67, %7, %cst_24 {dimension_numbers = #tpu.dot_dimension_numbers<[1], [0], [0], [1], [0, 0, 1, 1], [], []>} : vector<8x128xbf16>, vector<128x512xbf16>, vector<8x512xf32> -> vector<8x512xf32>
    %69 = arith.addf %66, %68 : vector<8x512xf32>
    %70 = vector.extract_strided_slice %69 {offsets = [0, 0], sizes = [8, 384], strides = [1, 1]} : vector<8x512xf32> to vector<8x384xf32>
    %cst_25 = arith.constant 5.000000e-01 : f32
    %71 = vector.broadcast %cst_25 : f32 to vector<8x384xf32>
    %72 = arith.mulf %71, %70 : vector<8x384xf32>
    %73 = math.tanh %72 : vector<8x384xf32>
    %cst_26 = arith.constant 5.000000e-01 : f32
    %74 = vector.broadcast %cst_26 : f32 to vector<8x384xf32>
    %75 = arith.mulf %74, %73 : vector<8x384xf32>
    %cst_27 = arith.constant 5.000000e-01 : f32
    %76 = vector.broadcast %cst_27 : f32 to vector<8x384xf32>
    %77 = arith.addf %75, %76 : vector<8x384xf32>
    %78 = vector.extract_strided_slice %77 {offsets = [0, 0], sizes = [8, 128], strides = [1, 1]} : vector<8x384xf32> to vector<8x128xf32>
    %79 = vector.extract_strided_slice %77 {offsets = [0, 128], sizes = [8, 128], strides = [1, 1]} : vector<8x384xf32> to vector<8x128xf32>
    %80 = vector.extract_strided_slice %77 {offsets = [0, 256], sizes = [8, 128], strides = [1, 1]} : vector<8x384xf32> to vector<8x128xf32>
    %81 = vector.extract_strided_slice %69 {offsets = [0, 384], sizes = [8, 128], strides = [1, 1]} : vector<8x512xf32> to vector<8x128xf32>
    %82 = math.tanh %81 : vector<8x128xf32>
    %83 = arith.mulf %79, %58 : vector<8x128xf32>
    %84 = arith.mulf %78, %82 : vector<8x128xf32>
    %85 = arith.addf %83, %84 : vector<8x128xf32>
    %86 = math.tanh %85 : vector<8x128xf32>
    %87 = arith.mulf %80, %86 : vector<8x128xf32>
    %88 = arith.truncf %87 : vector<8x128xf32> to vector<8x128xbf16>
    %89 = arith.index_cast %64 : i32 to index
    %c0_28 = arith.constant 0 : index
    %90 = vector.load %arg11[%89, %c0_28] : memref<64x128xbf16, #tpu.memory_space<vmem>>, vector<8x128xbf16>
    tpu.vector_store %arg11[%89, %c0_28], %88 {strides = array<i32>} : memref<64x128xbf16, #tpu.memory_space<vmem>>, vector<8x128xbf16>,
    %c24_i32 = arith.constant 24 : i32
    %91 = tpu.assume_multiple %c24_i32, 8 : i32
    %92 = arith.index_cast %91 : i32 to index
    %c0_29 = arith.constant 0 : index
    %93 = vector.load %arg10[%92, %c0_29] : memref<64x512xf32, #tpu.memory_space<vmem>>, vector<8x512xf32>
    %94 = arith.truncf %87 : vector<8x128xf32> to vector<8x128xbf16>
    %cst_30 = arith.constant dense<0.000000e+00> : vector<8x512xf32>
    %95 = tpu.matmul %94, %7, %cst_30 {dimension_numbers = #tpu.dot_dimension_numbers<[1], [0], [0], [1], [0, 0, 1, 1], [], []>} : vector<8x128xbf16>, vector<128x512xbf16>, vector<8x512xf32> -> vector<8x512xf32>
    %96 = arith.addf %93, %95 : vector<8x512xf32>
    %97 = vector.extract_strided_slice %96 {offsets = [0, 0], sizes = [8, 384], strides = [1, 1]} : vector<8x512xf32> to vector<8x384xf32>
    %cst_31 = arith.constant 5.000000e-01 : f32
    %98 = vector.broadcast %cst_31 : f32 to vector<8x384xf32>
    %99 = arith.mulf %98, %97 : vector<8x384xf32>
    %100 = math.tanh %99 : vector<8x384xf32>
    %cst_32 = arith.constant 5.000000e-01 : f32
    %101 = vector.broadcast %cst_32 : f32 to vector<8x384xf32>
    %102 = arith.mulf %101, %100 : vector<8x384xf32>
    %cst_33 = arith.constant 5.000000e-01 : f32
    %103 = vector.broadcast %cst_33 : f32 to vector<8x384xf32>
    %104 = arith.addf %102, %103 : vector<8x384xf32>
    %105 = vector.extract_strided_slice %104 {offsets = [0, 0], sizes = [8, 128], strides = [1, 1]} : vector<8x384xf32> to vector<8x128xf32>
    %106 = vector.extract_strided_slice %104 {offsets = [0, 128], sizes = [8, 128], strides = [1, 1]} : vector<8x384xf32> to vector<8x128xf32>
    %107 = vector.extract_strided_slice %104 {offsets = [0, 256], sizes = [8, 128], strides = [1, 1]} : vector<8x384xf32> to vector<8x128xf32>
    %108 = vector.extract_strided_slice %96 {offsets = [0, 384], sizes = [8, 128], strides = [1, 1]} : vector<8x512xf32> to vector<8x128xf32>
    %109 = math.tanh %108 : vector<8x128xf32>
    %110 = arith.mulf %106, %85 : vector<8x128xf32>
    %111 = arith.mulf %105, %109 : vector<8x128xf32>
    %112 = arith.addf %110, %111 : vector<8x128xf32>
    %113 = math.tanh %112 : vector<8x128xf32>
    %114 = arith.mulf %107, %113 : vector<8x128xf32>
    %115 = arith.truncf %114 : vector<8x128xf32> to vector<8x128xbf16>
    %116 = arith.index_cast %91 : i32 to index
    %c0_34 = arith.constant 0 : index
    %117 = vector.load %arg11[%116, %c0_34] : memref<64x128xbf16, #tpu.memory_space<vmem>>, vector<8x128xbf16>
    tpu.vector_store %arg11[%116, %c0_34], %115 {strides = array<i32>} : memref<64x128xbf16, #tpu.memory_space<vmem>>, vector<8x128xbf16>,
    %c32_i32 = arith.constant 32 : i32
    %118 = tpu.assume_multiple %c32_i32, 8 : i32
    %119 = arith.index_cast %118 : i32 to index
    %c0_35 = arith.constant 0 : index
    %120 = vector.load %arg10[%119, %c0_35] : memref<64x512xf32, #tpu.memory_space<vmem>>, vector<8x512xf32>
    %121 = arith.truncf %114 : vector<8x128xf32> to vector<8x128xbf16>
    %cst_36 = arith.constant dense<0.000000e+00> : vector<8x512xf32>
    %122 = tpu.matmul %121, %7, %cst_36 {dimension_numbers = #tpu.dot_dimension_numbers<[1], [0], [0], [1], [0, 0, 1, 1], [], []>} : vector<8x128xbf16>, vector<128x512xbf16>, vector<8x512xf32> -> vector<8x512xf32>
    %123 = arith.addf %120, %122 : vector<8x512xf32>
    %124 = vector.extract_strided_slice %123 {offsets = [0, 0], sizes = [8, 384], strides = [1, 1]} : vector<8x512xf32> to vector<8x384xf32>
    %cst_37 = arith.constant 5.000000e-01 : f32
    %125 = vector.broadcast %cst_37 : f32 to vector<8x384xf32>
    %126 = arith.mulf %125, %124 : vector<8x384xf32>
    %127 = math.tanh %126 : vector<8x384xf32>
    %cst_38 = arith.constant 5.000000e-01 : f32
    %128 = vector.broadcast %cst_38 : f32 to vector<8x384xf32>
    %129 = arith.mulf %128, %127 : vector<8x384xf32>
    %cst_39 = arith.constant 5.000000e-01 : f32
    %130 = vector.broadcast %cst_39 : f32 to vector<8x384xf32>
    %131 = arith.addf %129, %130 : vector<8x384xf32>
    %132 = vector.extract_strided_slice %131 {offsets = [0, 0], sizes = [8, 128], strides = [1, 1]} : vector<8x384xf32> to vector<8x128xf32>
    %133 = vector.extract_strided_slice %131 {offsets = [0, 128], sizes = [8, 128], strides = [1, 1]} : vector<8x384xf32> to vector<8x128xf32>
    %134 = vector.extract_strided_slice %131 {offsets = [0, 256], sizes = [8, 128], strides = [1, 1]} : vector<8x384xf32> to vector<8x128xf32>
    %135 = vector.extract_strided_slice %123 {offsets = [0, 384], sizes = [8, 128], strides = [1, 1]} : vector<8x512xf32> to vector<8x128xf32>
    %136 = math.tanh %135 : vector<8x128xf32>
    %137 = arith.mulf %133, %112 : vector<8x128xf32>
    %138 = arith.mulf %132, %136 : vector<8x128xf32>
    %139 = arith.addf %137, %138 : vector<8x128xf32>
    %140 = math.tanh %139 : vector<8x128xf32>
    %141 = arith.mulf %134, %140 : vector<8x128xf32>
    %142 = arith.truncf %141 : vector<8x128xf32> to vector<8x128xbf16>
    %143 = arith.index_cast %118 : i32 to index
    %c0_40 = arith.constant 0 : index
    %144 = vector.load %arg11[%143, %c0_40] : memref<64x128xbf16, #tpu.memory_space<vmem>>, vector<8x128xbf16>
    tpu.vector_store %arg11[%143, %c0_40], %142 {strides = array<i32>} : memref<64x128xbf16, #tpu.memory_space<vmem>>, vector<8x128xbf16>,
    %c40_i32 = arith.constant 40 : i32
    %145 = tpu.assume_multiple %c40_i32, 8 : i32
    %146 = arith.index_cast %145 : i32 to index
    %c0_41 = arith.constant 0 : index
    %147 = vector.load %arg10[%146, %c0_41] : memref<64x512xf32, #tpu.memory_space<vmem>>, vector<8x512xf32>
    %148 = arith.truncf %141 : vector<8x128xf32> to vector<8x128xbf16>
    %cst_42 = arith.constant dense<0.000000e+00> : vector<8x512xf32>
    %149 = tpu.matmul %148, %7, %cst_42 {dimension_numbers = #tpu.dot_dimension_numbers<[1], [0], [0], [1], [0, 0, 1, 1], [], []>} : vector<8x128xbf16>, vector<128x512xbf16>, vector<8x512xf32> -> vector<8x512xf32>
    %150 = arith.addf %147, %149 : vector<8x512xf32>
    %151 = vector.extract_strided_slice %150 {offsets = [0, 0], sizes = [8, 384], strides = [1, 1]} : vector<8x512xf32> to vector<8x384xf32>
    %cst_43 = arith.constant 5.000000e-01 : f32
    %152 = vector.broadcast %cst_43 : f32 to vector<8x384xf32>
    %153 = arith.mulf %152, %151 : vector<8x384xf32>
    %154 = math.tanh %153 : vector<8x384xf32>
    %cst_44 = arith.constant 5.000000e-01 : f32
    %155 = vector.broadcast %cst_44 : f32 to vector<8x384xf32>
    %156 = arith.mulf %155, %154 : vector<8x384xf32>
    %cst_45 = arith.constant 5.000000e-01 : f32
    %157 = vector.broadcast %cst_45 : f32 to vector<8x384xf32>
    %158 = arith.addf %156, %157 : vector<8x384xf32>
    %159 = vector.extract_strided_slice %158 {offsets = [0, 0], sizes = [8, 128], strides = [1, 1]} : vector<8x384xf32> to vector<8x128xf32>
    %160 = vector.extract_strided_slice %158 {offsets = [0, 128], sizes = [8, 128], strides = [1, 1]} : vector<8x384xf32> to vector<8x128xf32>
    %161 = vector.extract_strided_slice %158 {offsets = [0, 256], sizes = [8, 128], strides = [1, 1]} : vector<8x384xf32> to vector<8x128xf32>
    %162 = vector.extract_strided_slice %150 {offsets = [0, 384], sizes = [8, 128], strides = [1, 1]} : vector<8x512xf32> to vector<8x128xf32>
    %163 = math.tanh %162 : vector<8x128xf32>
    %164 = arith.mulf %160, %139 : vector<8x128xf32>
    %165 = arith.mulf %159, %163 : vector<8x128xf32>
    %166 = arith.addf %164, %165 : vector<8x128xf32>
    %167 = math.tanh %166 : vector<8x128xf32>
    %168 = arith.mulf %161, %167 : vector<8x128xf32>
    %169 = arith.truncf %168 : vector<8x128xf32> to vector<8x128xbf16>
    %170 = arith.index_cast %145 : i32 to index
    %c0_46 = arith.constant 0 : index
    %171 = vector.load %arg11[%170, %c0_46] : memref<64x128xbf16, #tpu.memory_space<vmem>>, vector<8x128xbf16>
    tpu.vector_store %arg11[%170, %c0_46], %169 {strides = array<i32>} : memref<64x128xbf16, #tpu.memory_space<vmem>>, vector<8x128xbf16>,
    %c48_i32 = arith.constant 48 : i32
    %172 = tpu.assume_multiple %c48_i32, 8 : i32
    %173 = arith.index_cast %172 : i32 to index
    %c0_47 = arith.constant 0 : index
    %174 = vector.load %arg10[%173, %c0_47] : memref<64x512xf32, #tpu.memory_space<vmem>>, vector<8x512xf32>
    %175 = arith.truncf %168 : vector<8x128xf32> to vector<8x128xbf16>
    %cst_48 = arith.constant dense<0.000000e+00> : vector<8x512xf32>
    %176 = tpu.matmul %175, %7, %cst_48 {dimension_numbers = #tpu.dot_dimension_numbers<[1], [0], [0], [1], [0, 0, 1, 1], [], []>} : vector<8x128xbf16>, vector<128x512xbf16>, vector<8x512xf32> -> vector<8x512xf32>
    %177 = arith.addf %174, %176 : vector<8x512xf32>
    %178 = vector.extract_strided_slice %177 {offsets = [0, 0], sizes = [8, 384], strides = [1, 1]} : vector<8x512xf32> to vector<8x384xf32>
    %cst_49 = arith.constant 5.000000e-01 : f32
    %179 = vector.broadcast %cst_49 : f32 to vector<8x384xf32>
    %180 = arith.mulf %179, %178 : vector<8x384xf32>
    %181 = math.tanh %180 : vector<8x384xf32>
    %cst_50 = arith.constant 5.000000e-01 : f32
    %182 = vector.broadcast %cst_50 : f32 to vector<8x384xf32>
    %183 = arith.mulf %182, %181 : vector<8x384xf32>
    %cst_51 = arith.constant 5.000000e-01 : f32
    %184 = vector.broadcast %cst_51 : f32 to vector<8x384xf32>
    %185 = arith.addf %183, %184 : vector<8x384xf32>
    %186 = vector.extract_strided_slice %185 {offsets = [0, 0], sizes = [8, 128], strides = [1, 1]} : vector<8x384xf32> to vector<8x128xf32>
    %187 = vector.extract_strided_slice %185 {offsets = [0, 128], sizes = [8, 128], strides = [1, 1]} : vector<8x384xf32> to vector<8x128xf32>
    %188 = vector.extract_strided_slice %185 {offsets = [0, 256], sizes = [8, 128], strides = [1, 1]} : vector<8x384xf32> to vector<8x128xf32>
    %189 = vector.extract_strided_slice %177 {offsets = [0, 384], sizes = [8, 128], strides = [1, 1]} : vector<8x512xf32> to vector<8x128xf32>
    %190 = math.tanh %189 : vector<8x128xf32>
    %191 = arith.mulf %187, %166 : vector<8x128xf32>
    %192 = arith.mulf %186, %190 : vector<8x128xf32>
    %193 = arith.addf %191, %192 : vector<8x128xf32>
    %194 = math.tanh %193 : vector<8x128xf32>
    %195 = arith.mulf %188, %194 : vector<8x128xf32>
    %196 = arith.truncf %195 : vector<8x128xf32> to vector<8x128xbf16>
    %197 = arith.index_cast %172 : i32 to index
    %c0_52 = arith.constant 0 : index
    %198 = vector.load %arg11[%197, %c0_52] : memref<64x128xbf16, #tpu.memory_space<vmem>>, vector<8x128xbf16>
    tpu.vector_store %arg11[%197, %c0_52], %196 {strides = array<i32>} : memref<64x128xbf16, #tpu.memory_space<vmem>>, vector<8x128xbf16>,
    %c56_i32 = arith.constant 56 : i32
    %199 = tpu.assume_multiple %c56_i32, 8 : i32
    %200 = arith.index_cast %199 : i32 to index
    %c0_53 = arith.constant 0 : index
    %201 = vector.load %arg10[%200, %c0_53] : memref<64x512xf32, #tpu.memory_space<vmem>>, vector<8x512xf32>
    %202 = arith.truncf %195 : vector<8x128xf32> to vector<8x128xbf16>
    %cst_54 = arith.constant dense<0.000000e+00> : vector<8x512xf32>
    %203 = tpu.matmul %202, %7, %cst_54 {dimension_numbers = #tpu.dot_dimension_numbers<[1], [0], [0], [1], [0, 0, 1, 1], [], []>} : vector<8x128xbf16>, vector<128x512xbf16>, vector<8x512xf32> -> vector<8x512xf32>
    %204 = arith.addf %201, %203 : vector<8x512xf32>
    %205 = vector.extract_strided_slice %204 {offsets = [0, 0], sizes = [8, 384], strides = [1, 1]} : vector<8x512xf32> to vector<8x384xf32>
    %cst_55 = arith.constant 5.000000e-01 : f32
    %206 = vector.broadcast %cst_55 : f32 to vector<8x384xf32>
    %207 = arith.mulf %206, %205 : vector<8x384xf32>
    %208 = math.tanh %207 : vector<8x384xf32>
    %cst_56 = arith.constant 5.000000e-01 : f32
    %209 = vector.broadcast %cst_56 : f32 to vector<8x384xf32>
    %210 = arith.mulf %209, %208 : vector<8x384xf32>
    %cst_57 = arith.constant 5.000000e-01 : f32
    %211 = vector.broadcast %cst_57 : f32 to vector<8x384xf32>
    %212 = arith.addf %210, %211 : vector<8x384xf32>
    %213 = vector.extract_strided_slice %212 {offsets = [0, 0], sizes = [8, 128], strides = [1, 1]} : vector<8x384xf32> to vector<8x128xf32>
    %214 = vector.extract_strided_slice %212 {offsets = [0, 128], sizes = [8, 128], strides = [1, 1]} : vector<8x384xf32> to vector<8x128xf32>
    %215 = vector.extract_strided_slice %212 {offsets = [0, 256], sizes = [8, 128], strides = [1, 1]} : vector<8x384xf32> to vector<8x128xf32>
    %216 = vector.extract_strided_slice %204 {offsets = [0, 384], sizes = [8, 128], strides = [1, 1]} : vector<8x512xf32> to vector<8x128xf32>
    %217 = math.tanh %216 : vector<8x128xf32>
    %218 = arith.mulf %214, %193 : vector<8x128xf32>
    %219 = arith.mulf %213, %217 : vector<8x128xf32>
    %220 = arith.addf %218, %219 : vector<8x128xf32>
    %221 = math.tanh %220 : vector<8x128xf32>
    %222 = arith.mulf %215, %221 : vector<8x128xf32>
    %223 = arith.truncf %222 : vector<8x128xf32> to vector<8x128xbf16>
    %224 = arith.index_cast %199 : i32 to index
    %c0_58 = arith.constant 0 : index
    %225 = vector.load %arg11[%224, %c0_58] : memref<64x128xbf16, #tpu.memory_space<vmem>>, vector<8x128xbf16>
    tpu.vector_store %arg11[%224, %c0_58], %223 {strides = array<i32>} : memref<64x128xbf16, #tpu.memory_space<vmem>>, vector<8x128xbf16>,
    %c0_59 = arith.constant 0 : index
    %c0_60 = arith.constant 0 : index
    %226 = vector.load %arg11[%c0_59, %c0_60] : memref<64x128xbf16, #tpu.memory_space<vmem>>, vector<64x128xbf16>
    %c0_61 = arith.constant 0 : index
    %c0_62 = arith.constant 0 : index
    %227 = vector.load %arg4[%c0_61, %c0_62] : memref<128x512xbf16, #tpu.memory_space<vmem>>, vector<128x512xbf16>
    %cst_63 = arith.constant dense<0.000000e+00> : vector<64x512xf32>
    %228 = tpu.matmul %226, %227, %cst_63 {dimension_numbers = #tpu.dot_dimension_numbers<[1], [0], [0], [1], [0, 0, 1, 1], [], []>} : vector<64x128xbf16>, vector<128x512xbf16>, vector<64x512xf32> -> vector<64x512xf32>
    %c0_64 = arith.constant 0 : index
    %c0_65 = arith.constant 0 : index
    %229 = vector.load %arg6[%c0_64, %c0_65] : memref<1x512xf32, #tpu.memory_space<vmem>>, vector<1x512xf32>
    %230 = vector.broadcast %229 : vector<1x512xf32> to vector<64x512xf32>
    %231 = arith.addf %228, %230 : vector<64x512xf32>
    %c0_66 = arith.constant 0 : index
    %c0_67 = arith.constant 0 : index
    %232 = vector.load %arg10[%c0_66, %c0_67] : memref<64x512xf32, #tpu.memory_space<vmem>>, vector<64x512xf32>
    tpu.vector_store %arg10[%c0_66, %c0_67], %231 {strides = array<i32>} : memref<64x512xf32, #tpu.memory_space<vmem>>, vector<64x512xf32>,
    %c0_68 = arith.constant 0 : index
    %c0_69 = arith.constant 0 : index
    %233 = vector.load %arg5[%c0_68, %c0_69] : memref<128x512xbf16, #tpu.memory_space<vmem>>, vector<128x512xbf16>
    %cst_70 = arith.constant 0.000000e+00 : f32
    %234 = vector.broadcast %cst_70 : f32 to vector<8x128xf32>
    %cst_71 = arith.constant 0.000000e+00 : f32
    %235 = vector.broadcast %cst_71 : f32 to vector<8x128xf32>
    %c0_i32_72 = arith.constant 0 : i32
    %236 = tpu.assume_multiple %c0_i32_72, 8 : i32
    %237 = arith.index_cast %236 : i32 to index
    %c0_73 = arith.constant 0 : index
    %238 = vector.load %arg10[%237, %c0_73] : memref<64x512xf32, #tpu.memory_space<vmem>>, vector<8x512xf32>
    %239 = arith.truncf %234 : vector<8x128xf32> to vector<8x128xbf16>
    %cst_74 = arith.constant dense<0.000000e+00> : vector<8x512xf32>
    %240 = tpu.matmul %239, %233, %cst_74 {dimension_numbers = #tpu.dot_dimension_numbers<[1], [0], [0], [1], [0, 0, 1, 1], [], []>} : vector<8x128xbf16>, vector<128x512xbf16>, vector<8x512xf32> -> vector<8x512xf32>
    %241 = arith.addf %238, %240 : vector<8x512xf32>
    %242 = vector.extract_strided_slice %241 {offsets = [0, 0], sizes = [8, 384], strides = [1, 1]} : vector<8x512xf32> to vector<8x384xf32>
    %cst_75 = arith.constant 5.000000e-01 : f32
    %243 = vector.broadcast %cst_75 : f32 to vector<8x384xf32>
    %244 = arith.mulf %243, %242 : vector<8x384xf32>
    %245 = math.tanh %244 : vector<8x384xf32>
    %cst_76 = arith.constant 5.000000e-01 : f32
    %246 = vector.broadcast %cst_76 : f32 to vector<8x384xf32>
    %247 = arith.mulf %246, %245 : vector<8x384xf32>
    %cst_77 = arith.constant 5.000000e-01 : f32
    %248 = vector.broadcast %cst_77 : f32 to vector<8x384xf32>
    %249 = arith.addf %247, %248 : vector<8x384xf32>
    %250 = vector.extract_strided_slice %249 {offsets = [0, 0], sizes = [8, 128], strides = [1, 1]} : vector<8x384xf32> to vector<8x128xf32>
    %251 = vector.extract_strided_slice %249 {offsets = [0, 128], sizes = [8, 128], strides = [1, 1]} : vector<8x384xf32> to vector<8x128xf32>
    %252 = vector.extract_strided_slice %249 {offsets = [0, 256], sizes = [8, 128], strides = [1, 1]} : vector<8x384xf32> to vector<8x128xf32>
    %253 = vector.extract_strided_slice %241 {offsets = [0, 384], sizes = [8, 128], strides = [1, 1]} : vector<8x512xf32> to vector<8x128xf32>
    %254 = math.tanh %253 : vector<8x128xf32>
    %255 = arith.mulf %251, %235 : vector<8x128xf32>
    %256 = arith.mulf %250, %254 : vector<8x128xf32>
    %257 = arith.addf %255, %256 : vector<8x128xf32>
    %258 = math.tanh %257 : vector<8x128xf32>
    %259 = arith.mulf %252, %258 : vector<8x128xf32>
    %c8_i32_78 = arith.constant 8 : i32
    %260 = tpu.assume_multiple %c8_i32_78, 8 : i32
    %261 = arith.index_cast %260 : i32 to index
    %c0_79 = arith.constant 0 : index
    %262 = vector.load %arg10[%261, %c0_79] : memref<64x512xf32, #tpu.memory_space<vmem>>, vector<8x512xf32>
    %263 = arith.truncf %259 : vector<8x128xf32> to vector<8x128xbf16>
    %cst_80 = arith.constant dense<0.000000e+00> : vector<8x512xf32>
    %264 = tpu.matmul %263, %233, %cst_80 {dimension_numbers = #tpu.dot_dimension_numbers<[1], [0], [0], [1], [0, 0, 1, 1], [], []>} : vector<8x128xbf16>, vector<128x512xbf16>, vector<8x512xf32> -> vector<8x512xf32>
    %265 = arith.addf %262, %264 : vector<8x512xf32>
    %266 = vector.extract_strided_slice %265 {offsets = [0, 0], sizes = [8, 384], strides = [1, 1]} : vector<8x512xf32> to vector<8x384xf32>
    %cst_81 = arith.constant 5.000000e-01 : f32
    %267 = vector.broadcast %cst_81 : f32 to vector<8x384xf32>
    %268 = arith.mulf %267, %266 : vector<8x384xf32>
    %269 = math.tanh %268 : vector<8x384xf32>
    %cst_82 = arith.constant 5.000000e-01 : f32
    %270 = vector.broadcast %cst_82 : f32 to vector<8x384xf32>
    %271 = arith.mulf %270, %269 : vector<8x384xf32>
    %cst_83 = arith.constant 5.000000e-01 : f32
    %272 = vector.broadcast %cst_83 : f32 to vector<8x384xf32>
    %273 = arith.addf %271, %272 : vector<8x384xf32>
    %274 = vector.extract_strided_slice %273 {offsets = [0, 0], sizes = [8, 128], strides = [1, 1]} : vector<8x384xf32> to vector<8x128xf32>
    %275 = vector.extract_strided_slice %273 {offsets = [0, 128], sizes = [8, 128], strides = [1, 1]} : vector<8x384xf32> to vector<8x128xf32>
    %276 = vector.extract_strided_slice %273 {offsets = [0, 256], sizes = [8, 128], strides = [1, 1]} : vector<8x384xf32> to vector<8x128xf32>
    %277 = vector.extract_strided_slice %265 {offsets = [0, 384], sizes = [8, 128], strides = [1, 1]} : vector<8x512xf32> to vector<8x128xf32>
    %278 = math.tanh %277 : vector<8x128xf32>
    %279 = arith.mulf %275, %257 : vector<8x128xf32>
    %280 = arith.mulf %274, %278 : vector<8x128xf32>
    %281 = arith.addf %279, %280 : vector<8x128xf32>
    %282 = math.tanh %281 : vector<8x128xf32>
    %283 = arith.mulf %276, %282 : vector<8x128xf32>
    %c16_i32_84 = arith.constant 16 : i32
    %284 = tpu.assume_multiple %c16_i32_84, 8 : i32
    %285 = arith.index_cast %284 : i32 to index
    %c0_85 = arith.constant 0 : index
    %286 = vector.load %arg10[%285, %c0_85] : memref<64x512xf32, #tpu.memory_space<vmem>>, vector<8x512xf32>
    %287 = arith.truncf %283 : vector<8x128xf32> to vector<8x128xbf16>
    %cst_86 = arith.constant dense<0.000000e+00> : vector<8x512xf32>
    %288 = tpu.matmul %287, %233, %cst_86 {dimension_numbers = #tpu.dot_dimension_numbers<[1], [0], [0], [1], [0, 0, 1, 1], [], []>} : vector<8x128xbf16>, vector<128x512xbf16>, vector<8x512xf32> -> vector<8x512xf32>
    %289 = arith.addf %286, %288 : vector<8x512xf32>
    %290 = vector.extract_strided_slice %289 {offsets = [0, 0], sizes = [8, 384], strides = [1, 1]} : vector<8x512xf32> to vector<8x384xf32>
    %cst_87 = arith.constant 5.000000e-01 : f32
    %291 = vector.broadcast %cst_87 : f32 to vector<8x384xf32>
    %292 = arith.mulf %291, %290 : vector<8x384xf32>
    %293 = math.tanh %292 : vector<8x384xf32>
    %cst_88 = arith.constant 5.000000e-01 : f32
    %294 = vector.broadcast %cst_88 : f32 to vector<8x384xf32>
    %295 = arith.mulf %294, %293 : vector<8x384xf32>
    %cst_89 = arith.constant 5.000000e-01 : f32
    %296 = vector.broadcast %cst_89 : f32 to vector<8x384xf32>
    %297 = arith.addf %295, %296 : vector<8x384xf32>
    %298 = vector.extract_strided_slice %297 {offsets = [0, 0], sizes = [8, 128], strides = [1, 1]} : vector<8x384xf32> to vector<8x128xf32>
    %299 = vector.extract_strided_slice %297 {offsets = [0, 128], sizes = [8, 128], strides = [1, 1]} : vector<8x384xf32> to vector<8x128xf32>
    %300 = vector.extract_strided_slice %297 {offsets = [0, 256], sizes = [8, 128], strides = [1, 1]} : vector<8x384xf32> to vector<8x128xf32>
    %301 = vector.extract_strided_slice %289 {offsets = [0, 384], sizes = [8, 128], strides = [1, 1]} : vector<8x512xf32> to vector<8x128xf32>
    %302 = math.tanh %301 : vector<8x128xf32>
    %303 = arith.mulf %299, %281 : vector<8x128xf32>
    %304 = arith.mulf %298, %302 : vector<8x128xf32>
    %305 = arith.addf %303, %304 : vector<8x128xf32>
    %306 = math.tanh %305 : vector<8x128xf32>
    %307 = arith.mulf %300, %306 : vector<8x128xf32>
    %c24_i32_90 = arith.constant 24 : i32
    %308 = tpu.assume_multiple %c24_i32_90, 8 : i32
    %309 = arith.index_cast %308 : i32 to index
    %c0_91 = arith.constant 0 : index
    %310 = vector.load %arg10[%309, %c0_91] : memref<64x512xf32, #tpu.memory_space<vmem>>, vector<8x512xf32>
    %311 = arith.truncf %307 : vector<8x128xf32> to vector<8x128xbf16>
    %cst_92 = arith.constant dense<0.000000e+00> : vector<8x512xf32>
    %312 = tpu.matmul %311, %233, %cst_92 {dimension_numbers = #tpu.dot_dimension_numbers<[1], [0], [0], [1], [0, 0, 1, 1], [], []>} : vector<8x128xbf16>, vector<128x512xbf16>, vector<8x512xf32> -> vector<8x512xf32>
    %313 = arith.addf %310, %312 : vector<8x512xf32>
    %314 = vector.extract_strided_slice %313 {offsets = [0, 0], sizes = [8, 384], strides = [1, 1]} : vector<8x512xf32> to vector<8x384xf32>
    %cst_93 = arith.constant 5.000000e-01 : f32
    %315 = vector.broadcast %cst_93 : f32 to vector<8x384xf32>
    %316 = arith.mulf %315, %314 : vector<8x384xf32>
    %317 = math.tanh %316 : vector<8x384xf32>
    %cst_94 = arith.constant 5.000000e-01 : f32
    %318 = vector.broadcast %cst_94 : f32 to vector<8x384xf32>
    %319 = arith.mulf %318, %317 : vector<8x384xf32>
    %cst_95 = arith.constant 5.000000e-01 : f32
    %320 = vector.broadcast %cst_95 : f32 to vector<8x384xf32>
    %321 = arith.addf %319, %320 : vector<8x384xf32>
    %322 = vector.extract_strided_slice %321 {offsets = [0, 0], sizes = [8, 128], strides = [1, 1]} : vector<8x384xf32> to vector<8x128xf32>
    %323 = vector.extract_strided_slice %321 {offsets = [0, 128], sizes = [8, 128], strides = [1, 1]} : vector<8x384xf32> to vector<8x128xf32>
    %324 = vector.extract_strided_slice %321 {offsets = [0, 256], sizes = [8, 128], strides = [1, 1]} : vector<8x384xf32> to vector<8x128xf32>
    %325 = vector.extract_strided_slice %313 {offsets = [0, 384], sizes = [8, 128], strides = [1, 1]} : vector<8x512xf32> to vector<8x128xf32>
    %326 = math.tanh %325 : vector<8x128xf32>
    %327 = arith.mulf %323, %305 : vector<8x128xf32>
    %328 = arith.mulf %322, %326 : vector<8x128xf32>
    %329 = arith.addf %327, %328 : vector<8x128xf32>
    %330 = math.tanh %329 : vector<8x128xf32>
    %331 = arith.mulf %324, %330 : vector<8x128xf32>
    %c32_i32_96 = arith.constant 32 : i32
    %332 = tpu.assume_multiple %c32_i32_96, 8 : i32
    %333 = arith.index_cast %332 : i32 to index
    %c0_97 = arith.constant 0 : index
    %334 = vector.load %arg10[%333, %c0_97] : memref<64x512xf32, #tpu.memory_space<vmem>>, vector<8x512xf32>
    %335 = arith.truncf %331 : vector<8x128xf32> to vector<8x128xbf16>
    %cst_98 = arith.constant dense<0.000000e+00> : vector<8x512xf32>
    %336 = tpu.matmul %335, %233, %cst_98 {dimension_numbers = #tpu.dot_dimension_numbers<[1], [0], [0], [1], [0, 0, 1, 1], [], []>} : vector<8x128xbf16>, vector<128x512xbf16>, vector<8x512xf32> -> vector<8x512xf32>
    %337 = arith.addf %334, %336 : vector<8x512xf32>
    %338 = vector.extract_strided_slice %337 {offsets = [0, 0], sizes = [8, 384], strides = [1, 1]} : vector<8x512xf32> to vector<8x384xf32>
    %cst_99 = arith.constant 5.000000e-01 : f32
    %339 = vector.broadcast %cst_99 : f32 to vector<8x384xf32>
    %340 = arith.mulf %339, %338 : vector<8x384xf32>
    %341 = math.tanh %340 : vector<8x384xf32>
    %cst_100 = arith.constant 5.000000e-01 : f32
    %342 = vector.broadcast %cst_100 : f32 to vector<8x384xf32>
    %343 = arith.mulf %342, %341 : vector<8x384xf32>
    %cst_101 = arith.constant 5.000000e-01 : f32
    %344 = vector.broadcast %cst_101 : f32 to vector<8x384xf32>
    %345 = arith.addf %343, %344 : vector<8x384xf32>
    %346 = vector.extract_strided_slice %345 {offsets = [0, 0], sizes = [8, 128], strides = [1, 1]} : vector<8x384xf32> to vector<8x128xf32>
    %347 = vector.extract_strided_slice %345 {offsets = [0, 128], sizes = [8, 128], strides = [1, 1]} : vector<8x384xf32> to vector<8x128xf32>
    %348 = vector.extract_strided_slice %345 {offsets = [0, 256], sizes = [8, 128], strides = [1, 1]} : vector<8x384xf32> to vector<8x128xf32>
    %349 = vector.extract_strided_slice %337 {offsets = [0, 384], sizes = [8, 128], strides = [1, 1]} : vector<8x512xf32> to vector<8x128xf32>
    %350 = math.tanh %349 : vector<8x128xf32>
    %351 = arith.mulf %347, %329 : vector<8x128xf32>
    %352 = arith.mulf %346, %350 : vector<8x128xf32>
    %353 = arith.addf %351, %352 : vector<8x128xf32>
    %354 = math.tanh %353 : vector<8x128xf32>
    %355 = arith.mulf %348, %354 : vector<8x128xf32>
    %c40_i32_102 = arith.constant 40 : i32
    %356 = tpu.assume_multiple %c40_i32_102, 8 : i32
    %357 = arith.index_cast %356 : i32 to index
    %c0_103 = arith.constant 0 : index
    %358 = vector.load %arg10[%357, %c0_103] : memref<64x512xf32, #tpu.memory_space<vmem>>, vector<8x512xf32>
    %359 = arith.truncf %355 : vector<8x128xf32> to vector<8x128xbf16>
    %cst_104 = arith.constant dense<0.000000e+00> : vector<8x512xf32>
    %360 = tpu.matmul %359, %233, %cst_104 {dimension_numbers = #tpu.dot_dimension_numbers<[1], [0], [0], [1], [0, 0, 1, 1], [], []>} : vector<8x128xbf16>, vector<128x512xbf16>, vector<8x512xf32> -> vector<8x512xf32>
    %361 = arith.addf %358, %360 : vector<8x512xf32>
    %362 = vector.extract_strided_slice %361 {offsets = [0, 0], sizes = [8, 384], strides = [1, 1]} : vector<8x512xf32> to vector<8x384xf32>
    %cst_105 = arith.constant 5.000000e-01 : f32
    %363 = vector.broadcast %cst_105 : f32 to vector<8x384xf32>
    %364 = arith.mulf %363, %362 : vector<8x384xf32>
    %365 = math.tanh %364 : vector<8x384xf32>
    %cst_106 = arith.constant 5.000000e-01 : f32
    %366 = vector.broadcast %cst_106 : f32 to vector<8x384xf32>
    %367 = arith.mulf %366, %365 : vector<8x384xf32>
    %cst_107 = arith.constant 5.000000e-01 : f32
    %368 = vector.broadcast %cst_107 : f32 to vector<8x384xf32>
    %369 = arith.addf %367, %368 : vector<8x384xf32>
    %370 = vector.extract_strided_slice %369 {offsets = [0, 0], sizes = [8, 128], strides = [1, 1]} : vector<8x384xf32> to vector<8x128xf32>
    %371 = vector.extract_strided_slice %369 {offsets = [0, 128], sizes = [8, 128], strides = [1, 1]} : vector<8x384xf32> to vector<8x128xf32>
    %372 = vector.extract_strided_slice %369 {offsets = [0, 256], sizes = [8, 128], strides = [1, 1]} : vector<8x384xf32> to vector<8x128xf32>
    %373 = vector.extract_strided_slice %361 {offsets = [0, 384], sizes = [8, 128], strides = [1, 1]} : vector<8x512xf32> to vector<8x128xf32>
    %374 = math.tanh %373 : vector<8x128xf32>
    %375 = arith.mulf %371, %353 : vector<8x128xf32>
    %376 = arith.mulf %370, %374 : vector<8x128xf32>
    %377 = arith.addf %375, %376 : vector<8x128xf32>
    %378 = math.tanh %377 : vector<8x128xf32>
    %379 = arith.mulf %372, %378 : vector<8x128xf32>
    %c48_i32_108 = arith.constant 48 : i32
    %380 = tpu.assume_multiple %c48_i32_108, 8 : i32
    %381 = arith.index_cast %380 : i32 to index
    %c0_109 = arith.constant 0 : index
    %382 = vector.load %arg10[%381, %c0_109] : memref<64x512xf32, #tpu.memory_space<vmem>>, vector<8x512xf32>
    %383 = arith.truncf %379 : vector<8x128xf32> to vector<8x128xbf16>
    %cst_110 = arith.constant dense<0.000000e+00> : vector<8x512xf32>
    %384 = tpu.matmul %383, %233, %cst_110 {dimension_numbers = #tpu.dot_dimension_numbers<[1], [0], [0], [1], [0, 0, 1, 1], [], []>} : vector<8x128xbf16>, vector<128x512xbf16>, vector<8x512xf32> -> vector<8x512xf32>
    %385 = arith.addf %382, %384 : vector<8x512xf32>
    %386 = vector.extract_strided_slice %385 {offsets = [0, 0], sizes = [8, 384], strides = [1, 1]} : vector<8x512xf32> to vector<8x384xf32>
    %cst_111 = arith.constant 5.000000e-01 : f32
    %387 = vector.broadcast %cst_111 : f32 to vector<8x384xf32>
    %388 = arith.mulf %387, %386 : vector<8x384xf32>
    %389 = math.tanh %388 : vector<8x384xf32>
    %cst_112 = arith.constant 5.000000e-01 : f32
    %390 = vector.broadcast %cst_112 : f32 to vector<8x384xf32>
    %391 = arith.mulf %390, %389 : vector<8x384xf32>
    %cst_113 = arith.constant 5.000000e-01 : f32
    %392 = vector.broadcast %cst_113 : f32 to vector<8x384xf32>
    %393 = arith.addf %391, %392 : vector<8x384xf32>
    %394 = vector.extract_strided_slice %393 {offsets = [0, 0], sizes = [8, 128], strides = [1, 1]} : vector<8x384xf32> to vector<8x128xf32>
    %395 = vector.extract_strided_slice %393 {offsets = [0, 128], sizes = [8, 128], strides = [1, 1]} : vector<8x384xf32> to vector<8x128xf32>
    %396 = vector.extract_strided_slice %393 {offsets = [0, 256], sizes = [8, 128], strides = [1, 1]} : vector<8x384xf32> to vector<8x128xf32>
    %397 = vector.extract_strided_slice %385 {offsets = [0, 384], sizes = [8, 128], strides = [1, 1]} : vector<8x512xf32> to vector<8x128xf32>
    %398 = math.tanh %397 : vector<8x128xf32>
    %399 = arith.mulf %395, %377 : vector<8x128xf32>
    %400 = arith.mulf %394, %398 : vector<8x128xf32>
    %401 = arith.addf %399, %400 : vector<8x128xf32>
    %402 = math.tanh %401 : vector<8x128xf32>
    %403 = arith.mulf %396, %402 : vector<8x128xf32>
    %c56_i32_114 = arith.constant 56 : i32
    %404 = tpu.assume_multiple %c56_i32_114, 8 : i32
    %405 = arith.index_cast %404 : i32 to index
    %c0_115 = arith.constant 0 : index
    %406 = vector.load %arg10[%405, %c0_115] : memref<64x512xf32, #tpu.memory_space<vmem>>, vector<8x512xf32>
    %407 = arith.truncf %403 : vector<8x128xf32> to vector<8x128xbf16>
    %cst_116 = arith.constant dense<0.000000e+00> : vector<8x512xf32>
    %408 = tpu.matmul %407, %233, %cst_116 {dimension_numbers = #tpu.dot_dimension_numbers<[1], [0], [0], [1], [0, 0, 1, 1], [], []>} : vector<8x128xbf16>, vector<128x512xbf16>, vector<8x512xf32> -> vector<8x512xf32>
    %409 = arith.addf %406, %408 : vector<8x512xf32>
    %410 = vector.extract_strided_slice %409 {offsets = [0, 0], sizes = [8, 384], strides = [1, 1]} : vector<8x512xf32> to vector<8x384xf32>
    %cst_117 = arith.constant 5.000000e-01 : f32
    %411 = vector.broadcast %cst_117 : f32 to vector<8x384xf32>
    %412 = arith.mulf %411, %410 : vector<8x384xf32>
    %413 = math.tanh %412 : vector<8x384xf32>
    %cst_118 = arith.constant 5.000000e-01 : f32
    %414 = vector.broadcast %cst_118 : f32 to vector<8x384xf32>
    %415 = arith.mulf %414, %413 : vector<8x384xf32>
    %cst_119 = arith.constant 5.000000e-01 : f32
    %416 = vector.broadcast %cst_119 : f32 to vector<8x384xf32>
    %417 = arith.addf %415, %416 : vector<8x384xf32>
    %418 = vector.extract_strided_slice %417 {offsets = [0, 0], sizes = [8, 128], strides = [1, 1]} : vector<8x384xf32> to vector<8x128xf32>
    %419 = vector.extract_strided_slice %417 {offsets = [0, 128], sizes = [8, 128], strides = [1, 1]} : vector<8x384xf32> to vector<8x128xf32>
    %420 = vector.extract_strided_slice %417 {offsets = [0, 256], sizes = [8, 128], strides = [1, 1]} : vector<8x384xf32> to vector<8x128xf32>
    %421 = vector.extract_strided_slice %409 {offsets = [0, 384], sizes = [8, 128], strides = [1, 1]} : vector<8x512xf32> to vector<8x128xf32>
    %422 = math.tanh %421 : vector<8x128xf32>
    %423 = arith.mulf %419, %401 : vector<8x128xf32>
    %424 = arith.mulf %418, %422 : vector<8x128xf32>
    %425 = arith.addf %423, %424 : vector<8x128xf32>
    %426 = math.tanh %425 : vector<8x128xf32>
    %427 = arith.mulf %420, %426 : vector<8x128xf32>
    %428 = arith.truncf %427 : vector<8x128xf32> to vector<8x128xbf16>
    %c0_120 = arith.constant 0 : index
    %c0_121 = arith.constant 0 : index
    %429 = vector.load %arg7[%c0_120, %c0_121] : memref<128x1xbf16, #tpu.memory_space<vmem>>, vector<128x1xbf16>
    %cst_122 = arith.constant dense<0.000000e+00> : vector<8x1xf32>
    %430 = tpu.matmul %428, %429, %cst_122 {dimension_numbers = #tpu.dot_dimension_numbers<[1], [0], [0], [1], [0, 0, 1, 1], [], []>} : vector<8x128xbf16>, vector<128x1xbf16>, vector<8x1xf32> -> vector<8x1xf32>
    %c0_123 = arith.constant 0 : index
    %c0_124 = arith.constant 0 : index
    %431 = vector.load %arg8[%c0_123, %c0_124] : memref<1x1xf32, #tpu.memory_space<vmem>>, vector<1x1xf32>
    %432 = vector.broadcast %431 : vector<1x1xf32> to vector<8x1xf32>
    %433 = arith.addf %430, %432 : vector<8x1xf32>
    %c0_125 = arith.constant 0 : index
    %c0_126 = arith.constant 0 : index
    %434 = vector.load %arg9[%c0_125, %c0_126] : memref<8x1xf32, #tpu.memory_space<vmem>>, vector<8x1xf32>
    tpu.vector_store %arg9[%c0_125, %c0_126], %433 {strides = array<i32>} : memref<8x1xf32, #tpu.memory_space<vmem>>, vector<8x1xf32>,
    return
  }
}

</mosaic_0001>

<bundles_post_ra>
// kernel: a_call__.1
= control target key start
LH: loop header
LB: loop body
LE: loop exit
PB: predicated region body
PF: predicated region fallthrough
CT: control target
= control target key end

     0   :  { %s5160_s0 = inlined_call_operand.vmem [shape: bf16[64,128], index: 0, kind: input, shape index: {}]   ;;  %s5161_s1 = inlined_call_operand.hbm [shape: bf16[128,512], index: 1, kind: input, shape index: {}]   ;;  %s5162_s2 = inlined_call_operand.hbm [shape: bf16[128,512], index: 2, kind: input, shape index: {}]   ;;  %s5163_s3 = inlined_call_operand.vmem [shape: f32[1,512], index: 3, kind: input, shape index: {}]   ;;  %s5164_s4 = inlined_call_operand.hbm [shape: bf16[128,512], index: 4, kind: input, shape index: {}]   ;;  %s5165_s5 = inlined_call_operand.hbm [shape: bf16[128,512], index: 5, kind: input, shape index: {}]   ;;  %s5166_s6 = inlined_call_operand.vmem [shape: f32[1,512], index: 6, kind: input, shape index: {}]   ;;  %s5167_s7 = inlined_call_operand.vmem [shape: bf16[128,1], index: 7, kind: input, shape index: {}]   ;;  %s5168_s8 = inlined_call_operand.<no memory space> [shape: f32[1,1], index: 8, kind: input, shape index: {}]   ;;  %s5169_s9 = inlined_call_operand.vmem [shape: f32[8,1], index: 9, kind: output, shape index: {}]  }
   0x1   :  { %v14_v0 = vstv %s5168_s8 }
   0x2   :  { %15 = vst [vmem:[#allocation4] sm:$0x1] %v14_v0 }
   0x3   :  { %16 = vsyncpa [#allocation6], 0 }
   0x4   :  { %17 = vsyncpa [#allocation8], 0 }
   0x5   :  { %18 = vsyncpa [#allocation11], 0  ;;  %s3933_s11 = smov [#allocation7]   ;;  %s3934_s13 = smov [#allocation5]  }
   0x6   :  { %s38_s12 = sshll.u32 %s3933_s11, 4  ;;  %s26_s14 = sshll.u32 %s3934_s13, 4  ;;  %s39_s12 = int_to_ptr.vmem [resolvable:$true] %s38_s12  ;;  %s27_s14 = int_to_ptr.vmem [resolvable:$true] %s26_s14 }
   0x7   :  { %s3855_s15 = scalar_lea.vmem %s39_s12, 4096  ;;  %p3860_p1 = scmp.lt.s32.totalorder %s39_s12, %s39_s12 }
   0x8   :  { %p3856_p0 = scmp.ne.s32.totalorder %s39_s12, %s3855_s15  ;;  %p3861_p2 = scmp.lt.s32.totalorder %s3855_s15, %s3855_s15 }
   0xa   :  { %p3862_p3 = por %p3861_p2, %p3860_p1 }
   0xc   :  { %p3863_p4 = pnand %p3862_p3, %p3856_p0 }
   0xe   :  { %3866 = shalt.err (!%p3863_p4)
}
   0xf   :  { %s3935_s16 = smov 256   ;;  %s3936_s17 = smov 16  }
  0x10   :  { %44 = dma.hbm_to_vmem [thread:$0]  %s5162_s2, 4096, %s39_s12, [#allocation8], %s3935_s16, %s3935_s16, %s3936_s17  }
  0x11   :  { %s3875_s19 = scalar_lea.vmem %s27_s14, 4096  ;;  %p3880_p6 = scmp.lt.s32.totalorder %s27_s14, %s27_s14 }
  0x12   :  { %p3876_p5 = scmp.ne.s32.totalorder %s27_s14, %s3875_s19  ;;  %p3881_p7 = scmp.lt.s32.totalorder %s3875_s19, %s3875_s19 }
  0x14   :  { %p3882_p8 = por %p3881_p7, %p3880_p6 }
  0x16   :  { %p3883_p9 = pnand %p3882_p8, %p3876_p5 }
  0x18   :  { %3886 = shalt.err (!%p3883_p9)
}
  0x19   :  { %32 = dma.hbm_to_vmem [thread:$0]  %s5161_s1, 4096, %s27_s14, [#allocation6], %s3935_s16, %s3935_s16, %s3936_s17  }
  0x1a   :  { %s3937_s22 = smov [#allocation9]   ;;  %s3938_s24 = smov [#allocation10]  }
  0x1b   :  { %s52_s23 = sshll.u32 %s3937_s22, 4  ;;  %s64_s25 = sshll.u32 %s3938_s24, 4  ;;  %s53_s23 = int_to_ptr.vmem [resolvable:$true] %s52_s23  ;;  %s65_s25 = int_to_ptr.vmem [resolvable:$true] %s64_s25 }
  0x1c   :  { %s3895_s2 = scalar_lea.vmem %s53_s23, 4096  ;;  %p3900_p11 = scmp.lt.s32.totalorder %s53_s23, %s53_s23 }
  0x1d   :  { %p3896_p10 = scmp.ne.s32.totalorder %s53_s23, %s3895_s2  ;;  %p3901_p12 = scmp.lt.s32.totalorder %s3895_s2, %s3895_s2 }
  0x1f   :  { %p3902_p13 = por %p3901_p12, %p3900_p11 }
  0x21   :  { %p3903_p0 = pnand %p3902_p13, %p3896_p10 }
  0x23   :  { %3906 = shalt.err (!%p3903_p0)
}
  0x24   :  { %58 = dma.hbm_to_vmem [thread:$0]  %s5164_s4, 4096, %s53_s23, [#allocation8], %s3935_s16, %s3935_s16, %s3936_s17  }
  0x25   :  { %s3915_s1 = scalar_lea.vmem %s65_s25, 4096  ;;  %p3920_p2 = scmp.lt.s32.totalorder %s65_s25, %s65_s25 }
  0x26   :  { %p3916_p1 = scmp.ne.s32.totalorder %s65_s25, %s3915_s1  ;;  %p3921_p3 = scmp.lt.s32.totalorder %s3915_s1, %s3915_s1 }
  0x28   :  { %p3922_p4 = por %p3921_p3, %p3920_p2 }
  0x2a   :  { %p3923_p5 = pnand %p3922_p4, %p3916_p1 }
  0x2c   :  { %3926 = shalt.err (!%p3923_p5)
}
  0x2d   :  { %70 = dma.hbm_to_vmem [thread:$0]  %s5165_s5, 4096, %s65_s25, [#allocation11], %s3935_s16, %s3935_s16, %s3936_s17  }
  0x2e   :  { %3927 = dma.done.wait [#allocation6], 4096  }
  0x2f   :  { %3928 = vsyncadd [#allocation6], 4294963200 }
  0x30   :  { %3929 = dma.done.wait [#allocation8], 8192  }
  0x31   :  { %3930 = vsyncadd [#allocation8], 4294959104 }
  0x32   :  { %3931 = dma.done.wait [#allocation11], 4096  }
  0x33   :  { %3932 = vsyncadd [#allocation11], 4294963200  ;;  %v5174_v1 = vmov 0   ;;  %v3415_v2 = vld [vmem:[#allocation5 + $0xe4] ss:$16 sps:$4 sm:$0xff]   ;;  %vm3941_vm0 = vmmov 0  }
  0x34   :  { %368 = vmatprep.mubr.bf16.mxu0 %v5174_v1  ;;  %441 = vmatprep.mubr.bf16.mxu1 %v5174_v1  ;;  %v3417_v3 = vld [vmem:[#allocation5 + $0xec] ss:$16 sps:$4 sm:$0xff]   ;;  %v3419_v4 = vld [vmem:[#allocation5 + $0xe0] ss:$16 sps:$4 sm:$0xff]   ;;  %v3420_v5 = vld [vmem:[#allocation5 + $0xe8] ss:$16 sps:$4 sm:$0xff]  }
  0x35   :  { %336 = vmatprep.subr.bf16.mxu0 %v3415_v2  ;;  %409 = vmatprep.subr.bf16.mxu1 %v3417_v3  ;;  %v3421_v6 = vld [vmem:[#allocation5 + $0xc4] ss:$16 sps:$4 sm:$0xff]   ;;  %v3423_v7 = vld [vmem:[#allocation5 + $0xcc] ss:$16 sps:$4 sm:$0xff]   ;;  %v3425_v8 = vld [vmem:[#allocation5 + $0xc0] ss:$16 sps:$4 sm:$0xff]  }
  0x36   :  { %337 = vmatpush1.bf16.msra.mxu0 %v3419_v4  ;;  %410 = vmatpush1.bf16.msra.mxu1 %v3420_v5  ;;  %v3426_v9 = vld [vmem:[#allocation5 + $0xc8] ss:$16 sps:$4 sm:$0xff]   ;;  %v3427_v10 = vld [vmem:[#allocation5 + $0xa4] ss:$16 sps:$4 sm:$0xff]   ;;  %v3429_v11 = vld [vmem:[#allocation5 + $0xac] ss:$16 sps:$4 sm:$0xff]  }
  0x37   :  { %338 = vmatprep.subr.bf16.mxu0 %v3421_v6  ;;  %411 = vmatprep.subr.bf16.mxu1 %v3423_v7  ;;  %v3431_v12 = vld [vmem:[#allocation5 + $0xa0] ss:$16 sps:$4 sm:$0xff]   ;;  %v3432_v13 = vld [vmem:[#allocation5 + $0xa8] ss:$16 sps:$4 sm:$0xff]   ;;  %v3433_v14 = vld [vmem:[#allocation5 + $0x84] ss:$16 sps:$4 sm:$0xff]   ;;  %v132_v7 = vlaneseq }
  0x38   :  { %v3435_v15 = vld [vmem:[#allocation5 + $0x8c] ss:$16 sps:$4 sm:$0xff]   ;;  %v3437_v16 = vld [vmem:[#allocation5 + $0x80] ss:$16 sps:$4 sm:$0xff]   ;;  %v3438_v17 = vld [vmem:[#allocation5 + $0x88] ss:$16 sps:$4 sm:$0xff]  }
  0x39   :  { %v3439_v18 = vld [vmem:[#allocation5 + $0x64] ss:$16 sps:$4 sm:$0xff]   ;;  %v3441_v19 = vld [vmem:[#allocation5 + $0x6c] ss:$16 sps:$4 sm:$0xff]   ;;  %v3443_v20 = vld [vmem:[#allocation5 + $0x60] ss:$16 sps:$4 sm:$0xff]  }
  0x3a   :  { %339 = vmatpush1.bf16.msra.mxu0 %v3425_v8  ;;  %412 = vmatpush1.bf16.msra.mxu1 %v3426_v9  ;;  %v3444_v21 = vld [vmem:[#allocation5 + $0x68] ss:$16 sps:$4 sm:$0xff]   ;;  %v3445_v22 = vld [vmem:[#allocation5 + $0x44] ss:$16 sps:$4 sm:$0xff]   ;;  %v3447_v23 = vld [vmem:[#allocation5 + $0x4c] ss:$16 sps:$4 sm:$0xff]  }
  0x3b   :  { %340 = vmatprep.subr.bf16.mxu0 %v3427_v10  ;;  %413 = vmatprep.subr.bf16.mxu1 %v3429_v11  ;;  %v3449_v24 = vld [vmem:[#allocation5 + $0x40] ss:$16 sps:$4 sm:$0xff]   ;;  %v3450_v25 = vld [vmem:[#allocation5 + $0x48] ss:$16 sps:$4 sm:$0xff]   ;;  %v3451_v26 = vld [vmem:[#allocation5 + $0x24] ss:$16 sps:$4 sm:$0xff]  }
  0x3c   :  { %v3453_v27 = vld [vmem:[#allocation5 + $0x2c] ss:$16 sps:$4 sm:$0xff]   ;;  %v3455_v28 = vld [vmem:[#allocation5 + $0x20] ss:$16 sps:$4 sm:$0xff]   ;;  %v3456_v29 = vld [vmem:[#allocation5 + $0x28] ss:$16 sps:$4 sm:$0xff]  }
  0x3d   :  { %v3457_v30 = vld [vmem:[#allocation5 + $0x4] ss:$16 sps:$4 sm:$0xff]   ;;  %v3459_v31 = vld [vmem:[#allocation5 + $0xc] ss:$16 sps:$4 sm:$0xff]   ;;  %v3461_v32 = vld [vmem:[#allocation5] ss:$16 sps:$4 sm:$0xff]  }
  0x3e   :  { %341 = vmatpush1.bf16.msra.mxu0 %v3431_v12  ;;  %414 = vmatpush1.bf16.msra.mxu1 %v3432_v13  ;;  %v3462_v33 = vld [vmem:[#allocation5 + $0x8] ss:$16 sps:$4 sm:$0xff]   ;;  %v4021_v34 = vld [vmem:[#allocation7 + $0xe4] ss:$16 sps:$4 sm:$0xff]   ;;  %v4023_v35 = vld [vmem:[#allocation7 + $0xec] ss:$16 sps:$4 sm:$0xff]  }
  0x3f   :  { %342 = vmatprep.subr.bf16.mxu0 %v3433_v14  ;;  %415 = vmatprep.subr.bf16.mxu1 %v3435_v15  ;;  %v3463_v36 = vld [vmem:[%s5160_s0] sm:$0xff]   ;;  %v4030_v38 = vld [vmem:[#allocation7 + $0xe8] ss:$16 sps:$4 sm:$0xff]   ;;  %v3489_v54 = vld [vmem:[%s5160_s0 + $0x10] sm:$0xff]   ;;  %v4175_v8 = vshrl.u32 %v132_v7, 7  ;;  %vm3216_vm1 = vcmask 7168  }
  0x40   :  { %v4028_v37 = vld [vmem:[#allocation7 + $0xe0] ss:$16 sps:$4 sm:$0xff]   ;;  %v4034_v39 = vld [vmem:[#allocation7 + $0xc4] ss:$16 sps:$4 sm:$0xff]   ;;  %v4036_v40 = vld [vmem:[#allocation7 + $0xcc] ss:$16 sps:$4 sm:$0xff]  }
  0x41   :  { %v4038_v41 = vld [vmem:[#allocation7 + $0xc0] ss:$16 sps:$4 sm:$0xff]   ;;  %v4042_v42 = vld [vmem:[#allocation7 + $0xc8] ss:$16 sps:$4 sm:$0xff]   ;;  %v4046_v43 = vld [vmem:[#allocation7 + $0xa4] ss:$16 sps:$4 sm:$0xff]  }
  0x42   :  { %343 = vmatpush1.bf16.msra.mxu0 %v3437_v16  ;;  %416 = vmatpush1.bf16.msra.mxu1 %v3438_v17  ;;  %v4048_v44 = vld [vmem:[#allocation7 + $0xac] ss:$16 sps:$4 sm:$0xff]   ;;  %v4055_v46 = vld [vmem:[#allocation7 + $0xa0] ss:$16 sps:$4 sm:$0xff]   ;;  %v4057_v47 = vld [vmem:[#allocation7 + $0xa8] ss:$16 sps:$4 sm:$0xff]  }
  0x43   :  { %344 = vmatprep.subr.bf16.mxu0 %v3439_v18  ;;  %417 = vmatprep.subr.bf16.mxu1 %v3441_v19  ;;  %v3476_v45 = vld [vmem:[%s5160_s0 + $0x8] sm:$0xff]   ;;  %v4067_v50 = vld [vmem:[#allocation7 + $0x80] ss:$16 sps:$4 sm:$0xff]   ;;  %v3502_v63 = vld [vmem:[%s5160_s0 + $0x18] sm:$0xff]   ;;  %5178 = vst [vmem:[#allocation15_spill] sm:$0xff] %v4175_v8  ;;  %v5170_v9 = vsub.s32 2, %v4175_v8 }
  0x44   :  { %v4061_v48 = vld [vmem:[#allocation7 + $0x84] ss:$16 sps:$4 sm:$0xff]   ;;  %v4065_v49 = vld [vmem:[#allocation7 + $0x8c] ss:$16 sps:$4 sm:$0xff]   ;;  %v4069_v51 = vld [vmem:[#allocation7 + $0x88] ss:$16 sps:$4 sm:$0xff]  }
  0x45   :  { %v4073_v52 = vld [vmem:[#allocation7 + $0x64] ss:$16 sps:$4 sm:$0xff]   ;;  %v4077_v53 = vld [vmem:[#allocation7 + $0x6c] ss:$16 sps:$4 sm:$0xff]   ;;  %v4084_v55 = vld [vmem:[#allocation7 + $0x60] ss:$16 sps:$4 sm:$0xff]  }
  0x46   :  { %345 = vmatpush1.bf16.msra.mxu0 %v3443_v20  ;;  %418 = vmatpush1.bf16.msra.mxu1 %v3444_v21  ;;  %v4086_v56 = vld [vmem:[#allocation7 + $0x68] ss:$16 sps:$4 sm:$0xff]   ;;  %v4088_v57 = vld [vmem:[#allocation7 + $0x44] ss:$16 sps:$4 sm:$0xff]   ;;  %v4090_v58 = vld [vmem:[#allocation7 + $0x4c] ss:$16 sps:$4 sm:$0xff]  }
  0x47   :  { %346 = vmatprep.subr.bf16.mxu0 %v3445_v22  ;;  %419 = vmatprep.subr.bf16.mxu1 %v3447_v23  ;;  %v4096_v59 = vld [vmem:[#allocation7 + $0x40] ss:$16 sps:$4 sm:$0xff]   ;;  %v4098_v60 = vld [vmem:[#allocation7 + $0x48] ss:$16 sps:$4 sm:$0xff]   ;;  %v4100_v61 = vld [vmem:[#allocation7 + $0x24] ss:$16 sps:$4 sm:$0xff]  }
  0x48   :  { %v4102_v62 = vld [vmem:[#allocation7 + $0x2c] ss:$16 sps:$4 sm:$0xff]   ;;  %v4113_v0 = vld [vmem:[#allocation7 + $0x20] ss:$16 sps:$4 sm:$0xff]   ;;  %v4115_v2 = vld [vmem:[#allocation7 + $0x28] ss:$16 sps:$4 sm:$0xff]  }
  0x49   :  { %v4117_v3 = vld [vmem:[#allocation7 + $0x4] ss:$16 sps:$4 sm:$0xff]   ;;  %v4119_v4 = vld [vmem:[#allocation7 + $0xc] ss:$16 sps:$4 sm:$0xff]   ;;  %v4125_v5 = vld [vmem:[#allocation7] ss:$16 sps:$4 sm:$0xff]  }
  0x4a   :  { %347 = vmatpush1.bf16.msra.mxu0 %v3449_v24  ;;  %420 = vmatpush1.bf16.msra.mxu1 %v3450_v25  ;;  %v4127_v6 = vld [vmem:[#allocation7 + $0x8] ss:$16 sps:$4 sm:$0xff]   ;;  %v5173_v10 = vsub.s32 0, %v4175_v8  ;;  %v5171_v11 = vsub.s32 3, %v4175_v8  ;;  %v130_v12 = vld [vmem:[%s5163_s3] sm:$0xf] }
  0x4b   :  { %348 = vmatprep.subr.bf16.mxu0 %v3451_v26  ;;  %421 = vmatprep.subr.bf16.mxu1 %v3453_v27  ;;  %v4189_v15 = vrot.slane %v130_v12, %v5170_v9  ;;  %v5172_v16 = vsub.s32 1, %v4175_v8 }
  0x4c   :  { %v135_v19 = vrot.slane %v130_v12, %v5173_v10  ;;  %v4200_v20 = vrot.slane %v130_v12, %v5171_v11 }
  0x4d   :  { %v139_v23 = vrot.slane %v130_v12, %v5172_v16 }
  0x4e   :  { %349 = vmatpush1.bf16.msra.mxu0 %v3455_v28  ;;  %422 = vmatpush1.bf16.msra.mxu1 %v3456_v29 }
  0x4f   :  { %350 = vmatprep.subr.bf16.mxu0 %v3457_v30  ;;  %423 = vmatprep.subr.bf16.mxu1 %v3459_v31 }
  0x52   :  { %351 = vmatpush1.bf16.msra.mxu0 %v3461_v32  ;;  %424 = vmatpush1.bf16.msra.mxu1 %v3462_v33 }
  0x53   :  { %713 = vmatprep.subr.bf16.mxu0 %v4021_v34  ;;  %754 = vmatprep.subr.bf16.mxu1 %v4023_v35 }
  0x55   :  { %369 = vmatmul.mubr.bf16.vlgmr.msra.gmra.mxu0 %v3463_v36  ;;  %442 = vmatmul.mubr.bf16.vlgmr.msra.gmra.mxu1 %v3463_v36 }
  0x56   :  { %714 = vmatpush1.bf16.msra.mxu0 %v4028_v37  ;;  %755 = vmatpush1.bf16.msra.mxu1 %v4030_v38 }
  0x57   :  { %715 = vmatprep.subr.bf16.mxu0 %v4034_v39  ;;  %756 = vmatprep.subr.bf16.mxu1 %v4036_v40 }
  0x58   :  { %378 = vmatprep.mubr.bf16.mxu0 %v5174_v1  ;;  %451 = vmatprep.mubr.bf16.mxu1 %v5174_v1 }
  0x5a   :  { %716 = vmatpush1.bf16.msra.mxu0 %v4038_v41  ;;  %757 = vmatpush1.bf16.msra.mxu1 %v4042_v42 }
  0x5b   :  { %717 = vmatprep.subr.bf16.mxu0 %v4046_v43  ;;  %758 = vmatprep.subr.bf16.mxu1 %v4048_v44 }
  0x5d   :  { %379 = vmatmul.mubr.bf16.gmra.mxu0 %v3476_v45  ;;  %452 = vmatmul.mubr.bf16.gmra.mxu1 %v3476_v45 }
  0x5e   :  { %718 = vmatpush1.bf16.msra.mxu0 %v4055_v46  ;;  %759 = vmatpush1.bf16.msra.mxu1 %v4057_v47 }
  0x5f   :  { %719 = vmatprep.subr.bf16.mxu0 %v4061_v48  ;;  %760 = vmatprep.subr.bf16.mxu1 %v4065_v49 }
  0x60   :  { %388 = vmatprep.mubr.bf16.mxu0 %v5174_v1  ;;  %461 = vmatprep.mubr.bf16.mxu1 %v5174_v1 }
  0x62   :  { %720 = vmatpush1.bf16.msra.mxu0 %v4067_v50  ;;  %761 = vmatpush1.bf16.msra.mxu1 %v4069_v51 }
  0x63   :  { %721 = vmatprep.subr.bf16.mxu0 %v4073_v52  ;;  %762 = vmatprep.subr.bf16.mxu1 %v4077_v53 }
  0x65   :  { %389 = vmatmul.mubr.bf16.gmra.mxu0 %v3489_v54  ;;  %462 = vmatmul.mubr.bf16.gmra.mxu1 %v3489_v54 }
  0x66   :  { %722 = vmatpush1.bf16.msra.mxu0 %v4084_v55  ;;  %763 = vmatpush1.bf16.msra.mxu1 %v4086_v56 }
  0x67   :  { %723 = vmatprep.subr.bf16.mxu0 %v4088_v57  ;;  %764 = vmatprep.subr.bf16.mxu1 %v4090_v58 }
  0x68   :  { %398 = vmatprep.mubr.bf16.mxu0 %v5174_v1  ;;  %471 = vmatprep.mubr.bf16.mxu1 %v5174_v1 }
  0x6a   :  { %724 = vmatpush1.bf16.msra.mxu0 %v4096_v59  ;;  %765 = vmatpush1.bf16.msra.mxu1 %v4098_v60 }
  0x6b   :  { %725 = vmatprep.subr.bf16.mxu0 %v4100_v61  ;;  %766 = vmatprep.subr.bf16.mxu1 %v4102_v62 }
  0x6d   :  { %399 = vmatmul.mubr.bf16.gmra.mxu0 %v3502_v63  ;;  %472 = vmatmul.mubr.bf16.gmra.mxu1 %v3502_v63 }
  0x6e   :  { %726 = vmatpush1.bf16.msra.mxu0 %v4113_v0  ;;  %767 = vmatpush1.bf16.msra.mxu1 %v4115_v2 }
  0x6f   :  { %727 = vmatprep.subr.bf16.mxu0 %v4117_v3  ;;  %768 = vmatprep.subr.bf16.mxu1 %v4119_v4 }
  0x70   :  { %745 = vmatprep.mubr.bf16.mxu0 %v5174_v1  ;;  %786 = vmatprep.mubr.bf16.mxu1 %v5174_v1 }
  0x72   :  { %728 = vmatpush1.bf16.msra.mxu0 %v4125_v5  ;;  %769 = vmatpush1.bf16.msra.mxu1 %v4127_v6 }
  0x73   :  { %826 = vmatprep.subr.bf16.mxu0 %v4021_v34  ;;  %867 = vmatprep.subr.bf16.mxu1 %v4023_v35 }
  0x75   :  { %746 = vmatmul.mubr.bf16.vlgmr.msra.gmra.mxu0 %v5174_v1  ;;  %787 = vmatmul.mubr.bf16.vlgmr.msra.gmra.mxu1 %v5174_v1 }
  0x76   :  { %827 = vmatpush1.bf16.msra.mxu0 %v4028_v37  ;;  %868 = vmatpush1.bf16.msra.mxu1 %v4030_v38 }
  0x77   :  { %828 = vmatprep.subr.bf16.mxu0 %v4034_v39  ;;  %869 = vmatprep.subr.bf16.mxu1 %v4036_v40 }
  0x78   :  { %858 = vmatprep.mubr.bf16.mxu0 %v5174_v1  ;;  %899 = vmatprep.mubr.bf16.mxu1 %v5174_v1 }
  0x7a   :  { %829 = vmatpush1.bf16.msra.mxu0 %v4038_v41  ;;  %870 = vmatpush1.bf16.msra.mxu1 %v4042_v42 }
  0x7b   :  { %830 = vmatprep.subr.bf16.mxu0 %v4046_v43  ;;  %871 = vmatprep.subr.bf16.mxu1 %v4048_v44 }
  0x7e   :  { %831 = vmatpush1.bf16.msra.mxu0 %v4055_v46  ;;  %872 = vmatpush1.bf16.msra.mxu1 %v4057_v47 }
  0x7f   :  { %832 = vmatprep.subr.bf16.mxu0 %v4061_v48  ;;  %873 = vmatprep.subr.bf16.mxu1 %v4065_v49 }
  0x82   :  { %833 = vmatpush1.bf16.msra.mxu0 %v4067_v50  ;;  %874 = vmatpush1.bf16.msra.mxu1 %v4069_v51 }
  0x83   :  { %834 = vmatprep.subr.bf16.mxu0 %v4073_v52  ;;  %875 = vmatprep.subr.bf16.mxu1 %v4077_v53 }
  0x86   :  { %835 = vmatpush1.bf16.msra.mxu0 %v4084_v55  ;;  %876 = vmatpush1.bf16.msra.mxu1 %v4086_v56 }
  0x87   :  { %836 = vmatprep.subr.bf16.mxu0 %v4088_v57  ;;  %877 = vmatprep.subr.bf16.mxu1 %v4090_v58 }
  0x8a   :  { %837 = vmatpush1.bf16.msra.mxu0 %v4096_v59  ;;  %878 = vmatpush1.bf16.msra.mxu1 %v4098_v60 }
  0x8b   :  { %838 = vmatprep.subr.bf16.mxu0 %v4100_v61  ;;  %879 = vmatprep.subr.bf16.mxu1 %v4102_v62 }
  0x8e   :  { %839 = vmatpush1.bf16.msra.mxu0 %v4113_v0  ;;  %880 = vmatpush1.bf16.msra.mxu1 %v4115_v2 }
  0x8f   :  { %840 = vmatprep.subr.bf16.mxu0 %v4117_v3  ;;  %881 = vmatprep.subr.bf16.mxu1 %v4119_v4 }
  0x92   :  { %841 = vmatpush1.bf16.msra.mxu0 %v4125_v5  ;;  %882 = vmatpush1.bf16.msra.mxu1 %v4127_v6 }
  0x93   :  { %940 = vmatprep.subr.bf16.mxu0 %v4021_v34  ;;  %981 = vmatprep.subr.bf16.mxu1 %v4023_v35 }
 0x115   :  { %v4183_v13 = vpop.f32.mrf.mxu0  ;;  %v4185_v14 = vpop.f32.mrf.mxu1 }
 0x117   :  { %v4192_v17 = vpop.f32.mrf.mxu0  ;;  %v4194_v18 = vpop.f32.mrf.mxu1 }
 0x119   :  { %v374_v21 = vpop.f32.mrf.mxu0  ;;  %v447_v22 = vpop.f32.mrf.mxu1 }
 0x11a   :  { %v4204_v24 = vadd.f32 %v374_v21, %v135_v19  ;;  %v4207_v25 = vadd.f32 %v447_v22, %v4189_v15 }
 0x11b   :  { %v376_v26 = vpop.f32.mrf.mxu0  ;;  %v449_v27 = vpop.f32.mrf.mxu1 }
 0x11c   :  { %v4209_v28 = vadd.f32 %v376_v26, %v139_v23  ;;  %v4212_v29 = vadd.f32 %v449_v27, %v4200_v20 }
 0x11d   :  { %v380_v30 = vpop.f32.mrf.mxu0  ;;  %v453_v31 = vpop.f32.mrf.mxu1 }
 0x11e   :  { %v4214_v32 = vadd.f32 %v380_v30, %v135_v19  ;;  %v4217_v33 = vadd.f32 %v453_v31, %v4189_v15 }
 0x11f   :  { %v382_v36 = vpop.f32.mrf.mxu0  ;;  %v455_v45 = vpop.f32.mrf.mxu1 }
 0x120   :  { %v4219_v54 = vadd.f32 %v382_v36, %v139_v23  ;;  %v4222_v63 = vadd.f32 %v455_v45, %v4200_v20 }
 0x121   :  { %v384_v7 = vpop.f32.mrf.mxu0  ;;  %v457_v12 = vpop.f32.mrf.mxu1 }
 0x122   :  { %v4224_v21 = vadd.f32 %v384_v7, %v135_v19  ;;  %v4227_v22 = vadd.f32 %v457_v12, %v4189_v15 }
 0x123   :  { %v386_v26 = vpop.f32.mrf.mxu0  ;;  %v459_v27 = vpop.f32.mrf.mxu1 }
 0x124   :  { %5179 = vst [vmem:[#allocation16_spill] sm:$0xff] %v4224_v21  ;;  %5180 = vst [vmem:[#allocation17_spill] sm:$0xff] %v4227_v22  ;;  %v4229_v30 = vadd.f32 %v386_v26, %v139_v23  ;;  %v4232_v31 = vadd.f32 %v459_v27, %v4200_v20  ;;  %v446_v21 = vadd.f32 %v4194_v18, %v4200_v20 }
 0x125   :  { %v390_v9 = vpop.f32.mrf.mxu0  ;;  %v463_v36 = vpop.f32.mrf.mxu1 }
 0x126   :  { %5181 = vst [vmem:[#allocation18_spill] sm:$0xff] %v4229_v30  ;;  %5182 = vst [vmem:[#allocation19_spill] sm:$0xff] %v4232_v31  ;;  %v4234_v11 = vadd.f32 %v390_v9, %v135_v19  ;;  %v4237_v45 = vadd.f32 %v463_v36, %v4189_v15 }
 0x127   :  { %v392_v16 = vpop.f32.mrf.mxu0  ;;  %v465_v7 = vpop.f32.mrf.mxu1 }
 0x128   :  { %5183 = vst [vmem:[#allocation20_spill] sm:$0xff] %v4234_v11  ;;  %5184 = vst [vmem:[#allocation21_spill] sm:$0xff] %v4237_v45  ;;  %v4239_v10 = vadd.f32 %v392_v16, %v139_v23  ;;  %v4242_v12 = vadd.f32 %v465_v7, %v4200_v20 }
 0x129   :  { %v394_v1 = vpop.f32.mrf.mxu0  ;;  %v467_v26 = vpop.f32.mrf.mxu1 }
 0x12a   :  { %5185 = vst [vmem:[#allocation22_spill] sm:$0xff] %v4239_v10  ;;  %5186 = vst [vmem:[#allocation23_spill] sm:$0xff] %v4242_v12  ;;  %v4244_v8 = vadd.f32 %v394_v1, %v135_v19  ;;  %v4247_v27 = vadd.f32 %v467_v26, %v4189_v15 }
 0x12b   :  { %v396_v22 = vpop.f32.mrf.mxu0  ;;  %v469_v9 = vpop.f32.mrf.mxu1 }
 0x12c   :  { %5187 = vst [vmem:[#allocation24_spill] sm:$0xff] %v4244_v8  ;;  %5188 = vst [vmem:[#allocation25_spill] sm:$0xff] %v4247_v27  ;;  %v4249_v11 = vadd.f32 %v396_v22, %v139_v23  ;;  %v4252_v36 = vadd.f32 %v469_v9, %v4200_v20 }
 0x12d   :  { %v400_v45 = vpop.f32.mrf.mxu0  ;;  %v473_v16 = vpop.f32.mrf.mxu1 }
 0x12e   :  { %5189 = vst [vmem:[#allocation26_spill] sm:$0xff] %v4249_v11  ;;  %5190 = vst [vmem:[#allocation27_spill] sm:$0xff] %v4252_v36  ;;  %v4254_v10 = vadd.f32 %v400_v45, %v135_v19  ;;  %v4257_v7 = vadd.f32 %v473_v16, %v4189_v15 }
 0x12f   :  { %v402_v12 = vpop.f32.mrf.mxu0  ;;  %v475_v1 = vpop.f32.mrf.mxu1 }
 0x130   :  { %5191 = vst [vmem:[#allocation28_spill] sm:$0xff] %v4254_v10  ;;  %5192 = vst [vmem:[#allocation29_spill] sm:$0xff] %v4257_v7  ;;  %v4259_v8 = vadd.f32 %v402_v12, %v139_v23  ;;  %v4262_v26 = vadd.f32 %v475_v1, %v4200_v20  ;;  %v371_v10 = vadd.f32 %v4183_v13, %v135_v19 }
 0x131   :  { %v404_v27 = vpop.f32.mrf.mxu0  ;;  %v477_v22 = vpop.f32.mrf.mxu1  ;;  %v373_v1 = vadd.f32 %v4192_v17, %v139_v23 }
 0x132   :  { %5193 = vst [vmem:[#allocation30_spill] sm:$0xff] %v4259_v8  ;;  %5194 = vst [vmem:[#allocation31_spill] sm:$0xff] %v4262_v26  ;;  %v4264_v11 = vadd.f32 %v404_v27, %v135_v19  ;;  %v4267_v9 = vadd.f32 %v477_v22, %v4189_v15 }
 0x133   :  { %v406_v36 = vpop.f32.mrf.mxu0  ;;  %v479_v45 = vpop.f32.mrf.mxu1 }
 0x134   :  { %5195 = vst [vmem:[#allocation32_spill] sm:$0xff] %v4264_v11  ;;  %5196 = vst [vmem:[#allocation33_spill] sm:$0xff] %v4267_v9  ;;  %v4270_v16 = vadd.f32 %v406_v36, %v139_v23  ;;  %v4273_v7 = vadd.f32 %v479_v45, %v4200_v20 }
 0x135   :  { %v747_v12 = vpop.f32.mrf.mxu0  ;;  %v788_v8 = vpop.f32.mrf.mxu1 }
 0x136   :  { %5197 = vst [vmem:[#allocation34_spill] sm:$0xff] %v4273_v7  ;;  %v795_v26 = vadd.f32 %v747_v12, %v371_v10  ;;  %v444_v7 = vadd.f32 %v4185_v14, %v4189_v15 }
 0x137   :  { %v749_v31 = vpop.f32.mrf.mxu0  ;;  %v790_v27 = vpop.f32.mrf.mxu1 }
 0x138   :  { %v799_v11 = vmul.f32 0.5, %v795_v26  ;;  %v796_v30 = vadd.f32 %v749_v31, %v373_v1  ;;  %v798_v45 = vadd.f32 %v790_v27, %v446_v21  ;;  %v797_v10 = vadd.f32 %v788_v8, %v444_v7 }
 0x139   :  { %v751_v22 = vpop.f32.mrf.mxu0  ;;  %v792_v9 = vpop.f32.mrf.mxu1 }
 0x13a   :  { %3623 = vtanh.f32 %v799_v11  ;;  %v800_v13 = vmul.f32 0.5, %v796_v30  ;;  %v801_v17 = vmul.f32 0.5, %v797_v10  ;;  %v5198_v22 = vmov 0  }
 0x13b   :  { %v752_v19 = vpop.f32.mrf.mxu0  ;;  %v793_v36 = vpop.f32.mrf.mxu1 }
 0x13c   :  { %3625 = vtanh.f32 %v800_v13 }
 0x13d   :  { %3627 = vtanh.f32 %v798_v45 }
 0x13e   :  { %3629 = vtanh.f32 %v801_v17 }
 0x147   :  { %v3624_v23 = vpop.eup %3623 }
 0x148   :  { %v805_v26 = vmul.f32 0.5, %v3624_v23 }
 0x149   :  { %v3626_v31 = vpop.eup %3625 }
 0x14a   :  { %v808_v12 = vadd.f32 0.5, %v805_v26  ;;  %v806_v9 = vmul.f32 0.5, %v3626_v31  ;;  %v3628_v18 = vpop.eup %3627 }
 0x14b   :  { %v3630_v21 = vpop.eup %3629 }
 0x14c   :  { %v809_v1 = vadd.f32 0.5, %v806_v9  ;;  %v813_v20 = vmul.f32 %v3628_v18, %v808_v12  ;;  %v807_v27 = vmul.f32 0.5, %v3630_v21 }
 0x14e   :  { %v812_v11 = vmul.f32 0.0, %v809_v1  ;;  %v810_v14 = vadd.f32 0.5, %v807_v27 }
 0x150   :  { %v4280_v30 = vadd.f32 %v813_v20, %v812_v11 }
 0x152   :  { %3631 = vtanh.f32 %v4280_v30 }
 0x15f   :  { %v3632_v15 = vpop.eup %3631 }
 0x160   :  { %v816_v8 = vmul.f32 %v3632_v15, %v810_v14 }
 0x162   :  { %v817_v7 = vpack.c.bf16 %v816_v8, %v816_v8 }
 0x164   :  { %818 = vst [vmem:[#allocation3] sm:$0xf] %v817_v7  ;;  %859 = vmatmul.mubr.bf16.vlgmr.msra.gmra.mxu0 %v817_v7  ;;  %900 = vmatmul.mubr.bf16.vlgmr.msra.gmra.mxu1 %v817_v7 }
 0x165   :  { %941 = vmatpush1.bf16.msra.mxu0 %v4028_v37  ;;  %982 = vmatpush1.bf16.msra.mxu1 %v4030_v38 }
 0x166   :  { %942 = vmatprep.subr.bf16.mxu0 %v4034_v39  ;;  %983 = vmatprep.subr.bf16.mxu1 %v4036_v40 }
 0x167   :  { %972 = vmatprep.mubr.bf16.mxu0 %v5198_v22  ;;  %1013 = vmatprep.mubr.bf16.mxu1 %v5198_v22 }
 0x169   :  { %943 = vmatpush1.bf16.msra.mxu0 %v4038_v41  ;;  %984 = vmatpush1.bf16.msra.mxu1 %v4042_v42 }
 0x16a   :  { %944 = vmatprep.subr.bf16.mxu0 %v4046_v43  ;;  %985 = vmatprep.subr.bf16.mxu1 %v4048_v44 }
 0x16d   :  { %945 = vmatpush1.bf16.msra.mxu0 %v4055_v46  ;;  %986 = vmatpush1.bf16.msra.mxu1 %v4057_v47 }
 0x16e   :  { %946 = vmatprep.subr.bf16.mxu0 %v4061_v48  ;;  %987 = vmatprep.subr.bf16.mxu1 %v4065_v49 }
 0x171   :  { %947 = vmatpush1.bf16.msra.mxu0 %v4067_v50  ;;  %988 = vmatpush1.bf16.msra.mxu1 %v4069_v51 }
 0x172   :  { %948 = vmatprep.subr.bf16.mxu0 %v4073_v52  ;;  %989 = vmatprep.subr.bf16.mxu1 %v4077_v53 }
 0x175   :  { %949 = vmatpush1.bf16.msra.mxu0 %v4084_v55  ;;  %990 = vmatpush1.bf16.msra.mxu1 %v4086_v56 }
 0x176   :  { %950 = vmatprep.subr.bf16.mxu0 %v4088_v57  ;;  %991 = vmatprep.subr.bf16.mxu1 %v4090_v58 }
 0x179   :  { %951 = vmatpush1.bf16.msra.mxu0 %v4096_v59  ;;  %992 = vmatpush1.bf16.msra.mxu1 %v4098_v60 }
 0x17a   :  { %952 = vmatprep.subr.bf16.mxu0 %v4100_v61  ;;  %993 = vmatprep.subr.bf16.mxu1 %v4102_v62 }
 0x17d   :  { %953 = vmatpush1.bf16.msra.mxu0 %v4113_v0  ;;  %994 = vmatpush1.bf16.msra.mxu1 %v4115_v2 }
 0x17e   :  { %954 = vmatprep.subr.bf16.mxu0 %v4117_v3  ;;  %995 = vmatprep.subr.bf16.mxu1 %v4119_v4 }
 0x181   :  { %955 = vmatpush1.bf16.msra.mxu0 %v4125_v5  ;;  %996 = vmatpush1.bf16.msra.mxu1 %v4127_v6 }
 0x182   :  { %1054 = vmatprep.subr.bf16.mxu0 %v4021_v34  ;;  %1095 = vmatprep.subr.bf16.mxu1 %v4023_v35 }
 0x224   :  { %v860_v13 = vpop.f32.mrf.mxu0  ;;  %v901_v19 = vpop.f32.mrf.mxu1 }
 0x225   :  { %v908_v36 = vadd.f32 %v860_v13, %v4204_v24  ;;  %v910_v11 = vadd.f32 %v901_v19, %v4207_v25 }
 0x226   :  { %v862_v45 = vpop.f32.mrf.mxu0  ;;  %v903_v10 = vpop.f32.mrf.mxu1 }
 0x227   :  { %v912_v17 = vmul.f32 0.5, %v908_v36  ;;  %v909_v23 = vadd.f32 %v862_v45, %v4209_v28  ;;  %v911_v9 = vadd.f32 %v903_v10, %v4212_v29  ;;  %v914_v20 = vmul.f32 0.5, %v910_v11 }
 0x228   :  { %v864_v26 = vpop.f32.mrf.mxu0  ;;  %v905_v31 = vpop.f32.mrf.mxu1 }
 0x229   :  { %3633 = vtanh.f32 %v912_v17  ;;  %v913_v12 = vmul.f32 0.5, %v909_v23 }
 0x22a   :  { %v865_v1 = vpop.f32.mrf.mxu0  ;;  %v906_v18 = vpop.f32.mrf.mxu1 }
 0x22b   :  { %3635 = vtanh.f32 %v913_v12 }
 0x22c   :  { %3637 = vtanh.f32 %v911_v9 }
 0x22d   :  { %3639 = vtanh.f32 %v914_v20 }
 0x236   :  { %v3634_v21 = vpop.eup %3633 }
 0x237   :  { %v918_v24 = vmul.f32 0.5, %v3634_v21 }
 0x238   :  { %v3636_v27 = vpop.eup %3635 }
 0x239   :  { %v921_v14 = vadd.f32 0.5, %v918_v24  ;;  %v919_v15 = vmul.f32 0.5, %v3636_v27  ;;  %v3638_v28 = vpop.eup %3637 }
 0x23a   :  { %v3640_v29 = vpop.eup %3639 }
 0x23b   :  { %v922_v8 = vadd.f32 0.5, %v919_v15  ;;  %v926_v7 = vmul.f32 %v3638_v28, %v921_v14  ;;  %v920_v45 = vmul.f32 0.5, %v3640_v29 }
 0x23d   :  { %v925_v13 = vmul.f32 %v922_v8, %v4280_v30  ;;  %v923_v10 = vadd.f32 0.5, %v920_v45 }
 0x23f   :  { %v4322_v36 = vadd.f32 %v926_v7, %v925_v13 }
 0x241   :  { %3641 = vtanh.f32 %v4322_v36 }
 0x24e   :  { %v3642_v25 = vpop.eup %3641 }
 0x24f   :  { %v929_v19 = vmul.f32 %v3642_v25, %v923_v10 }
 0x251   :  { %v930_v17 = vpack.c.bf16 %v929_v19, %v929_v19 }
 0x253   :  { %932 = vst [vmem:[#allocation3 + $0x4] sm:$0xf] %v930_v17  ;;  %973 = vmatmul.mubr.bf16.vlgmr.msra.gmra.mxu0 %v930_v17  ;;  %1014 = vmatmul.mubr.bf16.vlgmr.msra.gmra.mxu1 %v930_v17 }
 0x254   :  { %1055 = vmatpush1.bf16.msra.mxu0 %v4028_v37  ;;  %1096 = vmatpush1.bf16.msra.mxu1 %v4030_v38 }
 0x255   :  { %1056 = vmatprep.subr.bf16.mxu0 %v4034_v39  ;;  %1097 = vmatprep.subr.bf16.mxu1 %v4036_v40 }
 0x256   :  { %1086 = vmatprep.mubr.bf16.mxu0 %v5198_v22  ;;  %1127 = vmatprep.mubr.bf16.mxu1 %v5198_v22 }
 0x258   :  { %1057 = vmatpush1.bf16.msra.mxu0 %v4038_v41  ;;  %1098 = vmatpush1.bf16.msra.mxu1 %v4042_v42 }
 0x259   :  { %1058 = vmatprep.subr.bf16.mxu0 %v4046_v43  ;;  %1099 = vmatprep.subr.bf16.mxu1 %v4048_v44 }
 0x25c   :  { %1059 = vmatpush1.bf16.msra.mxu0 %v4055_v46  ;;  %1100 = vmatpush1.bf16.msra.mxu1 %v4057_v47 }
 0x25d   :  { %1060 = vmatprep.subr.bf16.mxu0 %v4061_v48  ;;  %1101 = vmatprep.subr.bf16.mxu1 %v4065_v49 }
 0x260   :  { %1061 = vmatpush1.bf16.msra.mxu0 %v4067_v50  ;;  %1102 = vmatpush1.bf16.msra.mxu1 %v4069_v51 }
 0x261   :  { %1062 = vmatprep.subr.bf16.mxu0 %v4073_v52  ;;  %1103 = vmatprep.subr.bf16.mxu1 %v4077_v53 }
 0x264   :  { %1063 = vmatpush1.bf16.msra.mxu0 %v4084_v55  ;;  %1104 = vmatpush1.bf16.msra.mxu1 %v4086_v56 }
 0x265   :  { %1064 = vmatprep.subr.bf16.mxu0 %v4088_v57  ;;  %1105 = vmatprep.subr.bf16.mxu1 %v4090_v58 }
 0x268   :  { %1065 = vmatpush1.bf16.msra.mxu0 %v4096_v59  ;;  %1106 = vmatpush1.bf16.msra.mxu1 %v4098_v60 }
 0x269   :  { %1066 = vmatprep.subr.bf16.mxu0 %v4100_v61  ;;  %1107 = vmatprep.subr.bf16.mxu1 %v4102_v62 }
 0x26c   :  { %1067 = vmatpush1.bf16.msra.mxu0 %v4113_v0  ;;  %1108 = vmatpush1.bf16.msra.mxu1 %v4115_v2 }
 0x26d   :  { %1068 = vmatprep.subr.bf16.mxu0 %v4117_v3  ;;  %1109 = vmatprep.subr.bf16.mxu1 %v4119_v4 }
 0x270   :  { %1069 = vmatpush1.bf16.msra.mxu0 %v4125_v5  ;;  %1110 = vmatpush1.bf16.msra.mxu1 %v4127_v6 }
 0x271   :  { %1168 = vmatprep.subr.bf16.mxu0 %v4021_v34  ;;  %1209 = vmatprep.subr.bf16.mxu1 %v4023_v35 }
 0x313   :  { %v974_v30 = vpop.f32.mrf.mxu0  ;;  %v1015_v23 = vpop.f32.mrf.mxu1 }
 0x314   :  { %v1022_v26 = vadd.f32 %v974_v30, %v4214_v32  ;;  %v1024_v34 = vadd.f32 %v1015_v23, %v4217_v33 }
 0x315   :  { %v976_v31 = vpop.f32.mrf.mxu0  ;;  %v1017_v12 = vpop.f32.mrf.mxu1 }
 0x316   :  { %v1026_v9 = vmul.f32 0.5, %v1022_v26  ;;  %v1023_v1 = vadd.f32 %v976_v31, %v4219_v54  ;;  %v1025_v21 = vadd.f32 %v1017_v12, %v4222_v63  ;;  %v1028_v35 = vmul.f32 0.5, %v1024_v34 }
 0x317   :  { %v978_v18 = vpop.f32.mrf.mxu0  ;;  %v1019_v11 = vpop.f32.mrf.mxu1 }
 0x318   :  { %3643 = vtanh.f32 %v1026_v9  ;;  %v1027_v20 = vmul.f32 0.5, %v1023_v1 }
 0x319   :  { %v979_v24 = vpop.f32.mrf.mxu0  ;;  %v1020_v27 = vpop.f32.mrf.mxu1 }
 0x31a   :  { %3645 = vtanh.f32 %v1027_v20 }
 0x31b   :  { %3647 = vtanh.f32 %v1025_v21 }
 0x31c   :  { %3649 = vtanh.f32 %v1028_v35 }
 0x325   :  { %v3644_v14 = vpop.eup %3643 }
 0x326   :  { %v1032_v32 = vmul.f32 0.5, %v3644_v14 }
 0x327   :  { %v3646_v15 = vpop.eup %3645 }
 0x328   :  { %v1035_v28 = vadd.f32 0.5, %v1032_v32  ;;  %v1033_v8 = vmul.f32 0.5, %v3646_v15  ;;  %v3648_v54 = vpop.eup %3647  ;;  %v4413_v32 = vld [vmem:[#allocation7 + $0xe0] ss:$16 sps:$4 sm:$0xff]   ;;  %v4416_v15 = vld [vmem:[#allocation7 + $0xe8] ss:$16 sps:$4 sm:$0xff]  }
 0x329   :  { %v3650_v63 = vpop.eup %3649 }
 0x32a   :  { %v1036_v7 = vadd.f32 0.5, %v1033_v8  ;;  %v1040_v13 = vmul.f32 %v3648_v54, %v1035_v28  ;;  %v1034_v10 = vmul.f32 0.5, %v3650_v63  ;;  %v4419_v28 = vld [vmem:[#allocation7 + $0xc4] ss:$16 sps:$4 sm:$0xff]   ;;  %v4422_v8 = vld [vmem:[#allocation7 + $0xcc] ss:$16 sps:$4 sm:$0xff]  }
 0x32b   :  { %v4427_v54 = vld [vmem:[#allocation7 + $0xc0] ss:$16 sps:$4 sm:$0xff]   ;;  %v4442_v63 = vld [vmem:[#allocation7 + $0xa8] ss:$16 sps:$4 sm:$0xff]  }
 0x32c   :  { %v1039_v29 = vmul.f32 %v1036_v7, %v4322_v36  ;;  %v1037_v25 = vadd.f32 0.5, %v1034_v10  ;;  %v4430_v7 = vld [vmem:[#allocation7 + $0xc8] ss:$16 sps:$4 sm:$0xff]   ;;  %v4445_v10 = vld [vmem:[#allocation7 + $0x84] ss:$16 sps:$4 sm:$0xff]  }
 0x32e   :  { %v4364_v45 = vadd.f32 %v1040_v13, %v1039_v29  ;;  %v4433_v13 = vld [vmem:[#allocation7 + $0xa4] ss:$16 sps:$4 sm:$0xff]   ;;  %v4436_v29 = vld [vmem:[#allocation7 + $0xac] ss:$16 sps:$4 sm:$0xff]  }
 0x330   :  { %3651 = vtanh.f32 %v4364_v45 }
 0x33d   :  { %v3652_v33 = vpop.eup %3651 }
 0x33e   :  { %v1043_v19 = vmul.f32 %v3652_v33, %v1037_v25  ;;  %v4448_v25 = vld [vmem:[#allocation7 + $0x8c] ss:$16 sps:$4 sm:$0xff]   ;;  %v4451_v33 = vld [vmem:[#allocation7 + $0x80] ss:$16 sps:$4 sm:$0xff]  }
 0x340   :  { %v1044_v17 = vpack.c.bf16 %v1043_v19, %v1043_v19  ;;  %v4454_v19 = vld [vmem:[#allocation7 + $0x88] ss:$16 sps:$4 sm:$0xff]  }
 0x342   :  { %1046 = vst [vmem:[#allocation3 + $0x8] sm:$0xf] %v1044_v17  ;;  %1087 = vmatmul.mubr.bf16.vlgmr.msra.gmra.mxu0 %v1044_v17  ;;  %1128 = vmatmul.mubr.bf16.vlgmr.msra.gmra.mxu1 %v1044_v17  ;;  %v4457_v17 = vld [vmem:[#allocation7 + $0x64] ss:$16 sps:$4 sm:$0xff]  }
 0x343   :  { %1169 = vmatpush1.bf16.msra.mxu0 %v4028_v37  ;;  %1210 = vmatpush1.bf16.msra.mxu1 %v4030_v38  ;;  %v4399_v37 = vld [vmem:[#allocation7 + $0xe4] ss:$16 sps:$4 sm:$0xff]   ;;  %v4402_v38 = vld [vmem:[#allocation7 + $0xec] ss:$16 sps:$4 sm:$0xff]  }
 0x344   :  { %1170 = vmatprep.subr.bf16.mxu0 %v4034_v39  ;;  %1211 = vmatprep.subr.bf16.mxu1 %v4036_v40 }
 0x345   :  { %1200 = vmatprep.mubr.bf16.mxu0 %v5198_v22  ;;  %1241 = vmatprep.mubr.bf16.mxu1 %v5198_v22 }
 0x347   :  { %1171 = vmatpush1.bf16.msra.mxu0 %v4038_v41  ;;  %1212 = vmatpush1.bf16.msra.mxu1 %v4042_v42  ;;  %v5199_v41 = vld [vmem:[#allocation16_spill] sm:$0xff] }
 0x348   :  { %1172 = vmatprep.subr.bf16.mxu0 %v4046_v43  ;;  %1213 = vmatprep.subr.bf16.mxu1 %v4048_v44 }
 0x34b   :  { %1173 = vmatpush1.bf16.msra.mxu0 %v4055_v46  ;;  %1214 = vmatpush1.bf16.msra.mxu1 %v4057_v47  ;;  %v5200_v47 = vld [vmem:[#allocation18_spill] sm:$0xff] }
 0x34c   :  { %1174 = vmatprep.subr.bf16.mxu0 %v4061_v48  ;;  %1215 = vmatprep.subr.bf16.mxu1 %v4065_v49 }
 0x34f   :  { %1175 = vmatpush1.bf16.msra.mxu0 %v4067_v50  ;;  %1216 = vmatpush1.bf16.msra.mxu1 %v4069_v51 }
 0x350   :  { %1176 = vmatprep.subr.bf16.mxu0 %v4073_v52  ;;  %1217 = vmatprep.subr.bf16.mxu1 %v4077_v53  ;;  %v5201_v52 = vld [vmem:[#allocation19_spill] sm:$0xff] }
 0x353   :  { %1177 = vmatpush1.bf16.msra.mxu0 %v4084_v55  ;;  %1218 = vmatpush1.bf16.msra.mxu1 %v4086_v56 }
 0x354   :  { %1178 = vmatprep.subr.bf16.mxu0 %v4088_v57  ;;  %1219 = vmatprep.subr.bf16.mxu1 %v4090_v58  ;;  %v5202_v57 = vld [vmem:[#allocation17_spill] sm:$0xff] }
 0x357   :  { %1179 = vmatpush1.bf16.msra.mxu0 %v4096_v59  ;;  %1220 = vmatpush1.bf16.msra.mxu1 %v4098_v60 }
 0x358   :  { %1180 = vmatprep.subr.bf16.mxu0 %v4100_v61  ;;  %1221 = vmatprep.subr.bf16.mxu1 %v4102_v62 }
 0x35b   :  { %1181 = vmatpush1.bf16.msra.mxu0 %v4113_v0  ;;  %1222 = vmatpush1.bf16.msra.mxu1 %v4115_v2 }
 0x35c   :  { %1182 = vmatprep.subr.bf16.mxu0 %v4117_v3  ;;  %1223 = vmatprep.subr.bf16.mxu1 %v4119_v4 }
 0x35f   :  { %1183 = vmatpush1.bf16.msra.mxu0 %v4125_v5  ;;  %1224 = vmatpush1.bf16.msra.mxu1 %v4127_v6 }
 0x360   :  { %1282 = vmatprep.subr.bf16.mxu0 %v4399_v37  ;;  %1323 = vmatprep.subr.bf16.mxu1 %v4402_v38 }
 0x402   :  { %v1088_v39 = vpop.f32.mrf.mxu0  ;;  %v1129_v40 = vpop.f32.mrf.mxu1 }
 0x403   :  { %v1136_v42 = vadd.f32 %v1088_v39, %v5199_v41  ;;  %v1138_v58 = vadd.f32 %v1129_v40, %v5202_v57  ;;  %v4460_v39 = vld [vmem:[#allocation7 + $0x6c] ss:$16 sps:$4 sm:$0xff]   ;;  %v4463_v40 = vld [vmem:[#allocation7 + $0x60] ss:$16 sps:$4 sm:$0xff]   ;;  %v4466_v41 = vld [vmem:[#allocation7 + $0x68] ss:$16 sps:$4 sm:$0xff]  }
 0x404   :  { %v1090_v43 = vpop.f32.mrf.mxu0  ;;  %v1131_v44 = vpop.f32.mrf.mxu1 }
 0x405   :  { %v1140_v46 = vmul.f32 0.5, %v1136_v42  ;;  %v1137_v48 = vadd.f32 %v1090_v43, %v5200_v47  ;;  %v1139_v53 = vadd.f32 %v1131_v44, %v5201_v52  ;;  %v1142_v36 = vmul.f32 0.5, %v1138_v58  ;;  %v4469_v42 = vld [vmem:[#allocation7 + $0x44] ss:$16 sps:$4 sm:$0xff]   ;;  %v4472_v43 = vld [vmem:[#allocation7 + $0x4c] ss:$16 sps:$4 sm:$0xff]  }
 0x406   :  { %v1092_v49 = vpop.f32.mrf.mxu0  ;;  %v1133_v50 = vpop.f32.mrf.mxu1 }
 0x407   :  { %3653 = vtanh.f32 %v1140_v46  ;;  %v1141_v51 = vmul.f32 0.5, %v1137_v48 }
 0x408   :  { %v1093_v55 = vpop.f32.mrf.mxu0  ;;  %v1134_v56 = vpop.f32.mrf.mxu1 }
 0x409   :  { %3655 = vtanh.f32 %v1141_v51  ;;  %v5206_v51 = vld [vmem:[#allocation21_spill] sm:$0xff] }
 0x40a   :  { %3657 = vtanh.f32 %v1139_v53 }
 0x40b   :  { %3659 = vtanh.f32 %v1142_v36 }
 0x414   :  { %v3654_v30 = vpop.eup %3653 }
 0x415   :  { %v1146_v23 = vmul.f32 0.5, %v3654_v30 }
 0x416   :  { %v3656_v26 = vpop.eup %3655 }
 0x417   :  { %v1149_v31 = vadd.f32 0.5, %v1146_v23  ;;  %v1147_v12 = vmul.f32 0.5, %v3656_v26  ;;  %v3658_v9 = vpop.eup %3657 }
 0x418   :  { %v3660_v21 = vpop.eup %3659 }
 0x419   :  { %v1150_v1 = vadd.f32 0.5, %v1147_v12  ;;  %v1154_v18 = vmul.f32 %v3658_v9, %v1149_v31  ;;  %v1148_v24 = vmul.f32 0.5, %v3660_v21 }
 0x41b   :  { %v1153_v11 = vmul.f32 %v1150_v1, %v4364_v45  ;;  %v1151_v27 = vadd.f32 0.5, %v1148_v24  ;;  %v4439_v45 = vld [vmem:[#allocation7 + $0xa0] ss:$16 sps:$4 sm:$0xff]  }
 0x41d   :  { %v4410_v20 = vadd.f32 %v1154_v18, %v1153_v11 }
 0x41f   :  { %3661 = vtanh.f32 %v4410_v20 }
 0x42c   :  { %v3662_v34 = vpop.eup %3661 }
 0x42d   :  { %v1157_v35 = vmul.f32 %v3662_v34, %v1151_v27  ;;  %v4520_v27 = vld [vmem:[#allocation7 + $0x48] ss:$16 sps:$4 sm:$0xff]   ;;  %v4523_v34 = vld [vmem:[#allocation7 + $0x24] ss:$16 sps:$4 sm:$0xff]  }
 0x42f   :  { %v1158_v14 = vpack.c.bf16 %v1157_v35, %v1157_v35  ;;  %v4526_v35 = vld [vmem:[#allocation7 + $0x2c] ss:$16 sps:$4 sm:$0xff]  }
 0x431   :  { %1160 = vst [vmem:[#allocation3 + $0xc] sm:$0xf] %v1158_v14  ;;  %1201 = vmatmul.mubr.bf16.vlgmr.msra.gmra.mxu0 %v1158_v14  ;;  %1242 = vmatmul.mubr.bf16.vlgmr.msra.gmra.mxu1 %v1158_v14  ;;  %v4529_v14 = vld [vmem:[#allocation7 + $0x20] ss:$16 sps:$4 sm:$0xff]  }
 0x432   :  { %1283 = vmatpush1.bf16.msra.mxu0 %v4413_v32  ;;  %1324 = vmatpush1.bf16.msra.mxu1 %v4416_v15 }
 0x433   :  { %1284 = vmatprep.subr.bf16.mxu0 %v4419_v28  ;;  %1325 = vmatprep.subr.bf16.mxu1 %v4422_v8 }
 0x434   :  { %1314 = vmatprep.mubr.bf16.mxu0 %v5198_v22  ;;  %1355 = vmatprep.mubr.bf16.mxu1 %v5198_v22 }
 0x436   :  { %1285 = vmatpush1.bf16.msra.mxu0 %v4427_v54  ;;  %1326 = vmatpush1.bf16.msra.mxu1 %v4430_v7 }
 0x437   :  { %1286 = vmatprep.subr.bf16.mxu0 %v4433_v13  ;;  %1327 = vmatprep.subr.bf16.mxu1 %v4436_v29 }
 0x43a   :  { %1287 = vmatpush1.bf16.msra.mxu0 %v4439_v45  ;;  %1328 = vmatpush1.bf16.msra.mxu1 %v4442_v63 }
 0x43b   :  { %1288 = vmatprep.subr.bf16.mxu0 %v4445_v10  ;;  %1329 = vmatprep.subr.bf16.mxu1 %v4448_v25 }
 0x43e   :  { %1289 = vmatpush1.bf16.msra.mxu0 %v4451_v33  ;;  %1330 = vmatpush1.bf16.msra.mxu1 %v4454_v19 }
 0x43f   :  { %1290 = vmatprep.subr.bf16.mxu0 %v4457_v17  ;;  %1331 = vmatprep.subr.bf16.mxu1 %v4460_v39 }
 0x442   :  { %1291 = vmatpush1.bf16.msra.mxu0 %v4463_v40  ;;  %1332 = vmatpush1.bf16.msra.mxu1 %v4466_v41 }
 0x443   :  { %1292 = vmatprep.subr.bf16.mxu0 %v4469_v42  ;;  %1333 = vmatprep.subr.bf16.mxu1 %v4472_v43 }
 0x446   :  { %1293 = vmatpush1.bf16.msra.mxu0 %v4096_v59  ;;  %1334 = vmatpush1.bf16.msra.mxu1 %v4098_v60 }
 0x447   :  { %1294 = vmatprep.subr.bf16.mxu0 %v4100_v61  ;;  %1335 = vmatprep.subr.bf16.mxu1 %v4102_v62  ;;  %v5203_v61 = vld [vmem:[#allocation20_spill] sm:$0xff] }
 0x44a   :  { %1295 = vmatpush1.bf16.msra.mxu0 %v4113_v0  ;;  %1336 = vmatpush1.bf16.msra.mxu1 %v4115_v2  ;;  %v5204_v2 = vld [vmem:[#allocation22_spill] sm:$0xff] }
 0x44b   :  { %1296 = vmatprep.subr.bf16.mxu0 %v4117_v3  ;;  %1337 = vmatprep.subr.bf16.mxu1 %v4119_v4 }
 0x44e   :  { %1297 = vmatpush1.bf16.msra.mxu0 %v4125_v5  ;;  %1338 = vmatpush1.bf16.msra.mxu1 %v4127_v6  ;;  %v5205_v5 = vld [vmem:[#allocation23_spill] sm:$0xff] }
 0x44f   :  { %1396 = vmatprep.subr.bf16.mxu0 %v4399_v37  ;;  %1437 = vmatprep.subr.bf16.mxu1 %v4402_v38 }
 0x4f1   :  { %v1202_v59 = vpop.f32.mrf.mxu0  ;;  %v1243_v60 = vpop.f32.mrf.mxu1 }
 0x4f2   :  { %v1250_v62 = vadd.f32 %v1202_v59, %v5203_v61  ;;  %v1252_v52 = vadd.f32 %v1243_v60, %v5206_v51  ;;  %v4532_v59 = vld [vmem:[#allocation7 + $0x28] ss:$16 sps:$4 sm:$0xff]   ;;  %v4535_v60 = vld [vmem:[#allocation7 + $0x4] ss:$16 sps:$4 sm:$0xff]   ;;  %v4538_v61 = vld [vmem:[#allocation7 + $0xc] ss:$16 sps:$4 sm:$0xff]  }
 0x4f3   :  { %v1204_v44 = vpop.f32.mrf.mxu0  ;;  %v1245_v0 = vpop.f32.mrf.mxu1 }
 0x4f4   :  { %v1254_v46 = vmul.f32 0.5, %v1250_v62  ;;  %v1251_v47 = vadd.f32 %v1204_v44, %v5204_v2  ;;  %v1253_v49 = vadd.f32 %v1245_v0, %v5205_v5  ;;  %v1256_v53 = vmul.f32 0.5, %v1252_v52  ;;  %v4541_v62 = vld [vmem:[#allocation7] ss:$16 sps:$4 sm:$0xff]   ;;  %v4544_v44 = vld [vmem:[#allocation7 + $0x8] ss:$16 sps:$4 sm:$0xff]  }
 0x4f5   :  { %v1206_v3 = vpop.f32.mrf.mxu0  ;;  %v1247_v48 = vpop.f32.mrf.mxu1  ;;  %v5207_v2 = vld [vmem:[#allocation24_spill] sm:$0xff]  ;;  %v5208_v5 = vld [vmem:[#allocation26_spill] sm:$0xff]  ;;  %v5209_v52 = vld [vmem:[#allocation27_spill] sm:$0xff] }
 0x4f6   :  { %3663 = vtanh.f32 %v1254_v46  ;;  %v1255_v4 = vmul.f32 0.5, %v1251_v47 }
 0x4f7   :  { %v1207_v6 = vpop.f32.mrf.mxu0  ;;  %v1248_v50 = vpop.f32.mrf.mxu1 }
 0x4f8   :  { %3665 = vtanh.f32 %v1255_v4 }
 0x4f9   :  { %3667 = vtanh.f32 %v1253_v49 }
 0x4fa   :  { %3669 = vtanh.f32 %v1256_v53 }
 0x503   :  { %v3664_v55 = vpop.eup %3663 }
 0x504   :  { %v1260_v56 = vmul.f32 0.5, %v3664_v55 }
 0x505   :  { %v3666_v57 = vpop.eup %3665 }
 0x506   :  { %v1263_v58 = vadd.f32 0.5, %v1260_v56  ;;  %v1261_v36 = vmul.f32 0.5, %v3666_v57  ;;  %v3668_v30 = vpop.eup %3667 }
 0x507   :  { %v3670_v9 = vpop.eup %3669 }
 0x508   :  { %v1264_v23 = vadd.f32 0.5, %v1261_v36  ;;  %v1268_v26 = vmul.f32 %v3668_v30, %v1263_v58  ;;  %v1262_v1 = vmul.f32 0.5, %v3670_v9 }
 0x50a   :  { %v1267_v31 = vmul.f32 %v1264_v23, %v4410_v20  ;;  %v1265_v18 = vadd.f32 0.5, %v1262_v1  ;;  %v4517_v20 = vld [vmem:[#allocation7 + $0x40] ss:$16 sps:$4 sm:$0xff]  }
 0x50c   :  { %v4492_v12 = vadd.f32 %v1268_v26, %v1267_v31 }
 0x50e   :  { %3671 = vtanh.f32 %v4492_v12 }
 0x51b   :  { %v3672_v11 = vpop.eup %3671 }
 0x51c   :  { %v1271_v21 = vmul.f32 %v3672_v11, %v1265_v18 }
 0x51e   :  { %v1272_v24 = vpack.c.bf16 %v1271_v21, %v1271_v21 }
 0x520   :  { %1274 = vst [vmem:[#allocation3 + $0x10] sm:$0xf] %v1272_v24  ;;  %1315 = vmatmul.mubr.bf16.vlgmr.msra.gmra.mxu0 %v1272_v24  ;;  %1356 = vmatmul.mubr.bf16.vlgmr.msra.gmra.mxu1 %v1272_v24 }
 0x521   :  { %1397 = vmatpush1.bf16.msra.mxu0 %v4413_v32  ;;  %1438 = vmatpush1.bf16.msra.mxu1 %v4416_v15 }
 0x522   :  { %1398 = vmatprep.subr.bf16.mxu0 %v4419_v28  ;;  %1439 = vmatprep.subr.bf16.mxu1 %v4422_v8 }
 0x523   :  { %1428 = vmatprep.mubr.bf16.mxu0 %v5198_v22  ;;  %1469 = vmatprep.mubr.bf16.mxu1 %v5198_v22 }
 0x525   :  { %1399 = vmatpush1.bf16.msra.mxu0 %v4427_v54  ;;  %1440 = vmatpush1.bf16.msra.mxu1 %v4430_v7 }
 0x526   :  { %1400 = vmatprep.subr.bf16.mxu0 %v4433_v13  ;;  %1441 = vmatprep.subr.bf16.mxu1 %v4436_v29 }
 0x529   :  { %1401 = vmatpush1.bf16.msra.mxu0 %v4439_v45  ;;  %1442 = vmatpush1.bf16.msra.mxu1 %v4442_v63 }
 0x52a   :  { %1402 = vmatprep.subr.bf16.mxu0 %v4445_v10  ;;  %1443 = vmatprep.subr.bf16.mxu1 %v4448_v25 }
 0x52d   :  { %1403 = vmatpush1.bf16.msra.mxu0 %v4451_v33  ;;  %1444 = vmatpush1.bf16.msra.mxu1 %v4454_v19 }
 0x52e   :  { %1404 = vmatprep.subr.bf16.mxu0 %v4457_v17  ;;  %1445 = vmatprep.subr.bf16.mxu1 %v4460_v39 }
 0x531   :  { %1405 = vmatpush1.bf16.msra.mxu0 %v4463_v40  ;;  %1446 = vmatpush1.bf16.msra.mxu1 %v4466_v41 }
 0x532   :  { %1406 = vmatprep.subr.bf16.mxu0 %v4469_v42  ;;  %1447 = vmatprep.subr.bf16.mxu1 %v4472_v43 }
 0x535   :  { %1407 = vmatpush1.bf16.msra.mxu0 %v4517_v20  ;;  %1448 = vmatpush1.bf16.msra.mxu1 %v4520_v27 }
 0x536   :  { %1408 = vmatprep.subr.bf16.mxu0 %v4523_v34  ;;  %1449 = vmatprep.subr.bf16.mxu1 %v4526_v35 }
 0x539   :  { %1409 = vmatpush1.bf16.msra.mxu0 %v4529_v14  ;;  %1450 = vmatpush1.bf16.msra.mxu1 %v4532_v59 }
 0x53a   :  { %1410 = vmatprep.subr.bf16.mxu0 %v4535_v60  ;;  %1451 = vmatprep.subr.bf16.mxu1 %v4538_v61 }
 0x53d   :  { %1411 = vmatpush1.bf16.msra.mxu0 %v4541_v62  ;;  %1452 = vmatpush1.bf16.msra.mxu1 %v4544_v44 }
 0x53e   :  { %1510 = vmatprep.subr.bf16.mxu0 %v4399_v37  ;;  %1551 = vmatprep.subr.bf16.mxu1 %v4402_v38  ;;  %v5210_v37 = vld [vmem:[#allocation25_spill] sm:$0xff] }
 0x5e0   :  { %v1316_v0 = vpop.f32.mrf.mxu0  ;;  %v1357_v46 = vpop.f32.mrf.mxu1 }
 0x5e1   :  { %v1364_v47 = vadd.f32 %v1316_v0, %v5207_v2  ;;  %v1366_v38 = vadd.f32 %v1357_v46, %v5210_v37  ;;  %v3529_v37 = vld [vmem:[#allocation9 + $0xa4] ss:$16 sps:$4 sm:$0xff]  }
 0x5e2   :  { %v1318_v3 = vpop.f32.mrf.mxu0  ;;  %v1359_v48 = vpop.f32.mrf.mxu1 }
 0x5e3   :  { %v1368_v4 = vmul.f32 0.5, %v1364_v47  ;;  %v1365_v49 = vadd.f32 %v1318_v3, %v5208_v5  ;;  %v1367_v53 = vadd.f32 %v1359_v48, %v5209_v52  ;;  %v1370_v57 = vmul.f32 0.5, %v1366_v38  ;;  %v3523_v52 = vld [vmem:[#allocation9 + $0xc4] ss:$16 sps:$4 sm:$0xff]   ;;  %v3532_v38 = vld [vmem:[#allocation9 + $0xac] ss:$16 sps:$4 sm:$0xff]  }
 0x5e4   :  { %v1320_v6 = vpop.f32.mrf.mxu0  ;;  %v1361_v50 = vpop.f32.mrf.mxu1 }
 0x5e5   :  { %3673 = vtanh.f32 %v1368_v4  ;;  %v1369_v51 = vmul.f32 0.5, %v1365_v49  ;;  %v3515_v6 = vld [vmem:[#allocation9 + $0xe0] ss:$16 sps:$4 sm:$0xff]   ;;  %v3518_v50 = vld [vmem:[#allocation9 + $0xe8] ss:$16 sps:$4 sm:$0xff]  }
 0x5e6   :  { %v1321_v55 = vpop.f32.mrf.mxu0  ;;  %v1362_v56 = vpop.f32.mrf.mxu1 }
 0x5e7   :  { %3675 = vtanh.f32 %v1369_v51  ;;  %v3521_v55 = vld [vmem:[#allocation9 + $0xc0] ss:$16 sps:$4 sm:$0xff]   ;;  %v3524_v56 = vld [vmem:[#allocation9 + $0xc8] ss:$16 sps:$4 sm:$0xff]  }
 0x5e8   :  { %3677 = vtanh.f32 %v1367_v53  ;;  %v3526_v53 = vld [vmem:[#allocation9 + $0xcc] ss:$16 sps:$4 sm:$0xff]  }
 0x5e9   :  { %3679 = vtanh.f32 %v1370_v57  ;;  %v3527_v57 = vld [vmem:[#allocation9 + $0xa0] ss:$16 sps:$4 sm:$0xff]  }
 0x5f2   :  { %v3674_v58 = vpop.eup %3673 }
 0x5f3   :  { %v1374_v36 = vmul.f32 0.5, %v3674_v58  ;;  %v3530_v58 = vld [vmem:[#allocation9 + $0xa8] ss:$16 sps:$4 sm:$0xff]  }
 0x5f4   :  { %v3676_v30 = vpop.eup %3675 }
 0x5f5   :  { %v1377_v23 = vadd.f32 0.5, %v1374_v36  ;;  %v1375_v26 = vmul.f32 0.5, %v3676_v30  ;;  %v3678_v31 = vpop.eup %3677  ;;  %v3535_v36 = vld [vmem:[#allocation9 + $0x84] ss:$16 sps:$4 sm:$0xff]   ;;  %v3538_v30 = vld [vmem:[#allocation9 + $0x8c] ss:$16 sps:$4 sm:$0xff]  }
 0x5f6   :  { %v3680_v21 = vpop.eup %3679 }
 0x5f7   :  { %v1378_v9 = vadd.f32 0.5, %v1375_v26  ;;  %v1382_v1 = vmul.f32 %v3678_v31, %v1377_v23  ;;  %v1376_v24 = vmul.f32 0.5, %v3680_v21  ;;  %v3533_v23 = vld [vmem:[#allocation9 + $0x80] ss:$16 sps:$4 sm:$0xff]   ;;  %v3536_v26 = vld [vmem:[#allocation9 + $0x88] ss:$16 sps:$4 sm:$0xff]  }
 0x5f8   :  { %v3541_v31 = vld [vmem:[#allocation9 + $0x64] ss:$16 sps:$4 sm:$0xff]   ;;  %v3550_v21 = vld [vmem:[#allocation9 + $0x4c] ss:$16 sps:$4 sm:$0xff]  }
 0x5f9   :  { %v1381_v18 = vmul.f32 %v1378_v9, %v4492_v12  ;;  %v1379_v0 = vadd.f32 0.5, %v1376_v24  ;;  %v3544_v9 = vld [vmem:[#allocation9 + $0x6c] ss:$16 sps:$4 sm:$0xff]   ;;  %v3545_v24 = vld [vmem:[#allocation9 + $0x40] ss:$16 sps:$4 sm:$0xff]  }
 0x5fb   :  { %v4554_v11 = vadd.f32 %v1382_v1, %v1381_v18  ;;  %v3539_v1 = vld [vmem:[#allocation9 + $0x60] ss:$16 sps:$4 sm:$0xff]   ;;  %v3542_v18 = vld [vmem:[#allocation9 + $0x68] ss:$16 sps:$4 sm:$0xff]  }
 0x5fd   :  { %3681 = vtanh.f32 %v4554_v11 }
 0x60a   :  { %v3682_v46 = vpop.eup %3681 }
 0x60b   :  { %v1385_v2 = vmul.f32 %v3682_v46, %v1379_v0  ;;  %v3548_v0 = vld [vmem:[#allocation9 + $0x48] ss:$16 sps:$4 sm:$0xff]   ;;  %v3553_v46 = vld [vmem:[#allocation9 + $0x24] ss:$16 sps:$4 sm:$0xff]  }
 0x60d   :  { %v1386_v47 = vpack.c.bf16 %v1385_v2, %v1385_v2  ;;  %v3556_v2 = vld [vmem:[#allocation9 + $0x2c] ss:$16 sps:$4 sm:$0xff]  }
 0x60f   :  { %1388 = vst [vmem:[#allocation3 + $0x14] sm:$0xf] %v1386_v47  ;;  %1429 = vmatmul.mubr.bf16.vlgmr.msra.gmra.mxu0 %v1386_v47  ;;  %1470 = vmatmul.mubr.bf16.vlgmr.msra.gmra.mxu1 %v1386_v47  ;;  %v3551_v47 = vld [vmem:[#allocation9 + $0x20] ss:$16 sps:$4 sm:$0xff]  }
 0x610   :  { %1511 = vmatpush1.bf16.msra.mxu0 %v4413_v32  ;;  %1552 = vmatpush1.bf16.msra.mxu1 %v4416_v15  ;;  %v3517_v32 = vld [vmem:[#allocation9 + $0xe4] ss:$16 sps:$4 sm:$0xff]   ;;  %v3520_v15 = vld [vmem:[#allocation9 + $0xec] ss:$16 sps:$4 sm:$0xff]  }
 0x611   :  { %1512 = vmatprep.subr.bf16.mxu0 %v4419_v28  ;;  %1553 = vmatprep.subr.bf16.mxu1 %v4422_v8 }
 0x612   :  { %1542 = vmatprep.mubr.bf16.mxu0 %v5198_v22  ;;  %1583 = vmatprep.mubr.bf16.mxu1 %v5198_v22 }
 0x614   :  { %1513 = vmatpush1.bf16.msra.mxu0 %v4427_v54  ;;  %1554 = vmatpush1.bf16.msra.mxu1 %v4430_v7  ;;  %v5211_v54 = vld [vmem:[#allocation28_spill] sm:$0xff] }
 0x615   :  { %1514 = vmatprep.subr.bf16.mxu0 %v4433_v13  ;;  %1555 = vmatprep.subr.bf16.mxu1 %v4436_v29 }
 0x618   :  { %1515 = vmatpush1.bf16.msra.mxu0 %v4439_v45  ;;  %1556 = vmatpush1.bf16.msra.mxu1 %v4442_v63  ;;  %v5212_v63 = vld [vmem:[#allocation30_spill] sm:$0xff] }
 0x619   :  { %1516 = vmatprep.subr.bf16.mxu0 %v4445_v10  ;;  %1557 = vmatprep.subr.bf16.mxu1 %v4448_v25 }
 0x61c   :  { %1517 = vmatpush1.bf16.msra.mxu0 %v4451_v33  ;;  %1558 = vmatpush1.bf16.msra.mxu1 %v4454_v19 }
 0x61d   :  { %1518 = vmatprep.subr.bf16.mxu0 %v4457_v17  ;;  %1559 = vmatprep.subr.bf16.mxu1 %v4460_v39  ;;  %v5213_v17 = vld [vmem:[#allocation31_spill] sm:$0xff] }
 0x620   :  { %1519 = vmatpush1.bf16.msra.mxu0 %v4463_v40  ;;  %1560 = vmatpush1.bf16.msra.mxu1 %v4466_v41 }
 0x621   :  { %1520 = vmatprep.subr.bf16.mxu0 %v4469_v42  ;;  %1561 = vmatprep.subr.bf16.mxu1 %v4472_v43  ;;  %v5214_v42 = vld [vmem:[#allocation29_spill] sm:$0xff] }
 0x624   :  { %1521 = vmatpush1.bf16.msra.mxu0 %v4517_v20  ;;  %1562 = vmatpush1.bf16.msra.mxu1 %v4520_v27 }
 0x625   :  { %1522 = vmatprep.subr.bf16.mxu0 %v4523_v34  ;;  %1563 = vmatprep.subr.bf16.mxu1 %v4526_v35 }
 0x628   :  { %1523 = vmatpush1.bf16.msra.mxu0 %v4529_v14  ;;  %1564 = vmatpush1.bf16.msra.mxu1 %v4532_v59 }
 0x629   :  { %1524 = vmatprep.subr.bf16.mxu0 %v4535_v60  ;;  %1565 = vmatprep.subr.bf16.mxu1 %v4538_v61 }
 0x62c   :  { %1525 = vmatpush1.bf16.msra.mxu0 %v4541_v62  ;;  %1566 = vmatpush1.bf16.msra.mxu1 %v4544_v44 }
 0x62d   :  { %1863 = vmatprep.subr.bf16.mxu0 %v3517_v32  ;;  %1936 = vmatprep.subr.bf16.mxu1 %v3520_v15  ;;  %v3554_v32 = vld [vmem:[#allocation9 + $0x28] ss:$16 sps:$4 sm:$0xff]   ;;  %v3559_v15 = vld [vmem:[#allocation9 + $0x4] ss:$16 sps:$4 sm:$0xff]  }
 0x6cf   :  { %v1430_v28 = vpop.f32.mrf.mxu0  ;;  %v1471_v8 = vpop.f32.mrf.mxu1 }
 0x6d0   :  { %v1478_v7 = vadd.f32 %v1430_v28, %v5211_v54  ;;  %v1480_v43 = vadd.f32 %v1471_v8, %v5214_v42  ;;  %v3562_v28 = vld [vmem:[#allocation9 + $0xc] ss:$16 sps:$4 sm:$0xff]   ;;  %v3557_v8 = vld [vmem:[#allocation9] ss:$16 sps:$4 sm:$0xff]   ;;  %v3560_v54 = vld [vmem:[#allocation9 + $0x8] ss:$16 sps:$4 sm:$0xff]  }
 0x6d1   :  { %v1432_v13 = vpop.f32.mrf.mxu0  ;;  %v1473_v29 = vpop.f32.mrf.mxu1  ;;  %v4633_v42 = vld [vmem:[#allocation10 + $0xa0] ss:$16 sps:$4 sm:$0xff]  }
 0x6d2   :  { %v1482_v45 = vmul.f32 0.5, %v1478_v7  ;;  %v1479_v10 = vadd.f32 %v1432_v13, %v5212_v63  ;;  %v1481_v39 = vadd.f32 %v1473_v29, %v5213_v17  ;;  %v1484_v12 = vmul.f32 0.5, %v1480_v43  ;;  %v3563_v7 = vld [vmem:[#allocation3] sm:$0xff]   ;;  %v3564_v13 = vld [vmem:[#allocation3 + $0x8] sm:$0xff]   ;;  %v3565_v29 = vld [vmem:[#allocation3 + $0x10] sm:$0xff]  }
 0x6d3   :  { %v1434_v25 = vpop.f32.mrf.mxu0  ;;  %v1475_v33 = vpop.f32.mrf.mxu1  ;;  %v4607_v63 = vld [vmem:[#allocation10 + $0xec] ss:$16 sps:$4 sm:$0xff]   ;;  %v4621_v17 = vld [vmem:[#allocation10 + $0xc0] ss:$16 sps:$4 sm:$0xff]   ;;  %v4635_v43 = vld [vmem:[#allocation10 + $0xa8] ss:$16 sps:$4 sm:$0xff]  }
 0x6d4   :  { %3683 = vtanh.f32 %v1482_v45  ;;  %v1483_v19 = vmul.f32 0.5, %v1479_v10  ;;  %v4605_v45 = vld [vmem:[#allocation10 + $0xe4] ss:$16 sps:$4 sm:$0xff]   ;;  %v4609_v10 = vld [vmem:[#allocation10 + $0xe0] ss:$16 sps:$4 sm:$0xff]  }
 0x6d5   :  { %v1435_v40 = vpop.f32.mrf.mxu0  ;;  %v1476_v41 = vpop.f32.mrf.mxu1  ;;  %v4611_v25 = vld [vmem:[#allocation10 + $0xe8] ss:$16 sps:$4 sm:$0xff]   ;;  %v4617_v33 = vld [vmem:[#allocation10 + $0xc4] ss:$16 sps:$4 sm:$0xff]  }
 0x6d6   :  { %3685 = vtanh.f32 %v1483_v19  ;;  %v4619_v19 = vld [vmem:[#allocation10 + $0xcc] ss:$16 sps:$4 sm:$0xff]   ;;  %v4629_v40 = vld [vmem:[#allocation10 + $0xa4] ss:$16 sps:$4 sm:$0xff]  }
 0x6d7   :  { %3687 = vtanh.f32 %v1481_v39  ;;  %v4623_v39 = vld [vmem:[#allocation10 + $0xc8] ss:$16 sps:$4 sm:$0xff]   ;;  %v4631_v41 = vld [vmem:[#allocation10 + $0xac] ss:$16 sps:$4 sm:$0xff]  }
 0x6d8   :  { %3689 = vtanh.f32 %v1484_v12  ;;  %v4641_v12 = vld [vmem:[#allocation10 + $0x84] ss:$16 sps:$4 sm:$0xff]  }
 0x6e1   :  { %v3684_v20 = vpop.eup %3683 }
 0x6e2   :  { %v1488_v27 = vmul.f32 0.5, %v3684_v20  ;;  %v4643_v20 = vld [vmem:[#allocation10 + $0x8c] ss:$16 sps:$4 sm:$0xff]  }
 0x6e3   :  { %v3686_v34 = vpop.eup %3685 }
 0x6e4   :  { %v1491_v35 = vadd.f32 0.5, %v1488_v27  ;;  %v1489_v14 = vmul.f32 0.5, %v3686_v34  ;;  %v3688_v59 = vpop.eup %3687  ;;  %v4645_v27 = vld [vmem:[#allocation10 + $0x80] ss:$16 sps:$4 sm:$0xff]   ;;  %v4647_v34 = vld [vmem:[#allocation10 + $0x88] ss:$16 sps:$4 sm:$0xff]  }
 0x6e5   :  { %v3690_v3 = vpop.eup %3689 }
 0x6e6   :  { %v1492_v60 = vadd.f32 0.5, %v1489_v14  ;;  %v1496_v61 = vmul.f32 %v3688_v59, %v1491_v35  ;;  %v1490_v48 = vmul.f32 0.5, %v3690_v3  ;;  %v4653_v35 = vld [vmem:[#allocation10 + $0x64] ss:$16 sps:$4 sm:$0xff]   ;;  %v4655_v14 = vld [vmem:[#allocation10 + $0x6c] ss:$16 sps:$4 sm:$0xff]  }
 0x6e7   :  { %v4657_v59 = vld [vmem:[#allocation10 + $0x60] ss:$16 sps:$4 sm:$0xff]  }
 0x6e8   :  { %v1495_v62 = vmul.f32 %v1492_v60, %v4554_v11  ;;  %v1493_v4 = vadd.f32 0.5, %v1490_v48  ;;  %v3547_v11 = vld [vmem:[#allocation9 + $0x44] ss:$16 sps:$4 sm:$0xff]   ;;  %v4659_v60 = vld [vmem:[#allocation10 + $0x68] ss:$16 sps:$4 sm:$0xff]  }
 0x6e9   :  { %v4669_v3 = vld [vmem:[#allocation10 + $0x40] ss:$16 sps:$4 sm:$0xff]   ;;  %v4671_v48 = vld [vmem:[#allocation10 + $0x48] ss:$16 sps:$4 sm:$0xff]  }
 0x6ea   :  { %v4594_v44 = vadd.f32 %v1496_v61, %v1495_v62  ;;  %v4665_v61 = vld [vmem:[#allocation10 + $0x44] ss:$16 sps:$4 sm:$0xff]   ;;  %v4667_v62 = vld [vmem:[#allocation10 + $0x4c] ss:$16 sps:$4 sm:$0xff]  }
 0x6ec   :  { %3691 = vtanh.f32 %v4594_v44 }
 0x6f9   :  { %v3692_v5 = vpop.eup %3691 }
 0x6fa   :  { %v1499_v49 = vmul.f32 %v3692_v5, %v1493_v4  ;;  %v4677_v4 = vld [vmem:[#allocation10 + $0x24] ss:$16 sps:$4 sm:$0xff]   ;;  %v4679_v5 = vld [vmem:[#allocation10 + $0x2c] ss:$16 sps:$4 sm:$0xff]  }
 0x6fc   :  { %v1500_v51 = vpack.c.bf16 %v1499_v49, %v1499_v49  ;;  %v4681_v49 = vld [vmem:[#allocation10 + $0x20] ss:$16 sps:$4 sm:$0xff]  }
 0x6fe   :  { %1502 = vst [vmem:[#allocation3 + $0x18] sm:$0xf] %v1500_v51  ;;  %1543 = vmatmul.mubr.bf16.vlgmr.msra.gmra.mxu0 %v1500_v51  ;;  %1584 = vmatmul.mubr.bf16.vlgmr.msra.gmra.mxu1 %v1500_v51  ;;  %v4687_v51 = vld [vmem:[#allocation10 + $0xc] ss:$16 sps:$4 sm:$0xff]  }
 0x6ff   :  { %1864 = vmatpush1.bf16.msra.mxu0 %v3515_v6  ;;  %1937 = vmatpush1.bf16.msra.mxu1 %v3518_v50  ;;  %v4683_v6 = vld [vmem:[#allocation10 + $0x28] ss:$16 sps:$4 sm:$0xff]   ;;  %v4685_v50 = vld [vmem:[#allocation10 + $0x4] ss:$16 sps:$4 sm:$0xff]  }
 0x700   :  { %1865 = vmatprep.subr.bf16.mxu0 %v3523_v52  ;;  %1938 = vmatprep.subr.bf16.mxu1 %v3526_v53  ;;  %v4693_v52 = vld [vmem:[#allocation10] ss:$16 sps:$4 sm:$0xff]   ;;  %v4695_v53 = vld [vmem:[#allocation10 + $0x8] ss:$16 sps:$4 sm:$0xff]  }
 0x701   :  { %1895 = vmatprep.mubr.bf16.mxu0 %v5198_v22  ;;  %1968 = vmatprep.mubr.bf16.mxu1 %v5198_v22 }
 0x703   :  { %1866 = vmatpush1.bf16.msra.mxu0 %v3521_v55  ;;  %1939 = vmatpush1.bf16.msra.mxu1 %v3524_v56 }
 0x704   :  { %1867 = vmatprep.subr.bf16.mxu0 %v3529_v37  ;;  %1940 = vmatprep.subr.bf16.mxu1 %v3532_v38  ;;  %v5215_v37 = vld [vmem:[#allocation32_spill] sm:$0xff] }
 0x707   :  { %1868 = vmatpush1.bf16.msra.mxu0 %v3527_v57  ;;  %1941 = vmatpush1.bf16.msra.mxu1 %v3530_v58 }
 0x708   :  { %1869 = vmatprep.subr.bf16.mxu0 %v3535_v36  ;;  %1942 = vmatprep.subr.bf16.mxu1 %v3538_v30 }
 0x70b   :  { %1870 = vmatpush1.bf16.msra.mxu0 %v3533_v23  ;;  %1943 = vmatpush1.bf16.msra.mxu1 %v3536_v26 }
 0x70c   :  { %1871 = vmatprep.subr.bf16.mxu0 %v3541_v31  ;;  %1944 = vmatprep.subr.bf16.mxu1 %v3544_v9  ;;  %v5216_v9 = vld [vmem:[#allocation34_spill] sm:$0xff] }
 0x70f   :  { %1872 = vmatpush1.bf16.msra.mxu0 %v3539_v1  ;;  %1945 = vmatpush1.bf16.msra.mxu1 %v3542_v18 }
 0x710   :  { %1873 = vmatprep.subr.bf16.mxu0 %v3547_v11  ;;  %1946 = vmatprep.subr.bf16.mxu1 %v3550_v21  ;;  %v5217_v21 = vld [vmem:[#allocation33_spill] sm:$0xff] }
 0x713   :  { %1874 = vmatpush1.bf16.msra.mxu0 %v3545_v24  ;;  %1947 = vmatpush1.bf16.msra.mxu1 %v3548_v0 }
 0x714   :  { %1875 = vmatprep.subr.bf16.mxu0 %v3553_v46  ;;  %1948 = vmatprep.subr.bf16.mxu1 %v3556_v2 }
 0x717   :  { %1876 = vmatpush1.bf16.msra.mxu0 %v3551_v47  ;;  %1949 = vmatpush1.bf16.msra.mxu1 %v3554_v32 }
 0x718   :  { %1877 = vmatprep.subr.bf16.mxu0 %v3559_v15  ;;  %1950 = vmatprep.subr.bf16.mxu1 %v3562_v28 }
 0x71b   :  { %1878 = vmatpush1.bf16.msra.mxu0 %v3557_v8  ;;  %1951 = vmatpush1.bf16.msra.mxu1 %v3560_v54 }
 0x71c   :  { %2237 = vmatprep.subr.bf16.mxu0 %v4605_v45  ;;  %2278 = vmatprep.subr.bf16.mxu1 %v4607_v63 }
 0x71e   :  { %1896 = vmatmul.mubr.bf16.vlgmr.msra.gmra.mxu0 %v3563_v7  ;;  %1969 = vmatmul.mubr.bf16.vlgmr.msra.gmra.mxu1 %v3563_v7 }
 0x71f   :  { %1905 = vmatprep.mubr.bf16.mxu0 %v5198_v22  ;;  %1978 = vmatprep.mubr.bf16.mxu1 %v5198_v22 }
 0x720   :  { %2238 = vmatpush1.bf16.msra.mxu0 %v4609_v10  ;;  %2279 = vmatpush1.bf16.msra.mxu1 %v4611_v25 }
 0x721   :  { %2239 = vmatprep.subr.bf16.mxu0 %v4617_v33  ;;  %2280 = vmatprep.subr.bf16.mxu1 %v4619_v19 }
 0x724   :  { %2240 = vmatpush1.bf16.msra.mxu0 %v4621_v17  ;;  %2281 = vmatpush1.bf16.msra.mxu1 %v4623_v39 }
 0x725   :  { %2241 = vmatprep.subr.bf16.mxu0 %v4629_v40  ;;  %2282 = vmatprep.subr.bf16.mxu1 %v4631_v41 }
 0x726   :  { %1906 = vmatmul.mubr.bf16.gmra.mxu0 %v3564_v13  ;;  %1979 = vmatmul.mubr.bf16.gmra.mxu1 %v3564_v13 }
 0x727   :  { %1915 = vmatprep.mubr.bf16.mxu0 %v5198_v22  ;;  %1988 = vmatprep.mubr.bf16.mxu1 %v5198_v22 }
 0x728   :  { %2242 = vmatpush1.bf16.msra.mxu0 %v4633_v42  ;;  %2283 = vmatpush1.bf16.msra.mxu1 %v4635_v43 }
 0x729   :  { %2243 = vmatprep.subr.bf16.mxu0 %v4641_v12  ;;  %2284 = vmatprep.subr.bf16.mxu1 %v4643_v20 }
 0x72c   :  { %2244 = vmatpush1.bf16.msra.mxu0 %v4645_v27  ;;  %2285 = vmatpush1.bf16.msra.mxu1 %v4647_v34 }
 0x72d   :  { %2245 = vmatprep.subr.bf16.mxu0 %v4653_v35  ;;  %2286 = vmatprep.subr.bf16.mxu1 %v4655_v14 }
 0x72e   :  { %1916 = vmatmul.mubr.bf16.gmra.mxu0 %v3565_v29  ;;  %1989 = vmatmul.mubr.bf16.gmra.mxu1 %v3565_v29 }
 0x72f   :  { %1925 = vmatprep.mubr.bf16.mxu0 %v5198_v22  ;;  %1998 = vmatprep.mubr.bf16.mxu1 %v5198_v22 }
 0x730   :  { %2246 = vmatpush1.bf16.msra.mxu0 %v4657_v59  ;;  %2287 = vmatpush1.bf16.msra.mxu1 %v4659_v60 }
 0x731   :  { %2247 = vmatprep.subr.bf16.mxu0 %v4665_v61  ;;  %2288 = vmatprep.subr.bf16.mxu1 %v4667_v62 }
 0x734   :  { %2248 = vmatpush1.bf16.msra.mxu0 %v4669_v3  ;;  %2289 = vmatpush1.bf16.msra.mxu1 %v4671_v48 }
 0x735   :  { %2249 = vmatprep.subr.bf16.mxu0 %v4677_v4  ;;  %2290 = vmatprep.subr.bf16.mxu1 %v4679_v5 }
 0x738   :  { %2250 = vmatpush1.bf16.msra.mxu0 %v4681_v49  ;;  %2291 = vmatpush1.bf16.msra.mxu1 %v4683_v6 }
 0x739   :  { %2251 = vmatprep.subr.bf16.mxu0 %v4685_v50  ;;  %2292 = vmatprep.subr.bf16.mxu1 %v4687_v51 }
 0x73c   :  { %2252 = vmatpush1.bf16.msra.mxu0 %v4693_v52  ;;  %2293 = vmatpush1.bf16.msra.mxu1 %v4695_v53 }
 0x73d   :  { %2346 = vmatprep.subr.bf16.mxu0 %v4605_v45  ;;  %2387 = vmatprep.subr.bf16.mxu1 %v4607_v63 }
 0x7be   :  { %v1544_v55 = vpop.f32.mrf.mxu0  ;;  %v1585_v56 = vpop.f32.mrf.mxu1 }
 0x7bf   :  { %v1592_v38 = vadd.f32 %v1544_v55, %v5215_v37  ;;  %v1594_v24 = vadd.f32 %v1585_v56, %v5217_v21 }
 0x7c0   :  { %v1546_v57 = vpop.f32.mrf.mxu0  ;;  %v1587_v58 = vpop.f32.mrf.mxu1 }
 0x7c1   :  { %v1596_v36 = vmul.f32 0.5, %v1592_v38  ;;  %v1593_v30 = vadd.f32 %v1546_v57, %v4270_v16  ;;  %v1595_v1 = vadd.f32 %v1587_v58, %v5216_v9  ;;  %v1598_v0 = vmul.f32 0.5, %v1594_v24 }
 0x7c2   :  { %v1548_v23 = vpop.f32.mrf.mxu0  ;;  %v1589_v26 = vpop.f32.mrf.mxu1 }
 0x7c3   :  { %3693 = vtanh.f32 %v1596_v36  ;;  %v1597_v31 = vmul.f32 0.5, %v1593_v30 }
 0x7c4   :  { %v1549_v18 = vpop.f32.mrf.mxu0  ;;  %v1590_v11 = vpop.f32.mrf.mxu1 }
 0x7c5   :  { %3695 = vtanh.f32 %v1597_v31 }
 0x7c6   :  { %3697 = vtanh.f32 %v1595_v1 }
 0x7c7   :  { %3699 = vtanh.f32 %v1598_v0 }
 0x7d0   :  { %v3694_v46 = vpop.eup %3693 }
 0x7d1   :  { %v1602_v2 = vmul.f32 0.5, %v3694_v46 }
 0x7d2   :  { %v3696_v47 = vpop.eup %3695 }
 0x7d3   :  { %v1605_v32 = vadd.f32 0.5, %v1602_v2  ;;  %v1603_v15 = vmul.f32 0.5, %v3696_v47  ;;  %v3698_v16 = vpop.eup %3697 }
 0x7d4   :  { %v3700_v13 = vpop.eup %3699 }
 0x7d5   :  { %v1606_v28 = vadd.f32 0.5, %v1603_v15  ;;  %v1610_v8 = vmul.f32 %v3698_v16, %v1605_v32  ;;  %v1604_v29 = vmul.f32 0.5, %v3700_v13  ;;  %v1657_v13 = vld [vmem:[%s5166_s6] sm:$0xf] }
 0x7d7   :  { %v1609_v54 = vmul.f32 %v1606_v28, %v4594_v44  ;;  %v1607_v55 = vadd.f32 0.5, %v1604_v29 }
 0x7d9   :  { %v1611_v7 = vadd.f32 %v1610_v8, %v1609_v54 }
 0x7db   :  { %3701 = vtanh.f32 %v1611_v7 }
 0x7de   :  { %v1897_v44 = vpop.f32.mrf.mxu0  ;;  %v1970_v58 = vpop.f32.mrf.mxu1 }
 0x7e0   :  { %v1899_v36 = vpop.f32.mrf.mxu0  ;;  %v1972_v30 = vpop.f32.mrf.mxu1 }
 0x7e2   :  { %v4746_v23 = vpop.f32.mrf.mxu0  ;;  %v4748_v26 = vpop.f32.mrf.mxu1 }
 0x7e4   :  { %v4750_v31 = vpop.f32.mrf.mxu0  ;;  %v4752_v9 = vpop.f32.mrf.mxu1 }
 0x7e6   :  { %v4754_v1 = vpop.f32.mrf.mxu0  ;;  %v4756_v18 = vpop.f32.mrf.mxu1 }
 0x7e7   :  { %5218 = vst [vmem:[#allocation16_spill] sm:$0xff] %v4756_v18 }
 0x7e8   :  { %v3702_v37 = vpop.eup %3701  ;;  %v4758_v11 = vpop.f32.mrf.mxu0 }
 0x7e9   :  { %v1613_v38 = vmul.f32 %v3702_v37, %v1607_v55  ;;  %v4760_v21 = vpop.f32.mrf.mxu1 }
 0x7ea   :  { %5219 = vst [vmem:[#allocation18_spill] sm:$0xff] %v4760_v21  ;;  %v4762_v24 = vpop.f32.mrf.mxu0 }
 0x7eb   :  { %v1614_v56 = vpack.c.bf16 %v1613_v38, %v1613_v38  ;;  %5220 = vst [vmem:[#allocation19_spill] sm:$0xff] %v4762_v24  ;;  %v4764_v0 = vpop.f32.mrf.mxu1 }
 0x7ec   :  { %5221 = vst [vmem:[#allocation17_spill] sm:$0xff] %v4764_v0  ;;  %v4766_v46 = vpop.f32.mrf.mxu0 }
 0x7ed   :  { %1616 = vst [vmem:[#allocation3 + $0x1c] sm:$0xf] %v1614_v56  ;;  %5222 = vst [vmem:[#allocation20_spill] sm:$0xff] %v4766_v46  ;;  %v4768_v2 = vpop.f32.mrf.mxu1  ;;  %v5236_v56 = vld [vmem:[#allocation15_spill] sm:$0xff] }
 0x7ee   :  { %5223 = vst [vmem:[#allocation22_spill] sm:$0xff] %v4768_v2  ;;  %v4770_v47 = vpop.f32.mrf.mxu0  ;;  %v5244_v21 = vsub.s32 2, %v5236_v56 }
 0x7ef   :  { %5224 = vst [vmem:[#allocation23_spill] sm:$0xff] %v4770_v47  ;;  %v4772_v32 = vpop.f32.mrf.mxu1 }
 0x7f0   :  { %5225 = vst [vmem:[#allocation21_spill] sm:$0xff] %v4772_v32  ;;  %v4774_v15 = vpop.f32.mrf.mxu0 }
 0x7f1   :  { %5226 = vst [vmem:[#allocation24_spill] sm:$0xff] %v4774_v15  ;;  %v4776_v16 = vpop.f32.mrf.mxu1 }
 0x7f2   :  { %5227 = vst [vmem:[#allocation26_spill] sm:$0xff] %v4776_v16  ;;  %v4778_v28 = vpop.f32.mrf.mxu0 }
 0x7f3   :  { %5228 = vst [vmem:[#allocation27_spill] sm:$0xff] %v4778_v28  ;;  %v4780_v8 = vpop.f32.mrf.mxu1 }
 0x7f4   :  { %v3602_v57 = vld [vmem:[#allocation3 + $0x18] sm:$0xff]   ;;  %5229 = vst [vmem:[#allocation25_spill] sm:$0xff] %v4780_v8  ;;  %v4782_v54 = vpop.f32.mrf.mxu0 }
 0x7f5   :  { %1926 = vmatmul.mubr.bf16.gmra.mxu0 %v3602_v57  ;;  %1999 = vmatmul.mubr.bf16.gmra.mxu1 %v3602_v57  ;;  %5230 = vst [vmem:[#allocation28_spill] sm:$0xff] %v4782_v54  ;;  %v4784_v7 = vpop.f32.mrf.mxu1  ;;  %v5237_v57 = vsub.s32 0, %v5236_v56 }
 0x7f6   :  { %2269 = vmatprep.mubr.bf16.mxu0 %v5198_v22  ;;  %2310 = vmatprep.mubr.bf16.mxu1 %v5198_v22  ;;  %5231 = vst [vmem:[#allocation30_spill] sm:$0xff] %v4784_v7  ;;  %v5240_v7 = vsub.s32 1, %v5236_v56 }
 0x7f7   :  { %v4799_v28 = vrot.slane %v1657_v13, %v5237_v57  ;;  %v5243_v57 = vsub.s32 3, %v5236_v56 }
 0x7f8   :  { %v4807_v32 = vrot.slane %v1657_v13, %v5240_v7 }
 0x7f9   :  { %v4817_v47 = vrot.slane %v1657_v13, %v5243_v57 }
 0x7fa   :  { %v1900_v15 = vadd.f32 %v1899_v36, %v4807_v32  ;;  %v4822_v36 = vrot.slane %v1657_v13, %v5244_v21 }
 0x7fd   :  { %2270 = vmatmul.mubr.bf16.vlgmr.msra.gmra.mxu0 %v5198_v22  ;;  %2311 = vmatmul.mubr.bf16.vlgmr.msra.gmra.mxu1 %v5198_v22 }
 0x7fe   :  { %2347 = vmatpush1.bf16.msra.mxu0 %v4609_v10  ;;  %2388 = vmatpush1.bf16.msra.mxu1 %v4611_v25 }
 0x7ff   :  { %2348 = vmatprep.subr.bf16.mxu0 %v4617_v33  ;;  %2389 = vmatprep.subr.bf16.mxu1 %v4619_v19 }
 0x800   :  { %2378 = vmatprep.mubr.bf16.mxu0 %v5198_v22  ;;  %2419 = vmatprep.mubr.bf16.mxu1 %v5198_v22 }
 0x802   :  { %2349 = vmatpush1.bf16.msra.mxu0 %v4621_v17  ;;  %2390 = vmatpush1.bf16.msra.mxu1 %v4623_v39 }
 0x803   :  { %2350 = vmatprep.subr.bf16.mxu0 %v4629_v40  ;;  %2391 = vmatprep.subr.bf16.mxu1 %v4631_v41 }
 0x806   :  { %2351 = vmatpush1.bf16.msra.mxu0 %v4633_v42  ;;  %2392 = vmatpush1.bf16.msra.mxu1 %v4635_v43 }
 0x807   :  { %2352 = vmatprep.subr.bf16.mxu0 %v4641_v12  ;;  %2393 = vmatprep.subr.bf16.mxu1 %v4643_v20 }
 0x80a   :  { %2353 = vmatpush1.bf16.msra.mxu0 %v4645_v27  ;;  %2394 = vmatpush1.bf16.msra.mxu1 %v4647_v34 }
 0x80b   :  { %2354 = vmatprep.subr.bf16.mxu0 %v4653_v35  ;;  %2395 = vmatprep.subr.bf16.mxu1 %v4655_v14 }
 0x80e   :  { %2355 = vmatpush1.bf16.msra.mxu0 %v4657_v59  ;;  %2396 = vmatpush1.bf16.msra.mxu1 %v4659_v60 }
 0x80f   :  { %2356 = vmatprep.subr.bf16.mxu0 %v4665_v61  ;;  %2397 = vmatprep.subr.bf16.mxu1 %v4667_v62 }
 0x812   :  { %2357 = vmatpush1.bf16.msra.mxu0 %v4669_v3  ;;  %2398 = vmatpush1.bf16.msra.mxu1 %v4671_v48 }
 0x813   :  { %2358 = vmatprep.subr.bf16.mxu0 %v4677_v4  ;;  %2399 = vmatprep.subr.bf16.mxu1 %v4679_v5 }
 0x816   :  { %2359 = vmatpush1.bf16.msra.mxu0 %v4681_v49  ;;  %2400 = vmatpush1.bf16.msra.mxu1 %v4683_v6 }
 0x817   :  { %2360 = vmatprep.subr.bf16.mxu0 %v4685_v50  ;;  %2401 = vmatprep.subr.bf16.mxu1 %v4687_v51 }
 0x81a   :  { %2361 = vmatpush1.bf16.msra.mxu0 %v4693_v52  ;;  %2402 = vmatpush1.bf16.msra.mxu1 %v4695_v53 }
 0x81b   :  { %2455 = vmatprep.subr.bf16.mxu0 %v4605_v45  ;;  %2496 = vmatprep.subr.bf16.mxu1 %v4607_v63 }
 0x8b5   :  { %v4789_v29 = vpop.f32.mrf.mxu0  ;;  %v4791_v55 = vpop.f32.mrf.mxu1 }
 0x8b6   :  { %5232 = vst [vmem:[#allocation31_spill] sm:$0xff] %v4789_v29  ;;  %5233 = vst [vmem:[#allocation29_spill] sm:$0xff] %v4791_v55  ;;  %v1898_v55 = vadd.f32 %v1897_v44, %v4799_v28 }
 0x8b7   :  { %v4793_v37 = vpop.f32.mrf.mxu0  ;;  %v4795_v38 = vpop.f32.mrf.mxu1 }
 0x8b8   :  { %5234 = vst [vmem:[#allocation32_spill] sm:$0xff] %v4793_v37  ;;  %5235 = vst [vmem:[#allocation34_spill] sm:$0xff] %v4795_v38 }
 0x8b9   :  { %v4801_v8 = vpop.f32.mrf.mxu0  ;;  %v4803_v54 = vpop.f32.mrf.mxu1 }
 0x8ba   :  { %5238 = vst [vmem:[#allocation33_spill] sm:$0xff] %v4801_v8  ;;  %5239 = vst [vmem:[#allocation15_spill] sm:$0xff] %v4803_v54 }
 0x8bb   :  { %v4809_v16 = vpop.f32.mrf.mxu0  ;;  %v4811_v29 = vpop.f32.mrf.mxu1 }
 0x8bc   :  { %5241 = vst [vmem:[#allocation35_spill] sm:$0xff] %v4809_v16  ;;  %5242 = vst [vmem:[#allocation36_spill] sm:$0xff] %v4811_v29  ;;  %v1973_v16 = vadd.f32 %v1972_v30, %v4817_v47 }
 0x8bd   :  { %v2271_v37 = vpop.f32.mrf.mxu0  ;;  %v2312_v38 = vpop.f32.mrf.mxu1 }
 0x8be   :  { %v2319_v8 = vadd.f32 %v2271_v37, %v1898_v55  ;;  %v1971_v55 = vadd.f32 %v1970_v58, %v4822_v36 }
 0x8bf   :  { %v2273_v54 = vpop.f32.mrf.mxu0  ;;  %v2314_v0 = vpop.f32.mrf.mxu1 }
 0x8c0   :  { %v2323_v2 = vmul.f32 0.5, %v2319_v8  ;;  %v2320_v7 = vadd.f32 %v2273_v54, %v1900_v15  ;;  %v2322_v57 = vadd.f32 %v2314_v0, %v1973_v16  ;;  %v2321_v37 = vadd.f32 %v2312_v38, %v1971_v55 }
 0x8c1   :  { %v2275_v46 = vpop.f32.mrf.mxu0  ;;  %v2316_v24 = vpop.f32.mrf.mxu1  ;;  %v1902_v38 = vadd.f32 %v4746_v23, %v4799_v28 }
 0x8c2   :  { %3703 = vtanh.f32 %v2323_v2  ;;  %v2324_v29 = vmul.f32 0.5, %v2320_v7  ;;  %v2325_v8 = vmul.f32 0.5, %v2321_v37  ;;  %v1904_v37 = vadd.f32 %v4750_v31, %v4807_v32 }
 0x8c3   :  { %v2276_v44 = vpop.f32.mrf.mxu0  ;;  %v2317_v18 = vpop.f32.mrf.mxu1  ;;  %v1975_v31 = vadd.f32 %v4748_v26, %v4822_v36 }
 0x8c4   :  { %3705 = vtanh.f32 %v2324_v29 }
 0x8c5   :  { %3707 = vtanh.f32 %v2322_v57 }
 0x8c6   :  { %3709 = vtanh.f32 %v2325_v8 }
 0x8cf   :  { %v3704_v15 = vpop.eup %3703 }
 0x8d0   :  { %v2329_v46 = vmul.f32 0.5, %v3704_v15 }
 0x8d1   :  { %v3706_v24 = vpop.eup %3705 }
 0x8d2   :  { %v2332_v54 = vadd.f32 0.5, %v2329_v46  ;;  %v2330_v30 = vmul.f32 0.5, %v3706_v24  ;;  %v3708_v7 = vpop.eup %3707  ;;  %v1977_v24 = vadd.f32 %v4752_v9, %v4817_v47 }
 0x8d3   :  { %v3710_v21 = vpop.eup %3709 }
 0x8d4   :  { %v2333_v2 = vadd.f32 0.5, %v2330_v30  ;;  %v2337_v44 = vmul.f32 %v3708_v7, %v2332_v54  ;;  %v2331_v0 = vmul.f32 0.5, %v3710_v21 }
 0x8d6   :  { %v2336_v18 = vmul.f32 0.0, %v2333_v2  ;;  %v2334_v58 = vadd.f32 0.5, %v2331_v0 }
 0x8d8   :  { %v4825_v56 = vadd.f32 %v2337_v44, %v2336_v18 }
 0x8da   :  { %3711 = vtanh.f32 %v4825_v56 }
 0x8e7   :  { %v3712_v16 = vpop.eup %3711 }
 0x8e8   :  { %v2340_v13 = vmul.f32 %v3712_v16, %v2334_v58 }
 0x8ea   :  { %v2345_v29 = vpack.c.bf16 %v2340_v13, %v2340_v13 }
 0x8ec   :  { %2379 = vmatmul.mubr.bf16.vlgmr.msra.gmra.mxu0 %v2345_v29  ;;  %2420 = vmatmul.mubr.bf16.vlgmr.msra.gmra.mxu1 %v2345_v29 }
 0x8ed   :  { %2456 = vmatpush1.bf16.msra.mxu0 %v4609_v10  ;;  %2497 = vmatpush1.bf16.msra.mxu1 %v4611_v25 }
 0x8ee   :  { %2457 = vmatprep.subr.bf16.mxu0 %v4617_v33  ;;  %2498 = vmatprep.subr.bf16.mxu1 %v4619_v19 }
 0x8ef   :  { %2487 = vmatprep.mubr.bf16.mxu0 %v5198_v22  ;;  %2528 = vmatprep.mubr.bf16.mxu1 %v5198_v22 }
 0x8f1   :  { %2458 = vmatpush1.bf16.msra.mxu0 %v4621_v17  ;;  %2499 = vmatpush1.bf16.msra.mxu1 %v4623_v39 }
 0x8f2   :  { %2459 = vmatprep.subr.bf16.mxu0 %v4629_v40  ;;  %2500 = vmatprep.subr.bf16.mxu1 %v4631_v41 }
 0x8f5   :  { %2460 = vmatpush1.bf16.msra.mxu0 %v4633_v42  ;;  %2501 = vmatpush1.bf16.msra.mxu1 %v4635_v43 }
 0x8f6   :  { %2461 = vmatprep.subr.bf16.mxu0 %v4641_v12  ;;  %2502 = vmatprep.subr.bf16.mxu1 %v4643_v20 }
 0x8f9   :  { %2462 = vmatpush1.bf16.msra.mxu0 %v4645_v27  ;;  %2503 = vmatpush1.bf16.msra.mxu1 %v4647_v34 }
 0x8fa   :  { %2463 = vmatprep.subr.bf16.mxu0 %v4653_v35  ;;  %2504 = vmatprep.subr.bf16.mxu1 %v4655_v14 }
 0x8fd   :  { %2464 = vmatpush1.bf16.msra.mxu0 %v4657_v59  ;;  %2505 = vmatpush1.bf16.msra.mxu1 %v4659_v60 }
 0x8fe   :  { %2465 = vmatprep.subr.bf16.mxu0 %v4665_v61  ;;  %2506 = vmatprep.subr.bf16.mxu1 %v4667_v62 }
 0x901   :  { %2466 = vmatpush1.bf16.msra.mxu0 %v4669_v3  ;;  %2507 = vmatpush1.bf16.msra.mxu1 %v4671_v48 }
 0x902   :  { %2467 = vmatprep.subr.bf16.mxu0 %v4677_v4  ;;  %2508 = vmatprep.subr.bf16.mxu1 %v4679_v5 }
 0x905   :  { %2468 = vmatpush1.bf16.msra.mxu0 %v4681_v49  ;;  %2509 = vmatpush1.bf16.msra.mxu1 %v4683_v6 }
 0x906   :  { %2469 = vmatprep.subr.bf16.mxu0 %v4685_v50  ;;  %2510 = vmatprep.subr.bf16.mxu1 %v4687_v51 }
 0x909   :  { %2470 = vmatpush1.bf16.msra.mxu0 %v4693_v52  ;;  %2511 = vmatpush1.bf16.msra.mxu1 %v4695_v53 }
 0x90a   :  { %2564 = vmatprep.subr.bf16.mxu0 %v4605_v45  ;;  %2605 = vmatprep.subr.bf16.mxu1 %v4607_v63 }
 0x9ac   :  { %v2380_v57 = vpop.f32.mrf.mxu0  ;;  %v2421_v55 = vpop.f32.mrf.mxu1 }
 0x9ad   :  { %v2428_v8 = vadd.f32 %v2380_v57, %v1902_v38  ;;  %v2430_v0 = vadd.f32 %v2421_v55, %v1975_v31 }
 0x9ae   :  { %v2382_v15 = vpop.f32.mrf.mxu0  ;;  %v2423_v46 = vpop.f32.mrf.mxu1 }
 0x9af   :  { %v2432_v54 = vmul.f32 0.5, %v2428_v8  ;;  %v2429_v30 = vadd.f32 %v2382_v15, %v1904_v37  ;;  %v2431_v44 = vadd.f32 %v2423_v46, %v1977_v24  ;;  %v2434_v58 = vmul.f32 0.5, %v2430_v0  ;;  %v5245_v0 = vld [vmem:[#allocation18_spill] sm:$0xff] }
 0x9b0   :  { %v2384_v2 = vpop.f32.mrf.mxu0  ;;  %v2425_v7 = vpop.f32.mrf.mxu1 }
 0x9b1   :  { %3713 = vtanh.f32 %v2432_v54  ;;  %v2433_v18 = vmul.f32 0.5, %v2429_v30 }
 0x9b2   :  { %v2385_v21 = vpop.f32.mrf.mxu0  ;;  %v2426_v23 = vpop.f32.mrf.mxu1 }
 0x9b3   :  { %3715 = vtanh.f32 %v2433_v18 }
 0x9b4   :  { %3717 = vtanh.f32 %v2431_v44  ;;  %v1910_v44 = vadd.f32 %v4758_v11, %v4807_v32 }
 0x9b5   :  { %3719 = vtanh.f32 %v2434_v58  ;;  %v1983_v58 = vadd.f32 %v5245_v0, %v4817_v47 }
 0x9be   :  { %v3714_v16 = vpop.eup %3713 }
 0x9bf   :  { %v2438_v13 = vmul.f32 0.5, %v3714_v16 }
 0x9c0   :  { %v3716_v29 = vpop.eup %3715 }
 0x9c1   :  { %v2441_v9 = vadd.f32 0.5, %v2438_v13  ;;  %v2439_v38 = vmul.f32 0.5, %v3716_v29  ;;  %v3718_v57 = vpop.eup %3717 }
 0x9c2   :  { %v3720_v24 = vpop.eup %3719 }
 0x9c3   :  { %v2442_v37 = vadd.f32 0.5, %v2439_v38  ;;  %v2446_v8 = vmul.f32 %v3718_v57, %v2441_v9  ;;  %v2440_v54 = vmul.f32 0.5, %v3720_v24 }
 0x9c5   :  { %v2445_v15 = vmul.f32 %v2442_v37, %v4825_v56  ;;  %v2443_v26 = vadd.f32 0.5, %v2440_v54  ;;  %v1908_v56 = vadd.f32 %v4754_v1, %v4799_v28 }
 0x9c7   :  { %v4871_v46 = vadd.f32 %v2446_v8, %v2445_v15  ;;  %v5246_v8 = vld [vmem:[#allocation16_spill] sm:$0xff] }
 0x9c8   :  { %v1981_v11 = vadd.f32 %v5246_v8, %v4822_v36 }
 0x9c9   :  { %3721 = vtanh.f32 %v4871_v46 }
 0x9d6   :  { %v3722_v55 = vpop.eup %3721 }
 0x9d7   :  { %v2449_v30 = vmul.f32 %v3722_v55, %v2443_v26 }
 0x9d9   :  { %v2454_v2 = vpack.c.bf16 %v2449_v30, %v2449_v30 }
 0x9db   :  { %2488 = vmatmul.mubr.bf16.vlgmr.msra.gmra.mxu0 %v2454_v2  ;;  %2529 = vmatmul.mubr.bf16.vlgmr.msra.gmra.mxu1 %v2454_v2 }
 0x9dc   :  { %2565 = vmatpush1.bf16.msra.mxu0 %v4609_v10  ;;  %2606 = vmatpush1.bf16.msra.mxu1 %v4611_v25 }
 0x9dd   :  { %2566 = vmatprep.subr.bf16.mxu0 %v4617_v33  ;;  %2607 = vmatprep.subr.bf16.mxu1 %v4619_v19 }
 0x9de   :  { %2596 = vmatprep.mubr.bf16.mxu0 %v5198_v22  ;;  %2637 = vmatprep.mubr.bf16.mxu1 %v5198_v22 }
 0x9e0   :  { %2567 = vmatpush1.bf16.msra.mxu0 %v4621_v17  ;;  %2608 = vmatpush1.bf16.msra.mxu1 %v4623_v39 }
 0x9e1   :  { %2568 = vmatprep.subr.bf16.mxu0 %v4629_v40  ;;  %2609 = vmatprep.subr.bf16.mxu1 %v4631_v41 }
 0x9e4   :  { %2569 = vmatpush1.bf16.msra.mxu0 %v4633_v42  ;;  %2610 = vmatpush1.bf16.msra.mxu1 %v4635_v43 }
 0x9e5   :  { %2570 = vmatprep.subr.bf16.mxu0 %v4641_v12  ;;  %2611 = vmatprep.subr.bf16.mxu1 %v4643_v20 }
 0x9e8   :  { %2571 = vmatpush1.bf16.msra.mxu0 %v4645_v27  ;;  %2612 = vmatpush1.bf16.msra.mxu1 %v4647_v34 }
 0x9e9   :  { %2572 = vmatprep.subr.bf16.mxu0 %v4653_v35  ;;  %2613 = vmatprep.subr.bf16.mxu1 %v4655_v14 }
 0x9ec   :  { %2573 = vmatpush1.bf16.msra.mxu0 %v4657_v59  ;;  %2614 = vmatpush1.bf16.msra.mxu1 %v4659_v60 }
 0x9ed   :  { %2574 = vmatprep.subr.bf16.mxu0 %v4665_v61  ;;  %2615 = vmatprep.subr.bf16.mxu1 %v4667_v62 }
 0x9f0   :  { %2575 = vmatpush1.bf16.msra.mxu0 %v4669_v3  ;;  %2616 = vmatpush1.bf16.msra.mxu1 %v4671_v48 }
 0x9f1   :  { %2576 = vmatprep.subr.bf16.mxu0 %v4677_v4  ;;  %2617 = vmatprep.subr.bf16.mxu1 %v4679_v5 }
 0x9f4   :  { %2577 = vmatpush1.bf16.msra.mxu0 %v4681_v49  ;;  %2618 = vmatpush1.bf16.msra.mxu1 %v4683_v6 }
 0x9f5   :  { %2578 = vmatprep.subr.bf16.mxu0 %v4685_v50  ;;  %2619 = vmatprep.subr.bf16.mxu1 %v4687_v51 }
 0x9f8   :  { %2579 = vmatpush1.bf16.msra.mxu0 %v4693_v52  ;;  %2620 = vmatpush1.bf16.msra.mxu1 %v4695_v53 }
 0x9f9   :  { %2673 = vmatprep.subr.bf16.mxu0 %v4605_v45  ;;  %2714 = vmatprep.subr.bf16.mxu1 %v4607_v63 }
 0xa9b   :  { %v2489_v7 = vpop.f32.mrf.mxu0  ;;  %v2530_v18 = vpop.f32.mrf.mxu1 }
 0xa9c   :  { %v2537_v21 = vadd.f32 %v2489_v7, %v1908_v56  ;;  %v2539_v15 = vadd.f32 %v2530_v18, %v1981_v11 }
 0xa9d   :  { %v2491_v23 = vpop.f32.mrf.mxu0  ;;  %v2532_v31 = vpop.f32.mrf.mxu1 }
 0xa9e   :  { %v2541_v16 = vmul.f32 0.5, %v2537_v21  ;;  %v2538_v13 = vadd.f32 %v2491_v23, %v1910_v44  ;;  %v2540_v57 = vadd.f32 %v2532_v31, %v1983_v58  ;;  %v2543_v24 = vmul.f32 0.5, %v2539_v15  ;;  %v5249_v15 = vld [vmem:[#allocation22_spill] sm:$0xff] }
 0xa9f   :  { %v2493_v29 = vpop.f32.mrf.mxu0  ;;  %v2534_v9 = vpop.f32.mrf.mxu1 }
 0xaa0   :  { %3723 = vtanh.f32 %v2541_v16  ;;  %v2542_v38 = vmul.f32 0.5, %v2538_v13 }
 0xaa1   :  { %v2494_v37 = vpop.f32.mrf.mxu0  ;;  %v2535_v1 = vpop.f32.mrf.mxu1 }
 0xaa2   :  { %3725 = vtanh.f32 %v2542_v38 }
 0xaa3   :  { %3727 = vtanh.f32 %v2540_v57  ;;  %v5248_v57 = vld [vmem:[#allocation20_spill] sm:$0xff] }
 0xaa4   :  { %3729 = vtanh.f32 %v2543_v24  ;;  %v1914_v37 = vadd.f32 %v5248_v57, %v4807_v32  ;;  %v1987_v24 = vadd.f32 %v5249_v15, %v4817_v47 }
 0xaad   :  { %v3724_v54 = vpop.eup %3723 }
 0xaae   :  { %v2547_v26 = vmul.f32 0.5, %v3724_v54 }
 0xaaf   :  { %v3726_v55 = vpop.eup %3725 }
 0xab0   :  { %v2550_v30 = vadd.f32 0.5, %v2547_v26  ;;  %v2548_v2 = vmul.f32 0.5, %v3726_v55  ;;  %v3728_v56 = vpop.eup %3727 }
 0xab1   :  { %v3730_v31 = vpop.eup %3729 }
 0xab2   :  { %v2551_v7 = vadd.f32 0.5, %v2548_v2  ;;  %v2555_v44 = vmul.f32 %v3728_v56, %v2550_v30  ;;  %v2549_v0 = vmul.f32 0.5, %v3730_v31 }
 0xab4   :  { %v2554_v21 = vmul.f32 %v2551_v7, %v4871_v46  ;;  %v2552_v58 = vadd.f32 0.5, %v2549_v0  ;;  %v5247_v46 = vld [vmem:[#allocation19_spill] sm:$0xff] }
 0xab5   :  { %v1912_v29 = vadd.f32 %v5247_v46, %v4799_v28 }
 0xab6   :  { %v4917_v23 = vadd.f32 %v2555_v44, %v2554_v21  ;;  %v5250_v21 = vld [vmem:[#allocation17_spill] sm:$0xff] }
 0xab7   :  { %v1985_v31 = vadd.f32 %v5250_v21, %v4822_v36 }
 0xab8   :  { %3731 = vtanh.f32 %v4917_v23 }
 0xac5   :  { %v3732_v18 = vpop.eup %3731 }
 0xac6   :  { %v2558_v16 = vmul.f32 %v3732_v18, %v2552_v58 }
 0xac8   :  { %v2563_v13 = vpack.c.bf16 %v2558_v16, %v2558_v16 }
 0xaca   :  { %2597 = vmatmul.mubr.bf16.vlgmr.msra.gmra.mxu0 %v2563_v13  ;;  %2638 = vmatmul.mubr.bf16.vlgmr.msra.gmra.mxu1 %v2563_v13 }
 0xacb   :  { %2674 = vmatpush1.bf16.msra.mxu0 %v4609_v10  ;;  %2715 = vmatpush1.bf16.msra.mxu1 %v4611_v25 }
 0xacc   :  { %2675 = vmatprep.subr.bf16.mxu0 %v4617_v33  ;;  %2716 = vmatprep.subr.bf16.mxu1 %v4619_v19 }
 0xacd   :  { %2705 = vmatprep.mubr.bf16.mxu0 %v5198_v22  ;;  %2746 = vmatprep.mubr.bf16.mxu1 %v5198_v22 }
 0xacf   :  { %2676 = vmatpush1.bf16.msra.mxu0 %v4621_v17  ;;  %2717 = vmatpush1.bf16.msra.mxu1 %v4623_v39 }
 0xad0   :  { %2677 = vmatprep.subr.bf16.mxu0 %v4629_v40  ;;  %2718 = vmatprep.subr.bf16.mxu1 %v4631_v41 }
 0xad3   :  { %2678 = vmatpush1.bf16.msra.mxu0 %v4633_v42  ;;  %2719 = vmatpush1.bf16.msra.mxu1 %v4635_v43 }
 0xad4   :  { %2679 = vmatprep.subr.bf16.mxu0 %v4641_v12  ;;  %2720 = vmatprep.subr.bf16.mxu1 %v4643_v20 }
 0xad7   :  { %2680 = vmatpush1.bf16.msra.mxu0 %v4645_v27  ;;  %2721 = vmatpush1.bf16.msra.mxu1 %v4647_v34 }
 0xad8   :  { %2681 = vmatprep.subr.bf16.mxu0 %v4653_v35  ;;  %2722 = vmatprep.subr.bf16.mxu1 %v4655_v14 }
 0xadb   :  { %2682 = vmatpush1.bf16.msra.mxu0 %v4657_v59  ;;  %2723 = vmatpush1.bf16.msra.mxu1 %v4659_v60 }
 0xadc   :  { %2683 = vmatprep.subr.bf16.mxu0 %v4665_v61  ;;  %2724 = vmatprep.subr.bf16.mxu1 %v4667_v62 }
 0xadf   :  { %2684 = vmatpush1.bf16.msra.mxu0 %v4669_v3  ;;  %2725 = vmatpush1.bf16.msra.mxu1 %v4671_v48 }
 0xae0   :  { %2685 = vmatprep.subr.bf16.mxu0 %v4677_v4  ;;  %2726 = vmatprep.subr.bf16.mxu1 %v4679_v5 }
 0xae3   :  { %2686 = vmatpush1.bf16.msra.mxu0 %v4681_v49  ;;  %2727 = vmatpush1.bf16.msra.mxu1 %v4683_v6 }
 0xae4   :  { %2687 = vmatprep.subr.bf16.mxu0 %v4685_v50  ;;  %2728 = vmatprep.subr.bf16.mxu1 %v4687_v51 }
 0xae7   :  { %2688 = vmatpush1.bf16.msra.mxu0 %v4693_v52  ;;  %2729 = vmatpush1.bf16.msra.mxu1 %v4695_v53 }
 0xae8   :  { %2782 = vmatprep.subr.bf16.mxu0 %v4605_v45  ;;  %2823 = vmatprep.subr.bf16.mxu1 %v4607_v63 }
 0xb8a   :  { %v2598_v9 = vpop.f32.mrf.mxu0  ;;  %v2639_v38 = vpop.f32.mrf.mxu1 }
 0xb8b   :  { %v2646_v1 = vadd.f32 %v2598_v9, %v1912_v29  ;;  %v2648_v0 = vadd.f32 %v2639_v38, %v1985_v31 }
 0xb8c   :  { %v2600_v8 = vpop.f32.mrf.mxu0  ;;  %v2641_v11 = vpop.f32.mrf.mxu1 }
 0xb8d   :  { %v2650_v54 = vmul.f32 0.5, %v2646_v1  ;;  %v2647_v26 = vadd.f32 %v2600_v8, %v1914_v37  ;;  %v2649_v56 = vadd.f32 %v2641_v11, %v1987_v24  ;;  %v2652_v58 = vmul.f32 0.5, %v2648_v0 }
 0xb8e   :  { %v2602_v55 = vpop.f32.mrf.mxu0  ;;  %v2643_v30 = vpop.f32.mrf.mxu1 }
 0xb8f   :  { %3733 = vtanh.f32 %v2650_v54  ;;  %v2651_v2 = vmul.f32 0.5, %v2647_v26 }
 0xb90   :  { %v2603_v7 = vpop.f32.mrf.mxu0  ;;  %v2644_v44 = vpop.f32.mrf.mxu1 }
 0xb91   :  { %3735 = vtanh.f32 %v2651_v2 }
 0xb92   :  { %3737 = vtanh.f32 %v2649_v56 }
 0xb93   :  { %3739 = vtanh.f32 %v2652_v58 }
 0xb9c   :  { %v3734_v18 = vpop.eup %3733 }
 0xb9d   :  { %v2656_v16 = vmul.f32 0.5, %v3734_v18 }
 0xb9e   :  { %v3736_v13 = vpop.eup %3735 }
 0xb9f   :  { %v2659_v46 = vadd.f32 0.5, %v2656_v16  ;;  %v2657_v29 = vmul.f32 0.5, %v3736_v13  ;;  %v3738_v9 = vpop.eup %3737 }
 0xba0   :  { %v3740_v11 = vpop.eup %3739 }
 0xba1   :  { %v2660_v57 = vadd.f32 0.5, %v2657_v29  ;;  %v2664_v37 = vmul.f32 %v3738_v9, %v2659_v46  ;;  %v2658_v15 = vmul.f32 0.5, %v3740_v11  ;;  %v5015_v11 = vld [vmem:[#allocation10 + $0xe8] ss:$16 sps:$4 sm:$0xff]  }
 0xba3   :  { %v2663_v1 = vmul.f32 %v2660_v57, %v4917_v23  ;;  %v2661_v24 = vadd.f32 0.5, %v2658_v15  ;;  %v5021_v15 = vld [vmem:[#allocation10 + $0xcc] ss:$16 sps:$4 sm:$0xff]  }
 0xba5   :  { %v4963_v8 = vadd.f32 %v2664_v37, %v2663_v1  ;;  %v5012_v1 = vld [vmem:[#allocation10 + $0xe0] ss:$16 sps:$4 sm:$0xff]  }
 0xba7   :  { %3741 = vtanh.f32 %v4963_v8 }
 0xbb4   :  { %v3742_v38 = vpop.eup %3741 }
 0xbb5   :  { %v2667_v54 = vmul.f32 %v3742_v38, %v2661_v24  ;;  %v5026_v24 = vld [vmem:[#allocation10 + $0xc0] ss:$16 sps:$4 sm:$0xff]   ;;  %v5029_v38 = vld [vmem:[#allocation10 + $0xc8] ss:$16 sps:$4 sm:$0xff]  }
 0xbb7   :  { %v2672_v26 = vpack.c.bf16 %v2667_v54, %v2667_v54  ;;  %v5032_v54 = vld [vmem:[#allocation10 + $0xa4] ss:$16 sps:$4 sm:$0xff]  }
 0xbb9   :  { %2706 = vmatmul.mubr.bf16.vlgmr.msra.gmra.mxu0 %v2672_v26  ;;  %2747 = vmatmul.mubr.bf16.vlgmr.msra.gmra.mxu1 %v2672_v26  ;;  %v5035_v26 = vld [vmem:[#allocation10 + $0xac] ss:$16 sps:$4 sm:$0xff]  }
 0xbba   :  { %2783 = vmatpush1.bf16.msra.mxu0 %v4609_v10  ;;  %2824 = vmatpush1.bf16.msra.mxu1 %v4611_v25  ;;  %v5251_v10 = vld [vmem:[#allocation23_spill] sm:$0xff] }
 0xbbb   :  { %2784 = vmatprep.subr.bf16.mxu0 %v4617_v33  ;;  %2825 = vmatprep.subr.bf16.mxu1 %v4619_v19  ;;  %v1918_v25 = vadd.f32 %v5251_v10, %v4799_v28  ;;  %v5038_v10 = vld [vmem:[#allocation10 + $0xa0] ss:$16 sps:$4 sm:$0xff]  }
 0xbbc   :  { %2814 = vmatprep.mubr.bf16.mxu0 %v5198_v22  ;;  %2855 = vmatprep.mubr.bf16.mxu1 %v5198_v22 }
 0xbbe   :  { %2785 = vmatpush1.bf16.msra.mxu0 %v4621_v17  ;;  %2826 = vmatpush1.bf16.msra.mxu1 %v4623_v39  ;;  %v5252_v17 = vld [vmem:[#allocation24_spill] sm:$0xff] }
 0xbbf   :  { %2786 = vmatprep.subr.bf16.mxu0 %v4629_v40  ;;  %2827 = vmatprep.subr.bf16.mxu1 %v4631_v41  ;;  %v1920_v39 = vadd.f32 %v5252_v17, %v4807_v32  ;;  %v5050_v17 = vld [vmem:[#allocation10 + $0x80] ss:$16 sps:$4 sm:$0xff]  }
 0xbc2   :  { %2787 = vmatpush1.bf16.msra.mxu0 %v4633_v42  ;;  %2828 = vmatpush1.bf16.msra.mxu1 %v4635_v43  ;;  %v5253_v43 = vld [vmem:[#allocation26_spill] sm:$0xff] }
 0xbc3   :  { %2788 = vmatprep.subr.bf16.mxu0 %v4641_v12  ;;  %2829 = vmatprep.subr.bf16.mxu1 %v4643_v20  ;;  %v1993_v12 = vadd.f32 %v5253_v43, %v4817_v47  ;;  %v5065_v43 = vld [vmem:[#allocation10 + $0x68] ss:$16 sps:$4 sm:$0xff]  }
 0xbc6   :  { %2789 = vmatpush1.bf16.msra.mxu0 %v4645_v27  ;;  %2830 = vmatpush1.bf16.msra.mxu1 %v4647_v34 }
 0xbc7   :  { %2790 = vmatprep.subr.bf16.mxu0 %v4653_v35  ;;  %2831 = vmatprep.subr.bf16.mxu1 %v4655_v14 }
 0xbca   :  { %2791 = vmatpush1.bf16.msra.mxu0 %v4657_v59  ;;  %2832 = vmatpush1.bf16.msra.mxu1 %v4659_v60  ;;  %v5254_v60 = vld [vmem:[#allocation21_spill] sm:$0xff] }
 0xbcb   :  { %2792 = vmatprep.subr.bf16.mxu0 %v4665_v61  ;;  %2833 = vmatprep.subr.bf16.mxu1 %v4667_v62  ;;  %v1991_v23 = vadd.f32 %v5254_v60, %v4822_v36  ;;  %v5258_v60 = vld [vmem:[#allocation25_spill] sm:$0xff] }
 0xbce   :  { %2793 = vmatpush1.bf16.msra.mxu0 %v4669_v3  ;;  %2834 = vmatpush1.bf16.msra.mxu1 %v4671_v48 }
 0xbcf   :  { %2794 = vmatprep.subr.bf16.mxu0 %v4677_v4  ;;  %2835 = vmatprep.subr.bf16.mxu1 %v4679_v5 }
 0xbd2   :  { %2795 = vmatpush1.bf16.msra.mxu0 %v4681_v49  ;;  %2836 = vmatpush1.bf16.msra.mxu1 %v4683_v6 }
 0xbd3   :  { %2796 = vmatprep.subr.bf16.mxu0 %v4685_v50  ;;  %2837 = vmatprep.subr.bf16.mxu1 %v4687_v51 }
 0xbd6   :  { %2797 = vmatpush1.bf16.msra.mxu0 %v4693_v52  ;;  %2838 = vmatpush1.bf16.msra.mxu1 %v4695_v53 }
 0xbd7   :  { %2891 = vmatprep.subr.bf16.mxu0 %v4605_v45  ;;  %2932 = vmatprep.subr.bf16.mxu1 %v4607_v63 }
 0xc79   :  { %v2707_v33 = vpop.f32.mrf.mxu0  ;;  %v2748_v19 = vpop.f32.mrf.mxu1 }
 0xc7a   :  { %v2755_v40 = vadd.f32 %v2707_v33, %v1918_v25  ;;  %v2757_v55 = vadd.f32 %v2748_v19, %v1991_v23  ;;  %v5041_v25 = vld [vmem:[#allocation10 + $0xa8] ss:$16 sps:$4 sm:$0xff]   ;;  %v5044_v33 = vld [vmem:[#allocation10 + $0x84] ss:$16 sps:$4 sm:$0xff]   ;;  %v5047_v19 = vld [vmem:[#allocation10 + $0x8c] ss:$16 sps:$4 sm:$0xff]   ;;  %v1995_v23 = vadd.f32 %v5258_v60, %v4822_v36 }
 0xc7b   :  { %v2709_v41 = vpop.f32.mrf.mxu0  ;;  %v2750_v42 = vpop.f32.mrf.mxu1 }
 0xc7c   :  { %v2759_v20 = vmul.f32 0.5, %v2755_v40  ;;  %v2756_v27 = vadd.f32 %v2709_v41, %v1920_v39  ;;  %v2758_v35 = vadd.f32 %v2750_v42, %v1993_v12  ;;  %v2761_v30 = vmul.f32 0.5, %v2757_v55  ;;  %v5053_v39 = vld [vmem:[#allocation10 + $0x88] ss:$16 sps:$4 sm:$0xff]   ;;  %v5056_v40 = vld [vmem:[#allocation10 + $0x64] ss:$16 sps:$4 sm:$0xff]  }
 0xc7d   :  { %v2711_v34 = vpop.f32.mrf.mxu0  ;;  %v2752_v45 = vpop.f32.mrf.mxu1  ;;  %v5059_v41 = vld [vmem:[#allocation10 + $0x6c] ss:$16 sps:$4 sm:$0xff]   ;;  %v5062_v42 = vld [vmem:[#allocation10 + $0x60] ss:$16 sps:$4 sm:$0xff]  }
 0xc7e   :  { %3743 = vtanh.f32 %v2759_v20  ;;  %v2760_v63 = vmul.f32 0.5, %v2756_v27 }
 0xc7f   :  { %v2712_v14 = vpop.f32.mrf.mxu0  ;;  %v2753_v59 = vpop.f32.mrf.mxu1 }
 0xc80   :  { %3745 = vtanh.f32 %v2760_v63 }
 0xc81   :  { %3747 = vtanh.f32 %v2758_v35 }
 0xc82   :  { %3749 = vtanh.f32 %v2761_v30 }
 0xc8b   :  { %v3744_v2 = vpop.eup %3743 }
 0xc8c   :  { %v2765_v56 = vmul.f32 0.5, %v3744_v2 }
 0xc8d   :  { %v3746_v7 = vpop.eup %3745 }
 0xc8e   :  { %v2768_v44 = vadd.f32 0.5, %v2765_v56  ;;  %v2766_v21 = vmul.f32 0.5, %v3746_v7  ;;  %v3748_v31 = vpop.eup %3747 }
 0xc8f   :  { %v3750_v13 = vpop.eup %3749 }
 0xc90   :  { %v2769_v0 = vadd.f32 0.5, %v2766_v21  ;;  %v2773_v58 = vmul.f32 %v3748_v31, %v2768_v44  ;;  %v2767_v46 = vmul.f32 0.5, %v3750_v13 }
 0xc92   :  { %v2772_v18 = vmul.f32 %v2769_v0, %v4963_v8  ;;  %v2770_v29 = vadd.f32 0.5, %v2767_v46  ;;  %v5018_v8 = vld [vmem:[#allocation10 + $0xc4] ss:$16 sps:$4 sm:$0xff]  }
 0xc94   :  { %v5009_v16 = vadd.f32 %v2773_v58, %v2772_v18 }
 0xc96   :  { %3751 = vtanh.f32 %v5009_v16 }
 0xca3   :  { %v3752_v9 = vpop.eup %3751 }
 0xca4   :  { %v2776_v57 = vmul.f32 %v3752_v9, %v2770_v29 }
 0xca6   :  { %v2781_v37 = vpack.c.bf16 %v2776_v57, %v2776_v57 }
 0xca8   :  { %2815 = vmatmul.mubr.bf16.vlgmr.msra.gmra.mxu0 %v2781_v37  ;;  %2856 = vmatmul.mubr.bf16.vlgmr.msra.gmra.mxu1 %v2781_v37 }
 0xca9   :  { %2892 = vmatpush1.bf16.msra.mxu0 %v5012_v1  ;;  %2933 = vmatpush1.bf16.msra.mxu1 %v5015_v11 }
 0xcaa   :  { %2893 = vmatprep.subr.bf16.mxu0 %v5018_v8  ;;  %2934 = vmatprep.subr.bf16.mxu1 %v5021_v15 }
 0xcab   :  { %2923 = vmatprep.mubr.bf16.mxu0 %v5198_v22  ;;  %2964 = vmatprep.mubr.bf16.mxu1 %v5198_v22 }
 0xcad   :  { %2894 = vmatpush1.bf16.msra.mxu0 %v5026_v24  ;;  %2935 = vmatpush1.bf16.msra.mxu1 %v5029_v38 }
 0xcae   :  { %2895 = vmatprep.subr.bf16.mxu0 %v5032_v54  ;;  %2936 = vmatprep.subr.bf16.mxu1 %v5035_v26 }
 0xcb1   :  { %2896 = vmatpush1.bf16.msra.mxu0 %v5038_v10  ;;  %2937 = vmatpush1.bf16.msra.mxu1 %v5041_v25 }
 0xcb2   :  { %2897 = vmatprep.subr.bf16.mxu0 %v5044_v33  ;;  %2938 = vmatprep.subr.bf16.mxu1 %v5047_v19 }
 0xcb5   :  { %2898 = vmatpush1.bf16.msra.mxu0 %v5050_v17  ;;  %2939 = vmatpush1.bf16.msra.mxu1 %v5053_v39 }
 0xcb6   :  { %2899 = vmatprep.subr.bf16.mxu0 %v5056_v40  ;;  %2940 = vmatprep.subr.bf16.mxu1 %v5059_v41 }
 0xcb9   :  { %2900 = vmatpush1.bf16.msra.mxu0 %v5062_v42  ;;  %2941 = vmatpush1.bf16.msra.mxu1 %v5065_v43 }
 0xcba   :  { %2901 = vmatprep.subr.bf16.mxu0 %v4665_v61  ;;  %2942 = vmatprep.subr.bf16.mxu1 %v4667_v62  ;;  %v3833_v61 = vld [vmem:[#allocation10 + $0xe4] ss:$16 sps:$4 sm:$0xff]   ;;  %v3834_v62 = vld [vmem:[#allocation10 + $0xec] ss:$16 sps:$4 sm:$0xff]  }
 0xcbd   :  { %2902 = vmatpush1.bf16.msra.mxu0 %v4669_v3  ;;  %2943 = vmatpush1.bf16.msra.mxu1 %v4671_v48  ;;  %v5255_v3 = vld [vmem:[#allocation27_spill] sm:$0xff] }
 0xcbe   :  { %2903 = vmatprep.subr.bf16.mxu0 %v4677_v4  ;;  %2944 = vmatprep.subr.bf16.mxu1 %v4679_v5  ;;  %v1922_v48 = vadd.f32 %v5255_v3, %v4799_v28  ;;  %v5261_v3 = vld [vmem:[#allocation34_spill] sm:$0xff] }
 0xcc1   :  { %2904 = vmatpush1.bf16.msra.mxu0 %v4681_v49  ;;  %2945 = vmatpush1.bf16.msra.mxu1 %v4683_v6  ;;  %v5256_v49 = vld [vmem:[#allocation28_spill] sm:$0xff] }
 0xcc2   :  { %2905 = vmatprep.subr.bf16.mxu0 %v4685_v50  ;;  %2946 = vmatprep.subr.bf16.mxu1 %v4687_v51  ;;  %v1924_v6 = vadd.f32 %v5256_v49, %v4807_v32 }
 0xcc5   :  { %2906 = vmatpush1.bf16.msra.mxu0 %v4693_v52  ;;  %2947 = vmatpush1.bf16.msra.mxu1 %v4695_v53  ;;  %v5257_v53 = vld [vmem:[#allocation30_spill] sm:$0xff] }
 0xcc6   :  { %3000 = vmatprep.subr.bf16.mxu0 %v3833_v61  ;;  %3041 = vmatprep.subr.bf16.mxu1 %v3834_v62  ;;  %v1997_v45 = vadd.f32 %v5257_v53, %v4817_v47 }
 0xd68   :  { %v2816_v4 = vpop.f32.mrf.mxu0  ;;  %v2857_v5 = vpop.f32.mrf.mxu1 }
 0xd69   :  { %v2864_v12 = vadd.f32 %v2816_v4, %v1922_v48  ;;  %v2866_v55 = vadd.f32 %v2857_v5, %v1995_v23  ;;  %v2003_v48 = vadd.f32 %v5261_v3, %v4817_v47 }
 0xd6a   :  { %v2818_v50 = vpop.f32.mrf.mxu0  ;;  %v2859_v20 = vpop.f32.mrf.mxu1 }
 0xd6b   :  { %v2868_v51 = vmul.f32 0.5, %v2864_v12  ;;  %v2865_v27 = vadd.f32 %v2818_v50, %v1924_v6  ;;  %v2867_v59 = vadd.f32 %v2859_v20, %v1997_v45  ;;  %v2870_v30 = vmul.f32 0.5, %v2866_v55 }
 0xd6c   :  { %v2820_v52 = vpop.f32.mrf.mxu0  ;;  %v2861_v34 = vpop.f32.mrf.mxu1 }
 0xd6d   :  { %3753 = vtanh.f32 %v2868_v51  ;;  %v2869_v63 = vmul.f32 0.5, %v2865_v27  ;;  %v5262_v27 = vld [vmem:[#allocation29_spill] sm:$0xff] }
 0xd6e   :  { %v2821_v35 = vpop.f32.mrf.mxu0  ;;  %v2862_v14 = vpop.f32.mrf.mxu1  ;;  %v2001_v52 = vadd.f32 %v5262_v27, %v4822_v36 }
 0xd6f   :  { %3755 = vtanh.f32 %v2869_v63 }
 0xd70   :  { %3757 = vtanh.f32 %v2867_v59 }
 0xd71   :  { %3759 = vtanh.f32 %v2870_v30 }
 0xd7a   :  { %v3754_v2 = vpop.eup %3753 }
 0xd7b   :  { %v2874_v56 = vmul.f32 0.5, %v3754_v2 }
 0xd7c   :  { %v3756_v7 = vpop.eup %3755 }
 0xd7d   :  { %v2877_v44 = vadd.f32 0.5, %v2874_v56  ;;  %v2875_v21 = vmul.f32 0.5, %v3756_v7  ;;  %v3758_v0 = vpop.eup %3757 }
 0xd7e   :  { %v3760_v46 = vpop.eup %3759 }
 0xd7f   :  { %v2878_v31 = vadd.f32 0.5, %v2875_v21  ;;  %v2882_v18 = vmul.f32 %v3758_v0, %v2877_v44  ;;  %v2876_v29 = vmul.f32 0.5, %v3760_v46  ;;  %v3617_v46 = vld [vmem:[%s5167_s7 + $0x28] sm:$0xff]  }
 0xd81   :  { %v2881_v58 = vmul.f32 %v2878_v31, %v5009_v16  ;;  %v2879_v9 = vadd.f32 0.5, %v2876_v29  ;;  %v3836_v16 = vld [vmem:[#allocation10 + $0x4c] ss:$16 sps:$4 sm:$0xff]  }
 0xd82   :  { %v3618_v29 = vld [vmem:[%s5167_s7 + $0x20] sm:$0xff]  }
 0xd83   :  { %v5089_v13 = vadd.f32 %v2882_v18, %v2881_v58  ;;  %v3615_v58 = vld [vmem:[%s5167_s7 + $0x38] sm:$0xff]   ;;  %v3940_v18 = vmov 0.0  }
 0xd85   :  { %3761 = vtanh.f32 %v5089_v13 }
 0xd92   :  { %v3762_v57 = vpop.eup %3761 }
 0xd93   :  { %v2885_v37 = vmul.f32 %v3762_v57, %v2879_v9  ;;  %v3619_v9 = vld [vmem:[%s5167_s7 + $0x18] sm:$0xff]   ;;  %v3620_v57 = vld [vmem:[%s5167_s7 + $0x10] sm:$0xff]  }
 0xd95   :  { %v2890_v61 = vpack.c.bf16 %v2885_v37, %v2885_v37  ;;  %v3621_v37 = vld [vmem:[%s5167_s7 + $0x8] sm:$0xff]  }
 0xd97   :  { %2924 = vmatmul.mubr.bf16.vlgmr.msra.gmra.mxu0 %v2890_v61  ;;  %2965 = vmatmul.mubr.bf16.vlgmr.msra.gmra.mxu1 %v2890_v61  ;;  %v3622_v61 = vld [vmem:[%s5167_s7] sm:$0xff]  }
 0xd98   :  { %3001 = vmatpush1.bf16.msra.mxu0 %v5012_v1  ;;  %3042 = vmatpush1.bf16.msra.mxu1 %v5015_v11  ;;  %v3837_v1 = vld [vmem:[#allocation10 + $0x40] ss:$16 sps:$4 sm:$0xff]   ;;  %v3838_v11 = vld [vmem:[#allocation10 + $0x48] ss:$16 sps:$4 sm:$0xff]  }
 0xd99   :  { %3002 = vmatprep.subr.bf16.mxu0 %v5018_v8  ;;  %3043 = vmatprep.subr.bf16.mxu1 %v5021_v15  ;;  %v3839_v8 = vld [vmem:[#allocation10 + $0x24] ss:$16 sps:$4 sm:$0xff]   ;;  %v3840_v15 = vld [vmem:[#allocation10 + $0x2c] ss:$16 sps:$4 sm:$0xff]  }
 0xd9a   :  { %3032 = vmatprep.mubr.bf16.mxu0 %v5198_v22  ;;  %3073 = vmatprep.mubr.bf16.mxu1 %v5198_v22  ;;  %v3835_v22 = vld [vmem:[#allocation10 + $0x44] ss:$16 sps:$4 sm:$0xff]  }
 0xd9c   :  { %3003 = vmatpush1.bf16.msra.mxu0 %v5026_v24  ;;  %3044 = vmatpush1.bf16.msra.mxu1 %v5029_v38  ;;  %v3841_v24 = vld [vmem:[#allocation10 + $0x20] ss:$16 sps:$4 sm:$0xff]   ;;  %v3842_v38 = vld [vmem:[#allocation10 + $0x28] ss:$16 sps:$4 sm:$0xff]  }
 0xd9d   :  { %3004 = vmatprep.subr.bf16.mxu0 %v5032_v54  ;;  %3045 = vmatprep.subr.bf16.mxu1 %v5035_v26  ;;  %v3843_v54 = vld [vmem:[#allocation10 + $0x4] ss:$16 sps:$4 sm:$0xff]   ;;  %v3844_v26 = vld [vmem:[#allocation10 + $0xc] ss:$16 sps:$4 sm:$0xff]  }
 0xda0   :  { %3005 = vmatpush1.bf16.msra.mxu0 %v5038_v10  ;;  %3046 = vmatpush1.bf16.msra.mxu1 %v5041_v25  ;;  %v3845_v10 = vld [vmem:[#allocation10] ss:$16 sps:$4 sm:$0xff]   ;;  %v3846_v25 = vld [vmem:[#allocation10 + $0x8] ss:$16 sps:$4 sm:$0xff]  }
 0xda1   :  { %3006 = vmatprep.subr.bf16.mxu0 %v5044_v33  ;;  %3047 = vmatprep.subr.bf16.mxu1 %v5047_v19  ;;  %v5259_v33 = vld [vmem:[#allocation31_spill] sm:$0xff] }
 0xda2   :  { %v1928_v19 = vadd.f32 %v5259_v33, %v4799_v28 }
 0xda4   :  { %3007 = vmatpush1.bf16.msra.mxu0 %v5050_v17  ;;  %3048 = vmatpush1.bf16.msra.mxu1 %v5053_v39 }
 0xda5   :  { %3008 = vmatprep.subr.bf16.mxu0 %v5056_v40  ;;  %3049 = vmatprep.subr.bf16.mxu1 %v5059_v41  ;;  %v5260_v40 = vld [vmem:[#allocation32_spill] sm:$0xff] }
 0xda6   :  { %v1930_v41 = vadd.f32 %v5260_v40, %v4807_v32 }
 0xda8   :  { %3009 = vmatpush1.bf16.msra.mxu0 %v5062_v42  ;;  %3050 = vmatpush1.bf16.msra.mxu1 %v5065_v43 }
 0xda9   :  { %3010 = vmatprep.subr.bf16.mxu0 %v3835_v22  ;;  %3051 = vmatprep.subr.bf16.mxu1 %v3836_v16  ;;  %v5263_v22 = vld [vmem:[#allocation33_spill] sm:$0xff] }
 0xdaa   :  { %v1932_v16 = vadd.f32 %v5263_v22, %v4799_v28 }
 0xdac   :  { %3011 = vmatpush1.bf16.msra.mxu0 %v3837_v1  ;;  %3052 = vmatpush1.bf16.msra.mxu1 %v3838_v11 }
 0xdad   :  { %3012 = vmatprep.subr.bf16.mxu0 %v3839_v8  ;;  %3053 = vmatprep.subr.bf16.mxu1 %v3840_v15  ;;  %v5264_v8 = vld [vmem:[#allocation35_spill] sm:$0xff] }
 0xdae   :  { %v1934_v15 = vadd.f32 %v5264_v8, %v4807_v32 }
 0xdb0   :  { %3013 = vmatpush1.bf16.msra.mxu0 %v3841_v24  ;;  %3054 = vmatpush1.bf16.msra.mxu1 %v3842_v38 }
 0xdb1   :  { %3014 = vmatprep.subr.bf16.mxu0 %v3843_v54  ;;  %3055 = vmatprep.subr.bf16.mxu1 %v3844_v26  ;;  %v5265_v26 = vld [vmem:[#allocation36_spill] sm:$0xff] }
 0xdb4   :  { %3015 = vmatpush1.bf16.msra.mxu0 %v3845_v10  ;;  %3056 = vmatpush1.bf16.msra.mxu1 %v3846_v25  ;;  %v2007_v10 = vadd.f32 %v5265_v26, %v4817_v47 }
 0xdb5   :  { %3386 = vmatprep.subr.bf16.mxu0 %v3940_v18 }
 0xe57   :  { %v2925_v17 = vpop.f32.mrf.mxu0  ;;  %v2966_v39 = vpop.f32.mrf.mxu1 }
 0xe58   :  { %v2973_v42 = vadd.f32 %v2925_v17, %v1928_v19  ;;  %v2975_v34 = vadd.f32 %v2966_v39, %v2001_v52 }
 0xe59   :  { %v2927_v43 = vpop.f32.mrf.mxu0  ;;  %v2968_v62 = vpop.f32.mrf.mxu1 }
 0xe5a   :  { %v2977_v4 = vmul.f32 0.5, %v2973_v42  ;;  %v2974_v5 = vadd.f32 %v2927_v43, %v1930_v41  ;;  %v2976_v50 = vadd.f32 %v2968_v62, %v2003_v48  ;;  %v2979_v53 = vmul.f32 0.5, %v2975_v34  ;;  %v5266_v42 = vld [vmem:[#allocation15_spill] sm:$0xff] }
 0xe5b   :  { %v2929_v49 = vpop.f32.mrf.mxu0  ;;  %v2970_v6 = vpop.f32.mrf.mxu1  ;;  %v2005_v32 = vadd.f32 %v5266_v42, %v4822_v36 }
 0xe5c   :  { %3763 = vtanh.f32 %v2977_v4  ;;  %v2978_v12 = vmul.f32 0.5, %v2974_v5 }
 0xe5d   :  { %v2930_v20 = vpop.f32.mrf.mxu0  ;;  %v2971_v51 = vpop.f32.mrf.mxu1 }
 0xe5e   :  { %3765 = vtanh.f32 %v2978_v12 }
 0xe5f   :  { %3767 = vtanh.f32 %v2976_v50 }
 0xe60   :  { %3769 = vtanh.f32 %v2979_v53 }
 0xe69   :  { %v3764_v45 = vpop.eup %3763 }
 0xe6a   :  { %v2983_v63 = vmul.f32 0.5, %v3764_v45  ;;  %v3368_v45 = vld [vmem:[#allocation4] ss:$0 sm:$0xff] }
 0xe6b   :  { %v3766_v35 = vpop.eup %3765 }
 0xe6c   :  { %v2986_v14 = vadd.f32 0.5, %v2983_v63  ;;  %v2984_v59 = vmul.f32 0.5, %v3766_v35  ;;  %v3768_v60 = vpop.eup %3767 }
 0xe6d   :  { %v3770_v56 = vpop.eup %3769 }
 0xe6e   :  { %v2987_v23 = vadd.f32 0.5, %v2984_v59  ;;  %v2991_v55 = vmul.f32 %v3768_v60, %v2986_v14  ;;  %v2985_v7 = vmul.f32 0.5, %v3770_v56 }
 0xe70   :  { %v2990_v30 = vmul.f32 %v2987_v23, %v5089_v13  ;;  %v2988_v44 = vadd.f32 0.5, %v2985_v7  ;;  %v3616_v13 = vld [vmem:[%s5167_s7 + $0x30] sm:$0xff]  }
 0xe72   :  { %v5121_v2 = vadd.f32 %v2991_v55, %v2990_v30 }
 0xe74   :  { %3771 = vtanh.f32 %v5121_v2 }
 0xe81   :  { %v3772_v21 = vpop.eup %3771 }
 0xe82   :  { %v2994_v31 = vmul.f32 %v3772_v21, %v2988_v44 }
 0xe84   :  { %v2999_v0 = vpack.c.bf16 %v2994_v31, %v2994_v31 }
 0xe86   :  { %3033 = vmatmul.mubr.bf16.vlgmr.msra.gmra.mxu0 %v2999_v0  ;;  %3074 = vmatmul.mubr.bf16.vlgmr.msra.gmra.mxu1 %v2999_v0 }
 0xe87   :  { %3387 = vmatpush3.bf16.msra.mxu0 %v3615_v58  ;;  %3402 = vmatprep.mubr.msk.bf16.mxu0 %vm3941_vm0, %v3940_v18 }
 0xe88   :  { %3388 = vmatprep.subr.bf16.mxu0 %v3940_v18 }
 0xe8b   :  { %3389 = vmatpush3.bf16.msra.mxu0 %v3616_v13 }
 0xe8c   :  { %3390 = vmatprep.subr.bf16.mxu0 %v3940_v18 }
 0xe8f   :  { %3391 = vmatpush3.bf16.msra.mxu0 %v3617_v46 }
 0xe90   :  { %3392 = vmatprep.subr.bf16.mxu0 %v3940_v18 }
 0xe93   :  { %3393 = vmatpush3.bf16.msra.mxu0 %v3618_v29 }
 0xe94   :  { %3394 = vmatprep.subr.bf16.mxu0 %v3940_v18 }
 0xe97   :  { %3395 = vmatpush3.bf16.msra.mxu0 %v3619_v9 }
 0xe98   :  { %3396 = vmatprep.subr.bf16.mxu0 %v3940_v18 }
 0xe9b   :  { %3397 = vmatpush3.bf16.msra.mxu0 %v3620_v57 }
 0xe9c   :  { %3398 = vmatprep.subr.bf16.mxu0 %v3940_v18 }
 0xe9f   :  { %3399 = vmatpush3.bf16.msra.mxu0 %v3621_v37 }
 0xea0   :  { %3400 = vmatprep.subr.bf16.mxu0 %v3940_v18 }
 0xea3   :  { %3401 = vmatpush3.bf16.msra.mxu0 %v3622_v61 }
 0xf46   :  { %v3034_v1 = vpop.f32.mrf.mxu0  ;;  %v3075_v11 = vpop.f32.mrf.mxu1 }
 0xf47   :  { %v3082_v24 = vadd.f32 %v3034_v1, %v1932_v16  ;;  %v3084_v43 = vadd.f32 %v3075_v11, %v2005_v32 }
 0xf48   :  { %v3036_v38 = vpop.f32.mrf.mxu0  ;;  %v3077_v54 = vpop.f32.mrf.mxu1 }
 0xf49   :  { %v3086_v25 = vmul.f32 0.5, %v3082_v24  ;;  %v3083_v33 = vadd.f32 %v3036_v38, %v1934_v15  ;;  %v3085_v40 = vadd.f32 %v3077_v54, %v2007_v10  ;;  %v3088_v62 = vmul.f32 0.5, %v3084_v43 }
 0xf4a   :  { %v3038_v19 = vpop.f32.mrf.mxu0  ;;  %v3079_v17 = vpop.f32.mrf.mxu1 }
 0xf4b   :  { %3773 = vtanh.f32 %v3086_v25  ;;  %v3087_v39 = vmul.f32 0.5, %v3083_v33 }
 0xf4c   :  { %v3039_v41 = vpop.f32.mrf.mxu0  ;;  %v3080_v28 = vpop.f32.mrf.mxu1 }
 0xf4d   :  { %3775 = vtanh.f32 %v3087_v39 }
 0xf4e   :  { %3777 = vtanh.f32 %v3085_v40 }
 0xf4f   :  { %3779 = vtanh.f32 %v3088_v62 }
 0xf58   :  { %v3774_v3 = vpop.eup %3773 }
 0xf59   :  { %v3092_v48 = vmul.f32 0.5, %v3774_v3 }
 0xf5a   :  { %v3776_v4 = vpop.eup %3775 }
 0xf5b   :  { %v3095_v47 = vadd.f32 0.5, %v3092_v48  ;;  %v3093_v5 = vmul.f32 0.5, %v3776_v4  ;;  %v3778_v49 = vpop.eup %3777 }
 0xf5c   :  { %v3780_v51 = vpop.eup %3779 }
 0xf5d   :  { %v3096_v6 = vadd.f32 0.5, %v3093_v5  ;;  %v3100_v12 = vmul.f32 %v3778_v49, %v3095_v47  ;;  %v3094_v27 = vmul.f32 0.5, %v3780_v51 }
 0xf5f   :  { %v3099_v50 = vmul.f32 %v3096_v6, %v5121_v2  ;;  %v3097_v52 = vadd.f32 0.5, %v3094_v27 }
 0xf61   :  { %v3101_v20 = vadd.f32 %v3100_v12, %v3099_v50 }
 0xf63   :  { %3781 = vtanh.f32 %v3101_v20 }
 0xf70   :  { %v3782_v34 = vpop.eup %3781 }
 0xf71   :  { %v3103_v36 = vmul.f32 %v3782_v34, %v3097_v52 }
 0xf73   :  { %v3104_v53 = vpack.c.bf16 %v3103_v36, %v3103_v36 }
 0xf75   :  { %3403 = vmatmul.mubr.bf16.vlgmr.msra.gmra.mxu0 %v3104_v53 }
0x1035   :  { %v3210_v63 = vpop.f32.mrf.mxu0 }
0x1036   :  { %v3211_v35 = vadd.f32 %v3368_v45, %v3210_v63 }
0x1037   :  { %v3404_v14 = vpop.f32.mrf.mxu0 }
0x1038   :  { %3217 = vst.msk [vmem:[%s5169_s9] sm:$0xff] %vm3216_vm1, %v3211_v35 }
0x1039   :  { %v3213_v59 = vpop.f32.mrf.mxu0 }
0x103b   :  { %v3405_v60 = vpop.f32.mrf.mxu0 }
0x103c   :  { %3222 = vsyncpa [#allocation6], 1 }
0x103d   :  { %3223 = vsyncpa [#allocation8], 1 }
0x103e   :  { %3224 = vsyncpa [#allocation11], 1 }

</bundles_post_ra>
